<compile_context>
chip_gen: v7x
topology: tpu7x:2x2x1
jax: 0.10.0
libtpu: 0.0.40
codegen_flags: <defaults>
</compile_context>

<pallas_src>
import numpy as np
import jax
import jax.numpy as jnp
from jax.experimental import pallas as pl
from jax.experimental.pallas import tpu as pltpu

# ----------------------------- configuration ------------------------------
B = 2
NV1 = 64           # number of input vertices
NV2 = 64           # number of output vertices
BNECK = 32
VS = [64, 32, 16]  # per-block Linear (length) sizes
FS = [8, 16, 32]   # per-block conv channel sizes
SPLIT_IDX = -1
LEAKY_SLOPE = 0.01
BN_EPS = 1e-5

_VMEM = pl.BlockSpec(memory_space=pltpu.MemorySpace.VMEM)


def _ceil8(n):
    return ((n + 7) // 8) * 8


# ------------------------------ static plan --------------------------------
def _build_plan():
    enc_vs = [NV1] + VS
    enc_fs = [3] + FS
    enc = []
    for v1, v2, f1, f2 in zip(enc_vs[:-1], enc_vs[1:], enc_fs[:-1], enc_fs[1:]):
        enc.append(dict(L=v1, M=v2, cin=f1, cout=f2, act=True, bn=True,
                        skip=None, tconv=False))

    dec = []
    vs_d1 = VS[::-1][:SPLIT_IDX]
    fs_d1 = FS[::-1][:SPLIT_IDX]
    ms = [1] + [2] * len(fs_d1[2:])
    for v1, v2, f1, f2, m in zip(vs_d1[:-1], vs_d1[1:], fs_d1[:-1], fs_d1[1:], ms):
        dec.append(dict(L=v1, M=v2, cin=f1 * m, cout=f2, act=True, bn=True,
                        tconv=True))
    vs_d2 = VS[::-1][SPLIT_IDX - 1:] + [NV2]
    fs_d2 = FS[::-1][SPLIT_IDX - 1:] + [3]
    ends = [0] * len(fs_d2[2:]) + [1]
    for v1, v2, f1, f2, end in zip(vs_d2[:-1], vs_d2[1:], fs_d2[:-1], fs_d2[1:], ends):
        dec.append(dict(L=v1, M=v2, cin=f1 * 2, cout=f2,
                        act=not end, bn=not end, tconv=True))

    # MeshUNet.forward skip wiring: the i-th TConvBlock (0 < i < #skips)
    # concatenates skips[-i-1].
    n_skips = len(enc)
    for i, blk in enumerate(dec):
        blk['skip'] = (n_skips - i - 1) if 0 < i < n_skips else None
    return enc, dec


ENC_PLAN, DEC_PLAN = _build_plan()


# ------------------------- parameter slab packing ---------------------------
class _Packer:
    """Packs many small 2-D f32 arrays into one (rows, width) slab.
    Every piece starts at a sublane-aligned (multiple-of-8) row offset."""

    def __init__(self, width):
        self.width = width
        self.rows = 0
        self.pieces = []
        self.index = {}

    def add(self, name, arr):
        arr = np.asarray(arr, np.float32)
        assert arr.ndim == 2 and arr.shape[1] <= self.width, (name, arr.shape)
        nr, nc = arr.shape
        rpad = _ceil8(nr)
        buf = np.zeros((rpad, self.width), np.float32)
        buf[:nr, :nc] = arr
        self.index[name] = (self.rows, nr, nc)
        self.pieces.append(buf)
        self.rows += rpad

    def finalize(self):
        return jnp.asarray(np.concatenate(self.pieces, axis=0))


def _uniform(key, shape, fan_in):
    bound = 1.0 / np.sqrt(fan_in)
    return jax.random.uniform(key, shape, jnp.float32, -bound, bound)


def make_params(key):
    keys = iter(jax.random.split(key, 128))
    wide = _Packer(128)    # shift-fused length matrices A_k, per-block biases
    narrow = _Packer(32)   # tap matrices, BN affine columns, bottleneck consts

    def block_params(cfg, bi):
        cin, cout, L, M = cfg['cin'], cfg['cout'], cfg['L'], cfg['M']
        if cfg['tconv']:
            # ConvTranspose1d(k=3,s=1,p=1) == Conv1d(p=1) with
            # W'[o,c,k] = Wt[c,o,2-k]  ->  taps[k][c,o] = Wt[c,o,2-k]
            wt = _uniform(next(keys), (cin, cout, 3), cin * 3)
            taps = jnp.transpose(wt[:, :, ::-1], (2, 0, 1))      # (3, cin, cout)
        else:
            wc = _uniform(next(keys), (cout, cin, 3), cin * 3)   # Conv1d (Cout,Cin,3)
            taps = jnp.transpose(wc, (2, 1, 0))                  # (3, cin, cout)
        bc = _uniform(next(keys), (cout,), cin * 3)
        wdown = _uniform(next(keys), (M, L), L)                  # Linear weight (out,in)
        bdown = _uniform(next(keys), (M,), L)
        gamma = jnp.ones((cout,), jnp.float32)
        beta = jnp.zeros((cout,), jnp.float32)

        # ---- kernel form: channels on sublanes (zero-padded to %8), length on lanes
        taps_np = np.asarray(taps)
        wdown_np = np.asarray(wdown)
        cout_p = _ceil8(cout)
        ch_s = ENC_PLAN[cfg['skip']]['cout'] if cfg['skip'] is not None else 0
        ch_h = cin - ch_s
        ch_h_p = _ceil8(ch_h)
        for k in range(3):
            tk = taps_np[k].T                                    # (cout, cin)
            th = np.zeros((cout_p, ch_h_p), np.float32)
            th[:cout, :ch_h] = tk[:, :ch_h]
            narrow.add(f"Th{bi}_{k}", th)
            if ch_s:
                ts = np.zeros((cout_p, ch_s), np.float32)        # ch_s already %8 == 0
                ts[:cout, :] = tk[:, ch_h:]
                narrow.add(f"Ts{bi}_{k}", ts)

        # fold conv padding/shift + the length-Linear into three (B*L, B*M) mats
        R = B * L
        wd_blk = np.kron(np.eye(B, dtype=np.float32), wdown_np)  # (B*M, B*L)
        r = np.arange(R)
        s_prev = np.zeros((R, R), np.float32)
        ok = (r % L) != 0
        s_prev[r[ok], r[ok] - 1] = 1.0                           # picks x[l-1]
        s_next = np.zeros((R, R), np.float32)
        ok = (r % L) != (L - 1)
        s_next[r[ok], r[ok] + 1] = 1.0                           # picks x[l+1]
        for k, a in enumerate((wd_blk @ s_prev, wd_blk, wd_blk @ s_next)):
            wide.add(f"A{bi}_{k}", a.T)                          # (B*L, B*M)

        rs = wdown_np.sum(axis=1)                                # (M,)
        bias = np.zeros((cout_p, B * M), np.float32)
        bias[:cout, :] = (np.asarray(bc)[:, None] * np.tile(rs, B)[None, :]
                          + np.tile(np.asarray(bdown), B)[None, :])
        wide.add(f"b{bi}", bias)

        if cfg['bn']:
            g = np.zeros((cout_p, 1), np.float32)
            g[:cout, 0] = np.asarray(gamma)
            bt = np.zeros((cout_p, 1), np.float32)
            bt[:cout, 0] = np.asarray(beta)
            narrow.add(f"g{bi}", g)
            narrow.add(f"be{bi}", bt)

        return dict(taps=taps, bc=bc, wdown=wdown, bdown=bdown,
                    gamma=gamma, beta=beta)

    enc_raw = [block_params(cfg, i) for i, cfg in enumerate(ENC_PLAN)]
    dec_raw = [block_params(cfg, len(ENC_PLAN) + i) for i, cfg in enumerate(DEC_PLAN)]

    # ---------------------------- bottleneck ---------------------------------
    cc, vv, J = FS[-1], VS[-1], BNECK
    flat = cc * vv
    w_enc = _uniform(next(keys), (J, flat), flat)
    b_enc = _uniform(next(keys), (J,), flat)
    w_dec1 = _uniform(next(keys), (flat, J), J)
    b_dec1 = _uniform(next(keys), (flat,), J)

    # All selector / mask matrices are BUILD-TIME constants (no in-kernel iota).
    we = np.asarray(w_enc).reshape(J, cc, vv)                    # We[j, c, u]
    narrow.add("wmix_u", np.transpose(we, (2, 0, 1)).reshape(vv * J, cc))
    cols = np.arange(B * vv)
    rows = np.arange(vv * J)
    narrow.add("mask_enc",
               ((rows[:, None] // J) == (cols[None, :] % vv)).astype(np.float32))
    rows = np.arange(vv * cc)
    narrow.add("mask_dec",
               ((rows[:, None] // cc) == (cols[None, :] % vv)).astype(np.float32))
    sel = np.zeros((B * vv, B), np.float32)
    for b in range(B):
        sel[b * vv:(b + 1) * vv, b] = 1.0
    narrow.add("selB2b", sel)                                    # (B*vv, B)
    narrow.add("selBexp", sel.T)                                 # (B, B*vv)
    narrow.add("benc_col", np.asarray(b_enc).reshape(J, 1))
    wd1 = np.asarray(w_dec1).reshape(cc, vv, J)
    narrow.add("wdec1p", np.transpose(wd1, (1, 0, 2)).reshape(vv * cc, J))
    narrow.add("bd1_t", np.tile(np.asarray(b_dec1).reshape(cc, vv), (1, B)))

    return dict(enc=enc_raw, dec=dec_raw,
                w_enc=w_enc, b_enc=b_enc, w_dec1=w_dec1, b_dec1=b_dec1,
                slab_wide=wide.finalize(), slab_narrow=narrow.finalize(),
                wide_idx=dict(wide.index), narrow_idx=dict(narrow.index))


# ------------------------------- kernel body --------------------------------
def _build_kernel(wide_idx, narrow_idx):
    n_enc = len(ENC_PLAN)
    cc, vv, J = FS[-1], VS[-1], BNECK

    def kernel(x_ref, wide_ref, narrow_ref, out_ref):
        def wide(name):
            r0, nr, nc = wide_idx[name]
            return wide_ref[r0:r0 + nr, 0:nc]

        def narrow(name):
            r0, nr, nc = narrow_idx[name]
            return narrow_ref[r0:r0 + nr, 0:nc]

        def block(h, skip, bi, cfg):
            # (C, B*L) activations: 3 tap matmuls (+ split-contraction skip)
            # followed by 3 accumulating shift-fused length matmuls.
            z = None
            for k in range(3):
                u = jnp.dot(narrow(f"Th{bi}_{k}"), h,
                            preferred_element_type=jnp.float32)
                if skip is not None:
                    u = u + jnp.dot(narrow(f"Ts{bi}_{k}"), skip,
                                    preferred_element_type=jnp.float32)
                t = jnp.dot(u, wide(f"A{bi}_{k}"),
                            preferred_element_type=jnp.float32)
                z = t if z is None else z + t
            z = z + wide(f"b{bi}")
            if cfg['act']:
                z = jnp.where(z >= 0, z, LEAKY_SLOPE * z)
            if cfg['bn']:
                # training-mode BatchNorm1d: per-channel (per-row) stats over
                # all (batch, length) lanes; two-pass centered variance.
                inv_n = 1.0 / z.shape[1]
                mu = jnp.sum(z, axis=1, keepdims=True) * inv_n
                xc = z - mu
                var = jnp.sum(xc * xc, axis=1, keepdims=True) * inv_n
                z = (xc * jax.lax.rsqrt(var + BN_EPS) * narrow(f"g{bi}")
                     + narrow(f"be{bi}"))
            return z

        h = x_ref[...]                                  # (8, B*NV1); rows 3..7 == 0
        skips = []
        for i, cfg in enumerate(ENC_PLAN):
            h = block(h, None, i, cfg)
            skips.append(h)                             # Dropout(p=0) == identity

        # ---- bottleneck: Flatten -> Linear(bneck) -> Linear -> Reshape -----
        # Selector/mask matrices come precomputed from the slab; the only
        # in-kernel rearrangement is static, sublane-aligned row-group sums.
        p1 = jnp.dot(narrow("wmix_u"), h, preferred_element_type=jnp.float32)
        m1 = p1 * narrow("mask_enc")                    # keep u == v
        s1 = m1[0:J, :]
        for u in range(1, vv):
            s1 = s1 + m1[u * J:(u + 1) * J, :]
        bneck_t = (jnp.dot(s1, narrow("selB2b"), preferred_element_type=jnp.float32)
                   + narrow("benc_col"))                # (J, B)
        p2 = jnp.dot(narrow("wdec1p"), bneck_t,
                     preferred_element_type=jnp.float32)  # (vv*cc, B)
        e = (jnp.dot(p2, narrow("selBexp"), preferred_element_type=jnp.float32)
             * narrow("mask_dec"))                      # (vv*cc, B*vv)
        g = e[0:cc, :]
        for v in range(1, vv):
            g = g + e[v * cc:(v + 1) * cc, :]
        h = g + narrow("bd1_t")                         # (cc, B*vv)

        for i, cfg in enumerate(DEC_PLAN):
            bi = n_enc + i
            skip = skips[cfg['skip']] if cfg['skip'] is not None else None
            h = block(h, skip, bi, cfg)

        out_ref[...] = h                                # (8, B*NV2), lane-dense

    return kernel


# ------------------------------ Pallas wrapper ------------------------------
def _cost_estimate(params):
    macs = 0
    for cfg in ENC_PLAN + DEC_PLAN:
        BL, BM = B * cfg['L'], B * cfg['M']
        cout_p = _ceil8(cfg['cout'])
        ch_s = ENC_PLAN[cfg['skip']]['cout'] if cfg['skip'] is not None else 0
        ch_h = _ceil8(cfg['cin'] - ch_s)
        macs += 3 * cout_p * (ch_h + ch_s) * BL + 3 * cout_p * BL * BM
    cc, vv, J = FS[-1], VS[-1], BNECK
    macs += vv * J * cc * (B * vv) + J * (B * vv) * B + vv * cc * J * B \
        + vv * cc * B * (B * vv)
    bytes_acc = 4 * (int(params['slab_wide'].size) + int(params['slab_narrow'].size)
                     + 8 * B * NV1 + 8 * B * NV2)
    return pl.CostEstimate(flops=int(2 * macs), transcendentals=256,
                           bytes_accessed=int(bytes_acc))


def pallas_forward(x, params):
    # (B, NV1, 3) -> channels-on-sublanes, batch-folded-length-on-lanes layout
    # (Permute(1,0) + batch fold), zero-padded from 3 to 8 channel rows.
    xt = jnp.transpose(x.astype(jnp.float32), (2, 0, 1)).reshape(3, B * NV1)
    x_pad = jnp.pad(xt, ((0, 5), (0, 0)))

    kernel = _build_kernel(params['wide_idx'], params['narrow_idx'])

    # TODO(synk): add a leading "parallel" grid axis over independent mesh
    # instances to use the second v7x TensorCore; a single B=2 forward is
    # coupled by training-mode BatchNorm so it stays gridless here.
    out = pl.pallas_call(
        kernel,
        out_shape=jax.ShapeDtypeStruct((8, B * NV2), jnp.float32),
        in_specs=[_VMEM, _VMEM, _VMEM],
        out_specs=_VMEM,
        cost_estimate=_cost_estimate(params),
    )(x_pad, params['slab_wide'], params['slab_narrow'])

    y = out[0:3, :].reshape(3, B, NV2)
    return jnp.transpose(y, (1, 2, 0)).astype(x.dtype)


# --------------------------- pure-JAX reference -----------------------------
def _ref_block(h, p, cfg):
    L = h.shape[2]
    taps = p['taps']
    hp = jnp.pad(h, ((0, 0), (0, 0), (1, 1)))
    y = sum(jnp.einsum('bcl,co->bol', hp[:, :, k:k + L], taps[k]) for k in range(3))
    y = y + p['bc'][None, :, None]
    z = jnp.einsum('bol,ml->bom', y, p['wdown']) + p['bdown'][None, None, :]
    if cfg['act']:
        z = jnp.where(z >= 0, z, LEAKY_SLOPE * z)
    if cfg['bn']:
        mu = jnp.mean(z, axis=(0, 2), keepdims=True)
        var = jnp.mean((z - mu) ** 2, axis=(0, 2), keepdims=True)
        z = (z - mu) * jax.lax.rsqrt(var + BN_EPS)
        z = z * p['gamma'][None, :, None] + p['beta'][None, :, None]
    return z


def ref_forward(x, params):
    h = jnp.transpose(x.astype(jnp.float32), (0, 2, 1))          # (B, 3, NV1)
    skips = []
    for p, cfg in zip(params['enc'], ENC_PLAN):
        h = _ref_block(h, p, cfg)
        skips.append(h)
    f = h.reshape(B, -1)                                          # Flatten
    bneck = f @ params['w_enc'].T + params['b_enc']
    d = bneck @ params['w_dec1'].T + params['b_dec1']
    h = d.reshape(B, FS[-1], VS[-1])                              # Reshape(fs[0], vs[0])
    for p, cfg in zip(params['dec'], DEC_PLAN):
        if cfg['skip'] is not None:
            h = jnp.concatenate([h, skips[cfg['skip']]], axis=1)
        h = _ref_block(h, p, cfg)
    return jnp.transpose(h, (0, 2, 1)).astype(x.dtype)            # Permute(1,0)


# ---------------------------------- main -----------------------------------
if __name__ == "__main__":
    key = jax.random.PRNGKey(0)
    kp, kx = jax.random.split(key)
    params = make_params(kp)
    x = jax.random.normal(kx, (B, NV1, 3), jnp.float32)

    fwd = jax.jit(lambda xx: pallas_forward(xx, params))
    out = jax.block_until_ready(fwd(x))

    ref = ref_forward(x, params)
    assert out.shape == (B, NV2, 3) and out.dtype == x.dtype
    np.testing.assert_allclose(np.asarray(out), np.asarray(ref),
                               rtol=5e-2, atol=5e-2)
    print("KERNEL_OK")
</pallas_src>

<mosaic_0001>
module attributes {stable_mosaic.version = 11 : i64} {
  func.func @kernel(%arg0: memref<8x128xf32, #tpu.memory_space<vmem>>, %arg1: memref<1720x128xf32, #tpu.memory_space<vmem>>, %arg2: memref<2624x32xf32, #tpu.memory_space<vmem>>, %arg3: memref<8x128xf32, #tpu.memory_space<vmem>>) attributes {dimension_semantics = [], scalar_prefetch = 0 : i64, scratch_operands = 0 : i64, tpu.core_type = #tpu.core_type<tc>} {
    %c0 = arith.constant 0 : index
    %c0_0 = arith.constant 0 : index
    %0 = vector.load %arg0[%c0, %c0_0] : memref<8x128xf32, #tpu.memory_space<vmem>>, vector<8x128xf32>
    %c0_1 = arith.constant 0 : index
    %c0_2 = arith.constant 0 : index
    %1 = vector.load %arg2[%c0_1, %c0_2] : memref<2624x32xf32, #tpu.memory_space<vmem>>, vector<8x8xf32>
    %cst = arith.constant dense<0.000000e+00> : vector<8x128xf32>
    %2 = tpu.matmul %1, %0, %cst {dimension_numbers = #tpu.dot_dimension_numbers<[1], [0], [0], [1], [0, 0, 1, 1], [], []>} : vector<8x8xf32>, vector<8x128xf32>, vector<8x128xf32> -> vector<8x128xf32>
    %c0_3 = arith.constant 0 : index
    %c0_4 = arith.constant 0 : index
    %3 = vector.load %arg1[%c0_3, %c0_4] : memref<1720x128xf32, #tpu.memory_space<vmem>>, vector<128x128xf32>
    %cst_5 = arith.constant dense<0.000000e+00> : vector<8x128xf32>
    %4 = tpu.matmul %2, %3, %cst_5 {dimension_numbers = #tpu.dot_dimension_numbers<[1], [0], [0], [1], [0, 0, 1, 1], [], []>} : vector<8x128xf32>, vector<128x128xf32>, vector<8x128xf32> -> vector<8x128xf32>
    %c8 = arith.constant 8 : index
    %c0_6 = arith.constant 0 : index
    %5 = vector.load %arg2[%c8, %c0_6] : memref<2624x32xf32, #tpu.memory_space<vmem>>, vector<8x8xf32>
    %cst_7 = arith.constant dense<0.000000e+00> : vector<8x128xf32>
    %6 = tpu.matmul %5, %0, %cst_7 {dimension_numbers = #tpu.dot_dimension_numbers<[1], [0], [0], [1], [0, 0, 1, 1], [], []>} : vector<8x8xf32>, vector<8x128xf32>, vector<8x128xf32> -> vector<8x128xf32>
    %c128 = arith.constant 128 : index
    %c0_8 = arith.constant 0 : index
    %7 = vector.load %arg1[%c128, %c0_8] : memref<1720x128xf32, #tpu.memory_space<vmem>>, vector<128x128xf32>
    %cst_9 = arith.constant dense<0.000000e+00> : vector<8x128xf32>
    %8 = tpu.matmul %6, %7, %cst_9 {dimension_numbers = #tpu.dot_dimension_numbers<[1], [0], [0], [1], [0, 0, 1, 1], [], []>} : vector<8x128xf32>, vector<128x128xf32>, vector<8x128xf32> -> vector<8x128xf32>
    %9 = arith.addf %4, %8 : vector<8x128xf32>
    %c16 = arith.constant 16 : index
    %c0_10 = arith.constant 0 : index
    %10 = vector.load %arg2[%c16, %c0_10] : memref<2624x32xf32, #tpu.memory_space<vmem>>, vector<8x8xf32>
    %cst_11 = arith.constant dense<0.000000e+00> : vector<8x128xf32>
    %11 = tpu.matmul %10, %0, %cst_11 {dimension_numbers = #tpu.dot_dimension_numbers<[1], [0], [0], [1], [0, 0, 1, 1], [], []>} : vector<8x8xf32>, vector<8x128xf32>, vector<8x128xf32> -> vector<8x128xf32>
    %c256 = arith.constant 256 : index
    %c0_12 = arith.constant 0 : index
    %12 = vector.load %arg1[%c256, %c0_12] : memref<1720x128xf32, #tpu.memory_space<vmem>>, vector<128x128xf32>
    %cst_13 = arith.constant dense<0.000000e+00> : vector<8x128xf32>
    %13 = tpu.matmul %11, %12, %cst_13 {dimension_numbers = #tpu.dot_dimension_numbers<[1], [0], [0], [1], [0, 0, 1, 1], [], []>} : vector<8x128xf32>, vector<128x128xf32>, vector<8x128xf32> -> vector<8x128xf32>
    %14 = arith.addf %9, %13 : vector<8x128xf32>
    %c384 = arith.constant 384 : index
    %c0_14 = arith.constant 0 : index
    %15 = vector.load %arg1[%c384, %c0_14] : memref<1720x128xf32, #tpu.memory_space<vmem>>, vector<8x128xf32>
    %16 = arith.addf %14, %15 : vector<8x128xf32>
    %cst_15 = arith.constant 0.000000e+00 : f32
    %17 = vector.broadcast %cst_15 : f32 to vector<8x128xf32>
    %18 = arith.cmpf oge, %16, %17 : vector<8x128xf32>
    %cst_16 = arith.constant 0.00999999977 : f32
    %19 = vector.broadcast %cst_16 : f32 to vector<8x128xf32>
    %20 = arith.mulf %19, %16 : vector<8x128xf32>
    %21 = arith.select %18, %16, %20 : vector<8x128xi1>, vector<8x128xf32>
    %cst_17 = arith.constant dense<0.000000e+00> : vector<8xf32>
    %22 = vector.multi_reduction <add>, %21, %cst_17 [1] : vector<8x128xf32> to vector<8xf32>
    %23 = vector.shape_cast %22 : vector<8xf32> to vector<8x1xf32>
    %cst_18 = arith.constant 7.812500e-03 : f32
    %24 = vector.broadcast %cst_18 : f32 to vector<8x1xf32>
    %25 = arith.mulf %23, %24 : vector<8x1xf32>
    %26 = vector.broadcast %25 : vector<8x1xf32> to vector<8x128xf32>
    %27 = arith.subf %21, %26 : vector<8x128xf32>
    %28 = arith.mulf %27, %27 : vector<8x128xf32>
    %cst_19 = arith.constant dense<0.000000e+00> : vector<8xf32>
    %29 = vector.multi_reduction <add>, %28, %cst_19 [1] : vector<8x128xf32> to vector<8xf32>
    %30 = vector.shape_cast %29 : vector<8xf32> to vector<8x1xf32>
    %cst_20 = arith.constant 7.812500e-03 : f32
    %31 = vector.broadcast %cst_20 : f32 to vector<8x1xf32>
    %32 = arith.mulf %30, %31 : vector<8x1xf32>
    %cst_21 = arith.constant 9.99999974E-6 : f32
    %33 = vector.broadcast %cst_21 : f32 to vector<8x1xf32>
    %34 = arith.addf %32, %33 : vector<8x1xf32>
    %35 = math.rsqrt %34 : vector<8x1xf32>
    %36 = vector.broadcast %35 : vector<8x1xf32> to vector<8x128xf32>
    %37 = arith.mulf %27, %36 : vector<8x128xf32>
    %c24 = arith.constant 24 : index
    %c0_22 = arith.constant 0 : index
    %38 = vector.load %arg2[%c24, %c0_22] : memref<2624x32xf32, #tpu.memory_space<vmem>>, vector<8x1xf32>
    %39 = vector.broadcast %38 : vector<8x1xf32> to vector<8x128xf32>
    %40 = arith.mulf %37, %39 : vector<8x128xf32>
    %c32 = arith.constant 32 : index
    %c0_23 = arith.constant 0 : index
    %41 = vector.load %arg2[%c32, %c0_23] : memref<2624x32xf32, #tpu.memory_space<vmem>>, vector<8x1xf32>
    %42 = vector.broadcast %41 : vector<8x1xf32> to vector<8x128xf32>
    %43 = arith.addf %40, %42 : vector<8x128xf32>
    %c40 = arith.constant 40 : index
    %c0_24 = arith.constant 0 : index
    %44 = vector.load %arg2[%c40, %c0_24] : memref<2624x32xf32, #tpu.memory_space<vmem>>, vector<16x8xf32>
    %cst_25 = arith.constant dense<0.000000e+00> : vector<16x128xf32>
    %45 = tpu.matmul %44, %43, %cst_25 {dimension_numbers = #tpu.dot_dimension_numbers<[1], [0], [0], [1], [0, 0, 1, 1], [], []>} : vector<16x8xf32>, vector<8x128xf32>, vector<16x128xf32> -> vector<16x128xf32>
    %c392 = arith.constant 392 : index
    %c0_26 = arith.constant 0 : index
    %46 = vector.load %arg1[%c392, %c0_26] : memref<1720x128xf32, #tpu.memory_space<vmem>>, vector<128x64xf32>
    %cst_27 = arith.constant dense<0.000000e+00> : vector<16x64xf32>
    %47 = tpu.matmul %45, %46, %cst_27 {dimension_numbers = #tpu.dot_dimension_numbers<[1], [0], [0], [1], [0, 0, 1, 1], [], []>} : vector<16x128xf32>, vector<128x64xf32>, vector<16x64xf32> -> vector<16x64xf32>
    %c56 = arith.constant 56 : index
    %c0_28 = arith.constant 0 : index
    %48 = vector.load %arg2[%c56, %c0_28] : memref<2624x32xf32, #tpu.memory_space<vmem>>, vector<16x8xf32>
    %cst_29 = arith.constant dense<0.000000e+00> : vector<16x128xf32>
    %49 = tpu.matmul %48, %43, %cst_29 {dimension_numbers = #tpu.dot_dimension_numbers<[1], [0], [0], [1], [0, 0, 1, 1], [], []>} : vector<16x8xf32>, vector<8x128xf32>, vector<16x128xf32> -> vector<16x128xf32>
    %c520 = arith.constant 520 : index
    %c0_30 = arith.constant 0 : index
    %50 = vector.load %arg1[%c520, %c0_30] : memref<1720x128xf32, #tpu.memory_space<vmem>>, vector<128x64xf32>
    %cst_31 = arith.constant dense<0.000000e+00> : vector<16x64xf32>
    %51 = tpu.matmul %49, %50, %cst_31 {dimension_numbers = #tpu.dot_dimension_numbers<[1], [0], [0], [1], [0, 0, 1, 1], [], []>} : vector<16x128xf32>, vector<128x64xf32>, vector<16x64xf32> -> vector<16x64xf32>
    %52 = arith.addf %47, %51 : vector<16x64xf32>
    %c72 = arith.constant 72 : index
    %c0_32 = arith.constant 0 : index
    %53 = vector.load %arg2[%c72, %c0_32] : memref<2624x32xf32, #tpu.memory_space<vmem>>, vector<16x8xf32>
    %cst_33 = arith.constant dense<0.000000e+00> : vector<16x128xf32>
    %54 = tpu.matmul %53, %43, %cst_33 {dimension_numbers = #tpu.dot_dimension_numbers<[1], [0], [0], [1], [0, 0, 1, 1], [], []>} : vector<16x8xf32>, vector<8x128xf32>, vector<16x128xf32> -> vector<16x128xf32>
    %c648 = arith.constant 648 : index
    %c0_34 = arith.constant 0 : index
    %55 = vector.load %arg1[%c648, %c0_34] : memref<1720x128xf32, #tpu.memory_space<vmem>>, vector<128x64xf32>
    %cst_35 = arith.constant dense<0.000000e+00> : vector<16x64xf32>
    %56 = tpu.matmul %54, %55, %cst_35 {dimension_numbers = #tpu.dot_dimension_numbers<[1], [0], [0], [1], [0, 0, 1, 1], [], []>} : vector<16x128xf32>, vector<128x64xf32>, vector<16x64xf32> -> vector<16x64xf32>
    %57 = arith.addf %52, %56 : vector<16x64xf32>
    %c776 = arith.constant 776 : index
    %c0_36 = arith.constant 0 : index
    %58 = vector.load %arg1[%c776, %c0_36] : memref<1720x128xf32, #tpu.memory_space<vmem>>, vector<16x64xf32>
    %59 = arith.addf %57, %58 : vector<16x64xf32>
    %cst_37 = arith.constant 0.000000e+00 : f32
    %60 = vector.broadcast %cst_37 : f32 to vector<16x64xf32>
    %61 = arith.cmpf oge, %59, %60 : vector<16x64xf32>
    %cst_38 = arith.constant 0.00999999977 : f32
    %62 = vector.broadcast %cst_38 : f32 to vector<16x64xf32>
    %63 = arith.mulf %62, %59 : vector<16x64xf32>
    %64 = arith.select %61, %59, %63 : vector<16x64xi1>, vector<16x64xf32>
    %cst_39 = arith.constant dense<0.000000e+00> : vector<16xf32>
    %65 = vector.multi_reduction <add>, %64, %cst_39 [1] : vector<16x64xf32> to vector<16xf32>
    %66 = vector.shape_cast %65 : vector<16xf32> to vector<16x1xf32>
    %cst_40 = arith.constant 1.562500e-02 : f32
    %67 = vector.broadcast %cst_40 : f32 to vector<16x1xf32>
    %68 = arith.mulf %66, %67 : vector<16x1xf32>
    %69 = vector.broadcast %68 : vector<16x1xf32> to vector<16x64xf32>
    %70 = arith.subf %64, %69 : vector<16x64xf32>
    %71 = arith.mulf %70, %70 : vector<16x64xf32>
    %cst_41 = arith.constant dense<0.000000e+00> : vector<16xf32>
    %72 = vector.multi_reduction <add>, %71, %cst_41 [1] : vector<16x64xf32> to vector<16xf32>
    %73 = vector.shape_cast %72 : vector<16xf32> to vector<16x1xf32>
    %cst_42 = arith.constant 1.562500e-02 : f32
    %74 = vector.broadcast %cst_42 : f32 to vector<16x1xf32>
    %75 = arith.mulf %73, %74 : vector<16x1xf32>
    %cst_43 = arith.constant 9.99999974E-6 : f32
    %76 = vector.broadcast %cst_43 : f32 to vector<16x1xf32>
    %77 = arith.addf %75, %76 : vector<16x1xf32>
    %78 = math.rsqrt %77 : vector<16x1xf32>
    %79 = vector.broadcast %78 : vector<16x1xf32> to vector<16x64xf32>
    %80 = arith.mulf %70, %79 : vector<16x64xf32>
    %c88 = arith.constant 88 : index
    %c0_44 = arith.constant 0 : index
    %81 = vector.load %arg2[%c88, %c0_44] : memref<2624x32xf32, #tpu.memory_space<vmem>>, vector<16x1xf32>
    %82 = vector.broadcast %81 : vector<16x1xf32> to vector<16x64xf32>
    %83 = arith.mulf %80, %82 : vector<16x64xf32>
    %c104 = arith.constant 104 : index
    %c0_45 = arith.constant 0 : index
    %84 = vector.load %arg2[%c104, %c0_45] : memref<2624x32xf32, #tpu.memory_space<vmem>>, vector<16x1xf32>
    %85 = vector.broadcast %84 : vector<16x1xf32> to vector<16x64xf32>
    %86 = arith.addf %83, %85 : vector<16x64xf32>
    %c120 = arith.constant 120 : index
    %c0_46 = arith.constant 0 : index
    %87 = vector.load %arg2[%c120, %c0_46] : memref<2624x32xf32, #tpu.memory_space<vmem>>, vector<32x16xf32>
    %cst_47 = arith.constant dense<0.000000e+00> : vector<32x64xf32>
    %88 = tpu.matmul %87, %86, %cst_47 {dimension_numbers = #tpu.dot_dimension_numbers<[1], [0], [0], [1], [0, 0, 1, 1], [], []>} : vector<32x16xf32>, vector<16x64xf32>, vector<32x64xf32> -> vector<32x64xf32>
    %c792 = arith.constant 792 : index
    %c0_48 = arith.constant 0 : index
    %89 = vector.load %arg1[%c792, %c0_48] : memref<1720x128xf32, #tpu.memory_space<vmem>>, vector<64x32xf32>
    %cst_49 = arith.constant dense<0.000000e+00> : vector<32x32xf32>
    %90 = tpu.matmul %88, %89, %cst_49 {dimension_numbers = #tpu.dot_dimension_numbers<[1], [0], [0], [1], [0, 0, 1, 1], [], []>} : vector<32x64xf32>, vector<64x32xf32>, vector<32x32xf32> -> vector<32x32xf32>
    %c152 = arith.constant 152 : index
    %c0_50 = arith.constant 0 : index
    %91 = vector.load %arg2[%c152, %c0_50] : memref<2624x32xf32, #tpu.memory_space<vmem>>, vector<32x16xf32>
    %cst_51 = arith.constant dense<0.000000e+00> : vector<32x64xf32>
    %92 = tpu.matmul %91, %86, %cst_51 {dimension_numbers = #tpu.dot_dimension_numbers<[1], [0], [0], [1], [0, 0, 1, 1], [], []>} : vector<32x16xf32>, vector<16x64xf32>, vector<32x64xf32> -> vector<32x64xf32>
    %c856 = arith.constant 856 : index
    %c0_52 = arith.constant 0 : index
    %93 = vector.load %arg1[%c856, %c0_52] : memref<1720x128xf32, #tpu.memory_space<vmem>>, vector<64x32xf32>
    %cst_53 = arith.constant dense<0.000000e+00> : vector<32x32xf32>
    %94 = tpu.matmul %92, %93, %cst_53 {dimension_numbers = #tpu.dot_dimension_numbers<[1], [0], [0], [1], [0, 0, 1, 1], [], []>} : vector<32x64xf32>, vector<64x32xf32>, vector<32x32xf32> -> vector<32x32xf32>
    %95 = arith.addf %90, %94 : vector<32x32xf32>
    %c184 = arith.constant 184 : index
    %c0_54 = arith.constant 0 : index
    %96 = vector.load %arg2[%c184, %c0_54] : memref<2624x32xf32, #tpu.memory_space<vmem>>, vector<32x16xf32>
    %cst_55 = arith.constant dense<0.000000e+00> : vector<32x64xf32>
    %97 = tpu.matmul %96, %86, %cst_55 {dimension_numbers = #tpu.dot_dimension_numbers<[1], [0], [0], [1], [0, 0, 1, 1], [], []>} : vector<32x16xf32>, vector<16x64xf32>, vector<32x64xf32> -> vector<32x64xf32>
    %c920 = arith.constant 920 : index
    %c0_56 = arith.constant 0 : index
    %98 = vector.load %arg1[%c920, %c0_56] : memref<1720x128xf32, #tpu.memory_space<vmem>>, vector<64x32xf32>
    %cst_57 = arith.constant dense<0.000000e+00> : vector<32x32xf32>
    %99 = tpu.matmul %97, %98, %cst_57 {dimension_numbers = #tpu.dot_dimension_numbers<[1], [0], [0], [1], [0, 0, 1, 1], [], []>} : vector<32x64xf32>, vector<64x32xf32>, vector<32x32xf32> -> vector<32x32xf32>
    %100 = arith.addf %95, %99 : vector<32x32xf32>
    %c984 = arith.constant 984 : index
    %c0_58 = arith.constant 0 : index
    %101 = vector.load %arg1[%c984, %c0_58] : memref<1720x128xf32, #tpu.memory_space<vmem>>, vector<32x32xf32>
    %102 = arith.addf %100, %101 : vector<32x32xf32>
    %cst_59 = arith.constant 0.000000e+00 : f32
    %103 = vector.broadcast %cst_59 : f32 to vector<32x32xf32>
    %104 = arith.cmpf oge, %102, %103 : vector<32x32xf32>
    %cst_60 = arith.constant 0.00999999977 : f32
    %105 = vector.broadcast %cst_60 : f32 to vector<32x32xf32>
    %106 = arith.mulf %105, %102 : vector<32x32xf32>
    %107 = arith.select %104, %102, %106 : vector<32x32xi1>, vector<32x32xf32>
    %cst_61 = arith.constant dense<0.000000e+00> : vector<32xf32>
    %108 = vector.multi_reduction <add>, %107, %cst_61 [1] : vector<32x32xf32> to vector<32xf32>
    %109 = vector.shape_cast %108 : vector<32xf32> to vector<32x1xf32>
    %cst_62 = arith.constant 3.125000e-02 : f32
    %110 = vector.broadcast %cst_62 : f32 to vector<32x1xf32>
    %111 = arith.mulf %109, %110 : vector<32x1xf32>
    %112 = vector.broadcast %111 : vector<32x1xf32> to vector<32x32xf32>
    %113 = arith.subf %107, %112 : vector<32x32xf32>
    %114 = arith.mulf %113, %113 : vector<32x32xf32>
    %cst_63 = arith.constant dense<0.000000e+00> : vector<32xf32>
    %115 = vector.multi_reduction <add>, %114, %cst_63 [1] : vector<32x32xf32> to vector<32xf32>
    %116 = vector.shape_cast %115 : vector<32xf32> to vector<32x1xf32>
    %cst_64 = arith.constant 3.125000e-02 : f32
    %117 = vector.broadcast %cst_64 : f32 to vector<32x1xf32>
    %118 = arith.mulf %116, %117 : vector<32x1xf32>
    %cst_65 = arith.constant 9.99999974E-6 : f32
    %119 = vector.broadcast %cst_65 : f32 to vector<32x1xf32>
    %120 = arith.addf %118, %119 : vector<32x1xf32>
    %121 = math.rsqrt %120 : vector<32x1xf32>
    %122 = vector.broadcast %121 : vector<32x1xf32> to vector<32x32xf32>
    %123 = arith.mulf %113, %122 : vector<32x32xf32>
    %c216 = arith.constant 216 : index
    %c0_66 = arith.constant 0 : index
    %124 = vector.load %arg2[%c216, %c0_66] : memref<2624x32xf32, #tpu.memory_space<vmem>>, vector<32x1xf32>
    %125 = vector.broadcast %124 : vector<32x1xf32> to vector<32x32xf32>
    %126 = arith.mulf %123, %125 : vector<32x32xf32>
    %c248 = arith.constant 248 : index
    %c0_67 = arith.constant 0 : index
    %127 = vector.load %arg2[%c248, %c0_67] : memref<2624x32xf32, #tpu.memory_space<vmem>>, vector<32x1xf32>
    %128 = vector.broadcast %127 : vector<32x1xf32> to vector<32x32xf32>
    %129 = arith.addf %126, %128 : vector<32x32xf32>
    %c472 = arith.constant 472 : index
    %c0_68 = arith.constant 0 : index
    %130 = vector.load %arg2[%c472, %c0_68] : memref<2624x32xf32, #tpu.memory_space<vmem>>, vector<512x32xf32>
    %cst_69 = arith.constant dense<0.000000e+00> : vector<512x32xf32>
    %131 = tpu.matmul %130, %129, %cst_69 {dimension_numbers = #tpu.dot_dimension_numbers<[1], [0], [0], [1], [0, 0, 1, 1], [], []>} : vector<512x32xf32>, vector<32x32xf32>, vector<512x32xf32> -> vector<512x32xf32>
    %c984_70 = arith.constant 984 : index
    %c0_71 = arith.constant 0 : index
    %132 = vector.load %arg2[%c984_70, %c0_71] : memref<2624x32xf32, #tpu.memory_space<vmem>>, vector<512x32xf32>
    %133 = arith.mulf %131, %132 : vector<512x32xf32>
    %134 = vector.extract_strided_slice %133 {offsets = [0, 0], sizes = [32, 32], strides = [1, 1]} : vector<512x32xf32> to vector<32x32xf32>
    %135 = vector.extract_strided_slice %133 {offsets = [32, 0], sizes = [32, 32], strides = [1, 1]} : vector<512x32xf32> to vector<32x32xf32>
    %136 = arith.addf %134, %135 : vector<32x32xf32>
    %137 = vector.extract_strided_slice %133 {offsets = [64, 0], sizes = [32, 32], strides = [1, 1]} : vector<512x32xf32> to vector<32x32xf32>
    %138 = arith.addf %136, %137 : vector<32x32xf32>
    %139 = vector.extract_strided_slice %133 {offsets = [96, 0], sizes = [32, 32], strides = [1, 1]} : vector<512x32xf32> to vector<32x32xf32>
    %140 = arith.addf %138, %139 : vector<32x32xf32>
    %141 = vector.extract_strided_slice %133 {offsets = [128, 0], sizes = [32, 32], strides = [1, 1]} : vector<512x32xf32> to vector<32x32xf32>
    %142 = arith.addf %140, %141 : vector<32x32xf32>
    %143 = vector.extract_strided_slice %133 {offsets = [160, 0], sizes = [32, 32], strides = [1, 1]} : vector<512x32xf32> to vector<32x32xf32>
    %144 = arith.addf %142, %143 : vector<32x32xf32>
    %145 = vector.extract_strided_slice %133 {offsets = [192, 0], sizes = [32, 32], strides = [1, 1]} : vector<512x32xf32> to vector<32x32xf32>
    %146 = arith.addf %144, %145 : vector<32x32xf32>
    %147 = vector.extract_strided_slice %133 {offsets = [224, 0], sizes = [32, 32], strides = [1, 1]} : vector<512x32xf32> to vector<32x32xf32>
    %148 = arith.addf %146, %147 : vector<32x32xf32>
    %149 = vector.extract_strided_slice %133 {offsets = [256, 0], sizes = [32, 32], strides = [1, 1]} : vector<512x32xf32> to vector<32x32xf32>
    %150 = arith.addf %148, %149 : vector<32x32xf32>
    %151 = vector.extract_strided_slice %133 {offsets = [288, 0], sizes = [32, 32], strides = [1, 1]} : vector<512x32xf32> to vector<32x32xf32>
    %152 = arith.addf %150, %151 : vector<32x32xf32>
    %153 = vector.extract_strided_slice %133 {offsets = [320, 0], sizes = [32, 32], strides = [1, 1]} : vector<512x32xf32> to vector<32x32xf32>
    %154 = arith.addf %152, %153 : vector<32x32xf32>
    %155 = vector.extract_strided_slice %133 {offsets = [352, 0], sizes = [32, 32], strides = [1, 1]} : vector<512x32xf32> to vector<32x32xf32>
    %156 = arith.addf %154, %155 : vector<32x32xf32>
    %157 = vector.extract_strided_slice %133 {offsets = [384, 0], sizes = [32, 32], strides = [1, 1]} : vector<512x32xf32> to vector<32x32xf32>
    %158 = arith.addf %156, %157 : vector<32x32xf32>
    %159 = vector.extract_strided_slice %133 {offsets = [416, 0], sizes = [32, 32], strides = [1, 1]} : vector<512x32xf32> to vector<32x32xf32>
    %160 = arith.addf %158, %159 : vector<32x32xf32>
    %161 = vector.extract_strided_slice %133 {offsets = [448, 0], sizes = [32, 32], strides = [1, 1]} : vector<512x32xf32> to vector<32x32xf32>
    %162 = arith.addf %160, %161 : vector<32x32xf32>
    %163 = vector.extract_strided_slice %133 {offsets = [480, 0], sizes = [32, 32], strides = [1, 1]} : vector<512x32xf32> to vector<32x32xf32>
    %164 = arith.addf %162, %163 : vector<32x32xf32>
    %c2008 = arith.constant 2008 : index
    %c0_72 = arith.constant 0 : index
    %165 = vector.load %arg2[%c2008, %c0_72] : memref<2624x32xf32, #tpu.memory_space<vmem>>, vector<32x2xf32>
    %cst_73 = arith.constant dense<0.000000e+00> : vector<32x2xf32>
    %166 = tpu.matmul %164, %165, %cst_73 {dimension_numbers = #tpu.dot_dimension_numbers<[1], [0], [0], [1], [0, 0, 1, 1], [], []>} : vector<32x32xf32>, vector<32x2xf32>, vector<32x2xf32> -> vector<32x2xf32>
    %c2048 = arith.constant 2048 : index
    %c0_74 = arith.constant 0 : index
    %167 = vector.load %arg2[%c2048, %c0_74] : memref<2624x32xf32, #tpu.memory_space<vmem>>, vector<32x1xf32>
    %168 = vector.broadcast %167 : vector<32x1xf32> to vector<32x2xf32>
    %169 = arith.addf %166, %168 : vector<32x2xf32>
    %c2080 = arith.constant 2080 : index
    %c0_75 = arith.constant 0 : index
    %170 = vector.load %arg2[%c2080, %c0_75] : memref<2624x32xf32, #tpu.memory_space<vmem>>, vector<512x32xf32>
    %cst_76 = arith.constant dense<0.000000e+00> : vector<512x2xf32>
    %171 = tpu.matmul %170, %169, %cst_76 {dimension_numbers = #tpu.dot_dimension_numbers<[1], [0], [0], [1], [0, 0, 1, 1], [], []>} : vector<512x32xf32>, vector<32x2xf32>, vector<512x2xf32> -> vector<512x2xf32>
    %c2040 = arith.constant 2040 : index
    %c0_77 = arith.constant 0 : index
    %172 = vector.load %arg2[%c2040, %c0_77] : memref<2624x32xf32, #tpu.memory_space<vmem>>, vector<2x32xf32>
    %cst_78 = arith.constant dense<0.000000e+00> : vector<512x32xf32>
    %173 = tpu.matmul %171, %172, %cst_78 {dimension_numbers = #tpu.dot_dimension_numbers<[1], [0], [0], [1], [0, 0, 1, 1], [], []>} : vector<512x2xf32>, vector<2x32xf32>, vector<512x32xf32> -> vector<512x32xf32>
    %c1496 = arith.constant 1496 : index
    %c0_79 = arith.constant 0 : index
    %174 = vector.load %arg2[%c1496, %c0_79] : memref<2624x32xf32, #tpu.memory_space<vmem>>, vector<512x32xf32>
    %175 = arith.mulf %173, %174 : vector<512x32xf32>
    %176 = vector.extract_strided_slice %175 {offsets = [0, 0], sizes = [32, 32], strides = [1, 1]} : vector<512x32xf32> to vector<32x32xf32>
    %177 = vector.extract_strided_slice %175 {offsets = [32, 0], sizes = [32, 32], strides = [1, 1]} : vector<512x32xf32> to vector<32x32xf32>
    %178 = arith.addf %176, %177 : vector<32x32xf32>
    %179 = vector.extract_strided_slice %175 {offsets = [64, 0], sizes = [32, 32], strides = [1, 1]} : vector<512x32xf32> to vector<32x32xf32>
    %180 = arith.addf %178, %179 : vector<32x32xf32>
    %181 = vector.extract_strided_slice %175 {offsets = [96, 0], sizes = [32, 32], strides = [1, 1]} : vector<512x32xf32> to vector<32x32xf32>
    %182 = arith.addf %180, %181 : vector<32x32xf32>
    %183 = vector.extract_strided_slice %175 {offsets = [128, 0], sizes = [32, 32], strides = [1, 1]} : vector<512x32xf32> to vector<32x32xf32>
    %184 = arith.addf %182, %183 : vector<32x32xf32>
    %185 = vector.extract_strided_slice %175 {offsets = [160, 0], sizes = [32, 32], strides = [1, 1]} : vector<512x32xf32> to vector<32x32xf32>
    %186 = arith.addf %184, %185 : vector<32x32xf32>
    %187 = vector.extract_strided_slice %175 {offsets = [192, 0], sizes = [32, 32], strides = [1, 1]} : vector<512x32xf32> to vector<32x32xf32>
    %188 = arith.addf %186, %187 : vector<32x32xf32>
    %189 = vector.extract_strided_slice %175 {offsets = [224, 0], sizes = [32, 32], strides = [1, 1]} : vector<512x32xf32> to vector<32x32xf32>
    %190 = arith.addf %188, %189 : vector<32x32xf32>
    %191 = vector.extract_strided_slice %175 {offsets = [256, 0], sizes = [32, 32], strides = [1, 1]} : vector<512x32xf32> to vector<32x32xf32>
    %192 = arith.addf %190, %191 : vector<32x32xf32>
    %193 = vector.extract_strided_slice %175 {offsets = [288, 0], sizes = [32, 32], strides = [1, 1]} : vector<512x32xf32> to vector<32x32xf32>
    %194 = arith.addf %192, %193 : vector<32x32xf32>
    %195 = vector.extract_strided_slice %175 {offsets = [320, 0], sizes = [32, 32], strides = [1, 1]} : vector<512x32xf32> to vector<32x32xf32>
    %196 = arith.addf %194, %195 : vector<32x32xf32>
    %197 = vector.extract_strided_slice %175 {offsets = [352, 0], sizes = [32, 32], strides = [1, 1]} : vector<512x32xf32> to vector<32x32xf32>
    %198 = arith.addf %196, %197 : vector<32x32xf32>
    %199 = vector.extract_strided_slice %175 {offsets = [384, 0], sizes = [32, 32], strides = [1, 1]} : vector<512x32xf32> to vector<32x32xf32>
    %200 = arith.addf %198, %199 : vector<32x32xf32>
    %201 = vector.extract_strided_slice %175 {offsets = [416, 0], sizes = [32, 32], strides = [1, 1]} : vector<512x32xf32> to vector<32x32xf32>
    %202 = arith.addf %200, %201 : vector<32x32xf32>
    %203 = vector.extract_strided_slice %175 {offsets = [448, 0], sizes = [32, 32], strides = [1, 1]} : vector<512x32xf32> to vector<32x32xf32>
    %204 = arith.addf %202, %203 : vector<32x32xf32>
    %205 = vector.extract_strided_slice %175 {offsets = [480, 0], sizes = [32, 32], strides = [1, 1]} : vector<512x32xf32> to vector<32x32xf32>
    %206 = arith.addf %204, %205 : vector<32x32xf32>
    %c2592 = arith.constant 2592 : index
    %c0_80 = arith.constant 0 : index
    %207 = vector.load %arg2[%c2592, %c0_80] : memref<2624x32xf32, #tpu.memory_space<vmem>>, vector<32x32xf32>
    %208 = arith.addf %206, %207 : vector<32x32xf32>
    %c280 = arith.constant 280 : index
    %c0_81 = arith.constant 0 : index
    %209 = vector.load %arg2[%c280, %c0_81] : memref<2624x32xf32, #tpu.memory_space<vmem>>, vector<16x32xf32>
    %cst_82 = arith.constant dense<0.000000e+00> : vector<16x32xf32>
    %210 = tpu.matmul %209, %208, %cst_82 {dimension_numbers = #tpu.dot_dimension_numbers<[1], [0], [0], [1], [0, 0, 1, 1], [], []>} : vector<16x32xf32>, vector<32x32xf32>, vector<16x32xf32> -> vector<16x32xf32>
    %c1016 = arith.constant 1016 : index
    %c0_83 = arith.constant 0 : index
    %211 = vector.load %arg1[%c1016, %c0_83] : memref<1720x128xf32, #tpu.memory_space<vmem>>, vector<32x64xf32>
    %cst_84 = arith.constant dense<0.000000e+00> : vector<16x64xf32>
    %212 = tpu.matmul %210, %211, %cst_84 {dimension_numbers = #tpu.dot_dimension_numbers<[1], [0], [0], [1], [0, 0, 1, 1], [], []>} : vector<16x32xf32>, vector<32x64xf32>, vector<16x64xf32> -> vector<16x64xf32>
    %c296 = arith.constant 296 : index
    %c0_85 = arith.constant 0 : index
    %213 = vector.load %arg2[%c296, %c0_85] : memref<2624x32xf32, #tpu.memory_space<vmem>>, vector<16x32xf32>
    %cst_86 = arith.constant dense<0.000000e+00> : vector<16x32xf32>
    %214 = tpu.matmul %213, %208, %cst_86 {dimension_numbers = #tpu.dot_dimension_numbers<[1], [0], [0], [1], [0, 0, 1, 1], [], []>} : vector<16x32xf32>, vector<32x32xf32>, vector<16x32xf32> -> vector<16x32xf32>
    %c1048 = arith.constant 1048 : index
    %c0_87 = arith.constant 0 : index
    %215 = vector.load %arg1[%c1048, %c0_87] : memref<1720x128xf32, #tpu.memory_space<vmem>>, vector<32x64xf32>
    %cst_88 = arith.constant dense<0.000000e+00> : vector<16x64xf32>
    %216 = tpu.matmul %214, %215, %cst_88 {dimension_numbers = #tpu.dot_dimension_numbers<[1], [0], [0], [1], [0, 0, 1, 1], [], []>} : vector<16x32xf32>, vector<32x64xf32>, vector<16x64xf32> -> vector<16x64xf32>
    %217 = arith.addf %212, %216 : vector<16x64xf32>
    %c312 = arith.constant 312 : index
    %c0_89 = arith.constant 0 : index
    %218 = vector.load %arg2[%c312, %c0_89] : memref<2624x32xf32, #tpu.memory_space<vmem>>, vector<16x32xf32>
    %cst_90 = arith.constant dense<0.000000e+00> : vector<16x32xf32>
    %219 = tpu.matmul %218, %208, %cst_90 {dimension_numbers = #tpu.dot_dimension_numbers<[1], [0], [0], [1], [0, 0, 1, 1], [], []>} : vector<16x32xf32>, vector<32x32xf32>, vector<16x32xf32> -> vector<16x32xf32>
    %c1080 = arith.constant 1080 : index
    %c0_91 = arith.constant 0 : index
    %220 = vector.load %arg1[%c1080, %c0_91] : memref<1720x128xf32, #tpu.memory_space<vmem>>, vector<32x64xf32>
    %cst_92 = arith.constant dense<0.000000e+00> : vector<16x64xf32>
    %221 = tpu.matmul %219, %220, %cst_92 {dimension_numbers = #tpu.dot_dimension_numbers<[1], [0], [0], [1], [0, 0, 1, 1], [], []>} : vector<16x32xf32>, vector<32x64xf32>, vector<16x64xf32> -> vector<16x64xf32>
    %222 = arith.addf %217, %221 : vector<16x64xf32>
    %c1112 = arith.constant 1112 : index
    %c0_93 = arith.constant 0 : index
    %223 = vector.load %arg1[%c1112, %c0_93] : memref<1720x128xf32, #tpu.memory_space<vmem>>, vector<16x64xf32>
    %224 = arith.addf %222, %223 : vector<16x64xf32>
    %cst_94 = arith.constant 0.000000e+00 : f32
    %225 = vector.broadcast %cst_94 : f32 to vector<16x64xf32>
    %226 = arith.cmpf oge, %224, %225 : vector<16x64xf32>
    %cst_95 = arith.constant 0.00999999977 : f32
    %227 = vector.broadcast %cst_95 : f32 to vector<16x64xf32>
    %228 = arith.mulf %227, %224 : vector<16x64xf32>
    %229 = arith.select %226, %224, %228 : vector<16x64xi1>, vector<16x64xf32>
    %cst_96 = arith.constant dense<0.000000e+00> : vector<16xf32>
    %230 = vector.multi_reduction <add>, %229, %cst_96 [1] : vector<16x64xf32> to vector<16xf32>
    %231 = vector.shape_cast %230 : vector<16xf32> to vector<16x1xf32>
    %cst_97 = arith.constant 1.562500e-02 : f32
    %232 = vector.broadcast %cst_97 : f32 to vector<16x1xf32>
    %233 = arith.mulf %231, %232 : vector<16x1xf32>
    %234 = vector.broadcast %233 : vector<16x1xf32> to vector<16x64xf32>
    %235 = arith.subf %229, %234 : vector<16x64xf32>
    %236 = arith.mulf %235, %235 : vector<16x64xf32>
    %cst_98 = arith.constant dense<0.000000e+00> : vector<16xf32>
    %237 = vector.multi_reduction <add>, %236, %cst_98 [1] : vector<16x64xf32> to vector<16xf32>
    %238 = vector.shape_cast %237 : vector<16xf32> to vector<16x1xf32>
    %cst_99 = arith.constant 1.562500e-02 : f32
    %239 = vector.broadcast %cst_99 : f32 to vector<16x1xf32>
    %240 = arith.mulf %238, %239 : vector<16x1xf32>
    %cst_100 = arith.constant 9.99999974E-6 : f32
    %241 = vector.broadcast %cst_100 : f32 to vector<16x1xf32>
    %242 = arith.addf %240, %241 : vector<16x1xf32>
    %243 = math.rsqrt %242 : vector<16x1xf32>
    %244 = vector.broadcast %243 : vector<16x1xf32> to vector<16x64xf32>
    %245 = arith.mulf %235, %244 : vector<16x64xf32>
    %c328 = arith.constant 328 : index
    %c0_101 = arith.constant 0 : index
    %246 = vector.load %arg2[%c328, %c0_101] : memref<2624x32xf32, #tpu.memory_space<vmem>>, vector<16x1xf32>
    %247 = vector.broadcast %246 : vector<16x1xf32> to vector<16x64xf32>
    %248 = arith.mulf %245, %247 : vector<16x64xf32>
    %c344 = arith.constant 344 : index
    %c0_102 = arith.constant 0 : index
    %249 = vector.load %arg2[%c344, %c0_102] : memref<2624x32xf32, #tpu.memory_space<vmem>>, vector<16x1xf32>
    %250 = vector.broadcast %249 : vector<16x1xf32> to vector<16x64xf32>
    %251 = arith.addf %248, %250 : vector<16x64xf32>
    %c360 = arith.constant 360 : index
    %c0_103 = arith.constant 0 : index
    %252 = vector.load %arg2[%c360, %c0_103] : memref<2624x32xf32, #tpu.memory_space<vmem>>, vector<8x16xf32>
    %cst_104 = arith.constant dense<0.000000e+00> : vector<8x64xf32>
    %253 = tpu.matmul %252, %251, %cst_104 {dimension_numbers = #tpu.dot_dimension_numbers<[1], [0], [0], [1], [0, 0, 1, 1], [], []>} : vector<8x16xf32>, vector<16x64xf32>, vector<8x64xf32> -> vector<8x64xf32>
    %c368 = arith.constant 368 : index
    %c0_105 = arith.constant 0 : index
    %254 = vector.load %arg2[%c368, %c0_105] : memref<2624x32xf32, #tpu.memory_space<vmem>>, vector<8x16xf32>
    %cst_106 = arith.constant dense<0.000000e+00> : vector<8x64xf32>
    %255 = tpu.matmul %254, %86, %cst_106 {dimension_numbers = #tpu.dot_dimension_numbers<[1], [0], [0], [1], [0, 0, 1, 1], [], []>} : vector<8x16xf32>, vector<16x64xf32>, vector<8x64xf32> -> vector<8x64xf32>
    %256 = arith.addf %253, %255 : vector<8x64xf32>
    %c1128 = arith.constant 1128 : index
    %c0_107 = arith.constant 0 : index
    %257 = vector.load %arg1[%c1128, %c0_107] : memref<1720x128xf32, #tpu.memory_space<vmem>>, vector<64x128xf32>
    %cst_108 = arith.constant dense<0.000000e+00> : vector<8x128xf32>
    %258 = tpu.matmul %256, %257, %cst_108 {dimension_numbers = #tpu.dot_dimension_numbers<[1], [0], [0], [1], [0, 0, 1, 1], [], []>} : vector<8x64xf32>, vector<64x128xf32>, vector<8x128xf32> -> vector<8x128xf32>
    %c376 = arith.constant 376 : index
    %c0_109 = arith.constant 0 : index
    %259 = vector.load %arg2[%c376, %c0_109] : memref<2624x32xf32, #tpu.memory_space<vmem>>, vector<8x16xf32>
    %cst_110 = arith.constant dense<0.000000e+00> : vector<8x64xf32>
    %260 = tpu.matmul %259, %251, %cst_110 {dimension_numbers = #tpu.dot_dimension_numbers<[1], [0], [0], [1], [0, 0, 1, 1], [], []>} : vector<8x16xf32>, vector<16x64xf32>, vector<8x64xf32> -> vector<8x64xf32>
    %c384_111 = arith.constant 384 : index
    %c0_112 = arith.constant 0 : index
    %261 = vector.load %arg2[%c384_111, %c0_112] : memref<2624x32xf32, #tpu.memory_space<vmem>>, vector<8x16xf32>
    %cst_113 = arith.constant dense<0.000000e+00> : vector<8x64xf32>
    %262 = tpu.matmul %261, %86, %cst_113 {dimension_numbers = #tpu.dot_dimension_numbers<[1], [0], [0], [1], [0, 0, 1, 1], [], []>} : vector<8x16xf32>, vector<16x64xf32>, vector<8x64xf32> -> vector<8x64xf32>
    %263 = arith.addf %260, %262 : vector<8x64xf32>
    %c1192 = arith.constant 1192 : index
    %c0_114 = arith.constant 0 : index
    %264 = vector.load %arg1[%c1192, %c0_114] : memref<1720x128xf32, #tpu.memory_space<vmem>>, vector<64x128xf32>
    %cst_115 = arith.constant dense<0.000000e+00> : vector<8x128xf32>
    %265 = tpu.matmul %263, %264, %cst_115 {dimension_numbers = #tpu.dot_dimension_numbers<[1], [0], [0], [1], [0, 0, 1, 1], [], []>} : vector<8x64xf32>, vector<64x128xf32>, vector<8x128xf32> -> vector<8x128xf32>
    %266 = arith.addf %258, %265 : vector<8x128xf32>
    %c392_116 = arith.constant 392 : index
    %c0_117 = arith.constant 0 : index
    %267 = vector.load %arg2[%c392_116, %c0_117] : memref<2624x32xf32, #tpu.memory_space<vmem>>, vector<8x16xf32>
    %cst_118 = arith.constant dense<0.000000e+00> : vector<8x64xf32>
    %268 = tpu.matmul %267, %251, %cst_118 {dimension_numbers = #tpu.dot_dimension_numbers<[1], [0], [0], [1], [0, 0, 1, 1], [], []>} : vector<8x16xf32>, vector<16x64xf32>, vector<8x64xf32> -> vector<8x64xf32>
    %c400 = arith.constant 400 : index
    %c0_119 = arith.constant 0 : index
    %269 = vector.load %arg2[%c400, %c0_119] : memref<2624x32xf32, #tpu.memory_space<vmem>>, vector<8x16xf32>
    %cst_120 = arith.constant dense<0.000000e+00> : vector<8x64xf32>
    %270 = tpu.matmul %269, %86, %cst_120 {dimension_numbers = #tpu.dot_dimension_numbers<[1], [0], [0], [1], [0, 0, 1, 1], [], []>} : vector<8x16xf32>, vector<16x64xf32>, vector<8x64xf32> -> vector<8x64xf32>
    %271 = arith.addf %268, %270 : vector<8x64xf32>
    %c1256 = arith.constant 1256 : index
    %c0_121 = arith.constant 0 : index
    %272 = vector.load %arg1[%c1256, %c0_121] : memref<1720x128xf32, #tpu.memory_space<vmem>>, vector<64x128xf32>
    %cst_122 = arith.constant dense<0.000000e+00> : vector<8x128xf32>
    %273 = tpu.matmul %271, %272, %cst_122 {dimension_numbers = #tpu.dot_dimension_numbers<[1], [0], [0], [1], [0, 0, 1, 1], [], []>} : vector<8x64xf32>, vector<64x128xf32>, vector<8x128xf32> -> vector<8x128xf32>
    %274 = arith.addf %266, %273 : vector<8x128xf32>
    %c1320 = arith.constant 1320 : index
    %c0_123 = arith.constant 0 : index
    %275 = vector.load %arg1[%c1320, %c0_123] : memref<1720x128xf32, #tpu.memory_space<vmem>>, vector<8x128xf32>
    %276 = arith.addf %274, %275 : vector<8x128xf32>
    %cst_124 = arith.constant 0.000000e+00 : f32
    %277 = vector.broadcast %cst_124 : f32 to vector<8x128xf32>
    %278 = arith.cmpf oge, %276, %277 : vector<8x128xf32>
    %cst_125 = arith.constant 0.00999999977 : f32
    %279 = vector.broadcast %cst_125 : f32 to vector<8x128xf32>
    %280 = arith.mulf %279, %276 : vector<8x128xf32>
    %281 = arith.select %278, %276, %280 : vector<8x128xi1>, vector<8x128xf32>
    %cst_126 = arith.constant dense<0.000000e+00> : vector<8xf32>
    %282 = vector.multi_reduction <add>, %281, %cst_126 [1] : vector<8x128xf32> to vector<8xf32>
    %283 = vector.shape_cast %282 : vector<8xf32> to vector<8x1xf32>
    %cst_127 = arith.constant 7.812500e-03 : f32
    %284 = vector.broadcast %cst_127 : f32 to vector<8x1xf32>
    %285 = arith.mulf %283, %284 : vector<8x1xf32>
    %286 = vector.broadcast %285 : vector<8x1xf32> to vector<8x128xf32>
    %287 = arith.subf %281, %286 : vector<8x128xf32>
    %288 = arith.mulf %287, %287 : vector<8x128xf32>
    %cst_128 = arith.constant dense<0.000000e+00> : vector<8xf32>
    %289 = vector.multi_reduction <add>, %288, %cst_128 [1] : vector<8x128xf32> to vector<8xf32>
    %290 = vector.shape_cast %289 : vector<8xf32> to vector<8x1xf32>
    %cst_129 = arith.constant 7.812500e-03 : f32
    %291 = vector.broadcast %cst_129 : f32 to vector<8x1xf32>
    %292 = arith.mulf %290, %291 : vector<8x1xf32>
    %cst_130 = arith.constant 9.99999974E-6 : f32
    %293 = vector.broadcast %cst_130 : f32 to vector<8x1xf32>
    %294 = arith.addf %292, %293 : vector<8x1xf32>
    %295 = math.rsqrt %294 : vector<8x1xf32>
    %296 = vector.broadcast %295 : vector<8x1xf32> to vector<8x128xf32>
    %297 = arith.mulf %287, %296 : vector<8x128xf32>
    %c408 = arith.constant 408 : index
    %c0_131 = arith.constant 0 : index
    %298 = vector.load %arg2[%c408, %c0_131] : memref<2624x32xf32, #tpu.memory_space<vmem>>, vector<8x1xf32>
    %299 = vector.broadcast %298 : vector<8x1xf32> to vector<8x128xf32>
    %300 = arith.mulf %297, %299 : vector<8x128xf32>
    %c416 = arith.constant 416 : index
    %c0_132 = arith.constant 0 : index
    %301 = vector.load %arg2[%c416, %c0_132] : memref<2624x32xf32, #tpu.memory_space<vmem>>, vector<8x1xf32>
    %302 = vector.broadcast %301 : vector<8x1xf32> to vector<8x128xf32>
    %303 = arith.addf %300, %302 : vector<8x128xf32>
    %c424 = arith.constant 424 : index
    %c0_133 = arith.constant 0 : index
    %304 = vector.load %arg2[%c424, %c0_133] : memref<2624x32xf32, #tpu.memory_space<vmem>>, vector<8x8xf32>
    %cst_134 = arith.constant dense<0.000000e+00> : vector<8x128xf32>
    %305 = tpu.matmul %304, %303, %cst_134 {dimension_numbers = #tpu.dot_dimension_numbers<[1], [0], [0], [1], [0, 0, 1, 1], [], []>} : vector<8x8xf32>, vector<8x128xf32>, vector<8x128xf32> -> vector<8x128xf32>
    %c432 = arith.constant 432 : index
    %c0_135 = arith.constant 0 : index
    %306 = vector.load %arg2[%c432, %c0_135] : memref<2624x32xf32, #tpu.memory_space<vmem>>, vector<8x8xf32>
    %cst_136 = arith.constant dense<0.000000e+00> : vector<8x128xf32>
    %307 = tpu.matmul %306, %43, %cst_136 {dimension_numbers = #tpu.dot_dimension_numbers<[1], [0], [0], [1], [0, 0, 1, 1], [], []>} : vector<8x8xf32>, vector<8x128xf32>, vector<8x128xf32> -> vector<8x128xf32>
    %308 = arith.addf %305, %307 : vector<8x128xf32>
    %c1328 = arith.constant 1328 : index
    %c0_137 = arith.constant 0 : index
    %309 = vector.load %arg1[%c1328, %c0_137] : memref<1720x128xf32, #tpu.memory_space<vmem>>, vector<128x128xf32>
    %cst_138 = arith.constant dense<0.000000e+00> : vector<8x128xf32>
    %310 = tpu.matmul %308, %309, %cst_138 {dimension_numbers = #tpu.dot_dimension_numbers<[1], [0], [0], [1], [0, 0, 1, 1], [], []>} : vector<8x128xf32>, vector<128x128xf32>, vector<8x128xf32> -> vector<8x128xf32>
    %c440 = arith.constant 440 : index
    %c0_139 = arith.constant 0 : index
    %311 = vector.load %arg2[%c440, %c0_139] : memref<2624x32xf32, #tpu.memory_space<vmem>>, vector<8x8xf32>
    %cst_140 = arith.constant dense<0.000000e+00> : vector<8x128xf32>
    %312 = tpu.matmul %311, %303, %cst_140 {dimension_numbers = #tpu.dot_dimension_numbers<[1], [0], [0], [1], [0, 0, 1, 1], [], []>} : vector<8x8xf32>, vector<8x128xf32>, vector<8x128xf32> -> vector<8x128xf32>
    %c448 = arith.constant 448 : index
    %c0_141 = arith.constant 0 : index
    %313 = vector.load %arg2[%c448, %c0_141] : memref<2624x32xf32, #tpu.memory_space<vmem>>, vector<8x8xf32>
    %cst_142 = arith.constant dense<0.000000e+00> : vector<8x128xf32>
    %314 = tpu.matmul %313, %43, %cst_142 {dimension_numbers = #tpu.dot_dimension_numbers<[1], [0], [0], [1], [0, 0, 1, 1], [], []>} : vector<8x8xf32>, vector<8x128xf32>, vector<8x128xf32> -> vector<8x128xf32>
    %315 = arith.addf %312, %314 : vector<8x128xf32>
    %c1456 = arith.constant 1456 : index
    %c0_143 = arith.constant 0 : index
    %316 = vector.load %arg1[%c1456, %c0_143] : memref<1720x128xf32, #tpu.memory_space<vmem>>, vector<128x128xf32>
    %cst_144 = arith.constant dense<0.000000e+00> : vector<8x128xf32>
    %317 = tpu.matmul %315, %316, %cst_144 {dimension_numbers = #tpu.dot_dimension_numbers<[1], [0], [0], [1], [0, 0, 1, 1], [], []>} : vector<8x128xf32>, vector<128x128xf32>, vector<8x128xf32> -> vector<8x128xf32>
    %318 = arith.addf %310, %317 : vector<8x128xf32>
    %c456 = arith.constant 456 : index
    %c0_145 = arith.constant 0 : index
    %319 = vector.load %arg2[%c456, %c0_145] : memref<2624x32xf32, #tpu.memory_space<vmem>>, vector<8x8xf32>
    %cst_146 = arith.constant dense<0.000000e+00> : vector<8x128xf32>
    %320 = tpu.matmul %319, %303, %cst_146 {dimension_numbers = #tpu.dot_dimension_numbers<[1], [0], [0], [1], [0, 0, 1, 1], [], []>} : vector<8x8xf32>, vector<8x128xf32>, vector<8x128xf32> -> vector<8x128xf32>
    %c464 = arith.constant 464 : index
    %c0_147 = arith.constant 0 : index
    %321 = vector.load %arg2[%c464, %c0_147] : memref<2624x32xf32, #tpu.memory_space<vmem>>, vector<8x8xf32>
    %cst_148 = arith.constant dense<0.000000e+00> : vector<8x128xf32>
    %322 = tpu.matmul %321, %43, %cst_148 {dimension_numbers = #tpu.dot_dimension_numbers<[1], [0], [0], [1], [0, 0, 1, 1], [], []>} : vector<8x8xf32>, vector<8x128xf32>, vector<8x128xf32> -> vector<8x128xf32>
    %323 = arith.addf %320, %322 : vector<8x128xf32>
    %c1584 = arith.constant 1584 : index
    %c0_149 = arith.constant 0 : index
    %324 = vector.load %arg1[%c1584, %c0_149] : memref<1720x128xf32, #tpu.memory_space<vmem>>, vector<128x128xf32>
    %cst_150 = arith.constant dense<0.000000e+00> : vector<8x128xf32>
    %325 = tpu.matmul %323, %324, %cst_150 {dimension_numbers = #tpu.dot_dimension_numbers<[1], [0], [0], [1], [0, 0, 1, 1], [], []>} : vector<8x128xf32>, vector<128x128xf32>, vector<8x128xf32> -> vector<8x128xf32>
    %326 = arith.addf %318, %325 : vector<8x128xf32>
    %c1712 = arith.constant 1712 : index
    %c0_151 = arith.constant 0 : index
    %327 = vector.load %arg1[%c1712, %c0_151] : memref<1720x128xf32, #tpu.memory_space<vmem>>, vector<8x128xf32>
    %328 = arith.addf %326, %327 : vector<8x128xf32>
    %c0_152 = arith.constant 0 : index
    %c0_153 = arith.constant 0 : index
    %329 = vector.load %arg3[%c0_152, %c0_153] : memref<8x128xf32, #tpu.memory_space<vmem>>, vector<8x128xf32>
    tpu.vector_store %arg3[%c0_152, %c0_153], %328 {strides = array<i32>} : memref<8x128xf32, #tpu.memory_space<vmem>>, vector<8x128xf32>,
    return
  }
}

</mosaic_0001>

<bundles_post_ra>
// kernel: _lambda_.1
= control target key start
LH: loop header
LB: loop body
LE: loop exit
PB: predicated region body
PF: predicated region fallthrough
CT: control target
= control target key end

     0   :  { %8 = vsyncpa [#allocation3], 0  ;;  %s9039_s0 = inlined_call_operand.vmem [shape: f32[8,128], index: 0, kind: input, shape index: {}]   ;;  %s9040_s1 = inlined_call_operand.hbm [shape: f32[1720,128], index: 1, kind: input, shape index: {}]   ;;  %s9041_s2 = inlined_call_operand.hbm [shape: f32[2624,32], index: 2, kind: input, shape index: {}]   ;;  %s9042_s3 = inlined_call_operand.vmem [shape: f32[8,128], index: 3, kind: output, shape index: {}]  }
   0x1   :  { %9 = vsyncpa [#allocation5], 0  ;;  %s8546_s12 = smov [#allocation2]   ;;  %s8498_s16 = scalar_lea.hbm %s9040_s1, 27520 }
   0x2   :  { %s17_s13 = sshll.u32 %s8546_s12, 4  ;;  %p8499_p0 = scmp.ne.s32.totalorder %s9040_s1, %s8498_s16  ;;  %s18_s13 = int_to_ptr.vmem [resolvable:$true] %s17_s13 }
   0x3   :  { %p8502_p1 = scmp.lt.u32.totalorder %s8498_s16, %s9040_s1 }
   0x5   :  { %p8504_p2 = pnand %p8502_p1, %p8499_p0 }
   0x7   :  { %8507 = shalt.err (!%p8504_p2)
}
   0x8   :  { %s8508_s21 = scalar_lea.vmem %s18_s13, 27520  ;;  %p8513_p4 = scmp.lt.s32.totalorder %s18_s13, %s18_s13 }
   0x9   :  { %p8509_p3 = scmp.ne.s32.totalorder %s18_s13, %s8508_s21  ;;  %p8514_p5 = scmp.lt.s32.totalorder %s8508_s21, %s8508_s21 }
   0xb   :  { %p8515_p6 = por %p8514_p5, %p8513_p4 }
   0xd   :  { %p8516_p7 = pnand %p8515_p6, %p8509_p3 }
   0xf   :  { %8519 = shalt.err (!%p8516_p7)
}
  0x10   :  { %s8547_s22 = smov 128   ;;  %s8548_s23 = smov 8  }
  0x11   :  { %23 = dma.hbm_to_vmem [thread:$0]  %s9040_s1, 27520, %s18_s13, [#allocation3], %s8547_s22, %s8547_s22, %s8548_s23  }
  0x12   :  { %s8549_s26 = smov [#allocation4]   ;;  %s8520_s30 = scalar_lea.hbm %s9041_s2, 41984 }
  0x13   :  { %s29_s27 = sshll.u32 %s8549_s26, 4  ;;  %p8521_p8 = scmp.ne.s32.totalorder %s9041_s2, %s8520_s30  ;;  %s30_s27 = int_to_ptr.vmem [resolvable:$true] %s29_s27 }
  0x14   :  { %p8524_p9 = scmp.lt.u32.totalorder %s8520_s30, %s9041_s2 }
  0x16   :  { %p8526_p10 = pnand %p8524_p9, %p8521_p8 }
  0x18   :  { %8529 = shalt.err (!%p8526_p10)
}
  0x19   :  { %s8530_s8 = scalar_lea.vmem %s30_s27, 41984  ;;  %p8535_p12 = scmp.lt.s32.totalorder %s30_s27, %s30_s27 }
  0x1a   :  { %p8531_p11 = scmp.ne.s32.totalorder %s30_s27, %s8530_s8  ;;  %p8536_p13 = scmp.lt.s32.totalorder %s8530_s8, %s8530_s8 }
  0x1c   :  { %p8537_p0 = por %p8536_p13, %p8535_p12 }
  0x1e   :  { %p8538_p1 = pnand %p8537_p0, %p8531_p11 }
  0x20   :  { %8541 = shalt.err (!%p8538_p1)
}
  0x21   :  { %35 = dma.hbm_to_vmem [thread:$0]  %s9041_s2, 41984, %s30_s27, [#allocation5], %s8547_s22, %s8547_s22, %s8548_s23  }
  0x22   :  { %8542 = dma.done.wait [#allocation3], 27520  }
  0x23   :  { %8543 = vsyncadd [#allocation3], 4294939776 }
  0x24   :  { %8544 = dma.done.wait [#allocation5], 41984  }
  0x25   :  { %8545 = vsyncadd [#allocation5], 4294925312  ;;  %v8550_v0 = vmov 0.0   ;;  %vm8551_vm0 = vmmov 0   ;;  %vm44_vm1 = vcmask 64512   ;;  %v8607_v1 = vld [vmem:[%s9039_s0] sm:$0xff] }
  0x26   :  { %7054 = vmatprep.subr.mxu0 %v8550_v0  ;;  %7059 = vmatprep.subr.mxu1 %v8550_v0  ;;  %v43_v2 = vld [vmem:[#allocation4] sm:$0xff]  ;;  %v134_v3 = vld [vmem:[#allocation4 + $0x8] sm:$0xff]  ;;  %v209_v5 = vld [vmem:[#allocation2 + $0x88] sm:$0xff]  ;;  %v8552_v11 = vmov 0.0|0.0   ;;  %vm1089_vm4 = vcmask 523264   ;;  %vm1148_vm6 = vcmask 130048  }
  0x27   :  { %7056 = vmatprep.mubr.msk.f32.mxu0 %vm8551_vm0, %v8550_v0  ;;  %7061 = vmatprep.mubr.msk.f32.mxu1 %vm8551_vm0, %v8550_v0  ;;  %v208_v4 = vld [vmem:[#allocation2 + $0x80] sm:$0xff]  ;;  %v119_v8 = vld [vmem:[#allocation2 + $0x8] sm:$0xff]  ;;  %v210_v9 = vld [vmem:[#allocation2 + $0x90] sm:$0xff]  ;;  %vm1787_vm8 = vcmask 261120   ;;  %vm3685_vm12 = vcmask 1041408   ;;  %vm3492_vm13 = vcmask 15360  }
  0x28   :  { %7055 = vmatpush3.msra.mxu0 %v8607_v1  ;;  %7060 = vmatpush3.msra.mxu1 %v8607_v1  ;;  %v118_v6 = vld [vmem:[#allocation2] sm:$0xff]  ;;  %v8011_v7 = vpack.c.bf16 %v209_v5, %v208_v4  ;;  %v211_v10 = vld [vmem:[#allocation2 + $0x98] sm:$0xff]  ;;  %v120_v13 = vld [vmem:[#allocation2 + $0x10] sm:$0xff] }
  0x29   :  { %7057 = vmatmul.mubr.msk.f32.vlgmr.msra.gmra.mrb[0].mxu0 %vm44_vm1, %v43_v2  ;;  %7062 = vmatmul.mubr.msk.f32.vlgmr.msra.gmra.mrb[0].mxu1 %vm44_vm1, %v134_v3  ;;  %v8035_v12 = vpack.c.bf16 %v119_v8, %v118_v6  ;;  %v121_v14 = vld [vmem:[#allocation2 + $0x18] sm:$0xff]  ;;  %v8014_v15 = vpack.c.bf16 %v211_v10, %v210_v9  ;;  %v212_v17 = vld [vmem:[#allocation2 + $0xa0] sm:$0xff]  ;;  %v213_v18 = vld [vmem:[#allocation2 + $0xa8] sm:$0xff] }
  0x2a   :  { %8010 = vmatprep.subr.bf16.mxu0 %v8552_v11  ;;  %8034 = vmatprep.subr.bf16.mxu1 %v8552_v11  ;;  %v8038_v16 = vpack.c.bf16 %v121_v14, %v120_v13  ;;  %v122_v19 = vld [vmem:[#allocation2 + $0x20] sm:$0xff]  ;;  %v123_v20 = vld [vmem:[#allocation2 + $0x28] sm:$0xff]  ;;  %v8017_v21 = vpack.c.bf16 %v213_v18, %v212_v17  ;;  %v214_v23 = vld [vmem:[#allocation2 + $0xb0] sm:$0xff] }
  0x2b   :  { %8012 = vmatpush3.bf16.msra.mxu0 %v8011_v7  ;;  %7096 = vmatprep.mubr.msk.f32.mxu0 %vm8551_vm0, %v8550_v0  ;;  %v8041_v22 = vpack.c.bf16 %v123_v20, %v122_v19  ;;  %v215_v24 = vld [vmem:[#allocation2 + $0xb8] sm:$0xff]  ;;  %v124_v25 = vld [vmem:[#allocation2 + $0x30] sm:$0xff]  ;;  %v216_v29 = vld [vmem:[#allocation2 + $0xc0] sm:$0xff] }
  0x2c   :  { %8036 = vmatpush3.bf16.msra.mxu1 %v8035_v12  ;;  %8013 = vmatprep.subr.bf16.mxu0 %v8552_v11  ;;  %v125_v26 = vld [vmem:[#allocation2 + $0x38] sm:$0xff]  ;;  %v8020_v27 = vpack.c.bf16 %v215_v24, %v214_v23  ;;  %v217_v30 = vld [vmem:[#allocation2 + $0xc8] sm:$0xff]  ;;  %v126_v31 = vld [vmem:[#allocation2 + $0x40] sm:$0xff] }
  0x2d   :  { %8037 = vmatprep.subr.bf16.mxu1 %v8552_v11  ;;  %7131 = vmatprep.mubr.msk.f32.mxu1 %vm8551_vm0, %v8550_v0  ;;  %v8044_v28 = vpack.c.bf16 %v125_v26, %v124_v25  ;;  %v127_v32 = vld [vmem:[#allocation2 + $0x48] sm:$0xff]  ;;  %v8023_v33 = vpack.c.bf16 %v217_v30, %v216_v29  ;;  %v218_v35 = vld [vmem:[#allocation2 + $0xd0] sm:$0xff]  ;;  %v219_v36 = vld [vmem:[#allocation2 + $0xd8] sm:$0xff] }
  0x2e   :  { %v8047_v34 = vpack.c.bf16 %v127_v32, %v126_v31  ;;  %v128_v37 = vld [vmem:[#allocation2 + $0x50] sm:$0xff]  ;;  %v129_v38 = vld [vmem:[#allocation2 + $0x58] sm:$0xff]  ;;  %v8026_v39 = vpack.c.bf16 %v219_v36, %v218_v35  ;;  %v220_v41 = vld [vmem:[#allocation2 + $0xe0] sm:$0xff]  ;;  %v8553_v35 = vmov 0  }
  0x2f   :  { %8015 = vmatpush3.bf16.msra.mxu0 %v8014_v15  ;;  %v8050_v40 = vpack.c.bf16 %v129_v38, %v128_v37  ;;  %v221_v42 = vld [vmem:[#allocation2 + $0xe8] sm:$0xff]  ;;  %v130_v43 = vld [vmem:[#allocation2 + $0x60] sm:$0xff]  ;;  %v222_v47 = vld [vmem:[#allocation2 + $0xf0] sm:$0xff]  ;;  %8476 = vset.pattern.permute.xlu1 %v8553_v35 }
  0x30   :  { %8039 = vmatpush3.bf16.msra.mxu1 %v8038_v16  ;;  %8016 = vmatprep.subr.bf16.mxu0 %v8552_v11  ;;  %v131_v44 = vld [vmem:[#allocation2 + $0x68] sm:$0xff]  ;;  %v8029_v45 = vpack.c.bf16 %v221_v42, %v220_v41  ;;  %v223_v48 = vld [vmem:[#allocation2 + $0xf8] sm:$0xff]  ;;  %v132_v49 = vld [vmem:[#allocation2 + $0x70] sm:$0xff] }
  0x31   :  { %8040 = vmatprep.subr.bf16.mxu1 %v8552_v11  ;;  %v8053_v46 = vpack.c.bf16 %v131_v44, %v130_v43  ;;  %v133_v50 = vld [vmem:[#allocation2 + $0x78] sm:$0xff]  ;;  %v8032_v51 = vpack.c.bf16 %v223_v48, %v222_v47  ;;  %v438_v53 = vld [vmem:[#allocation2 + $0x100] sm:$0xff]  ;;  %v439_v54 = vld [vmem:[#allocation2 + $0x108] sm:$0xff]  ;;  %8477 = vset.pattern.permute.xlu0 %v8553_v35 }
  0x32   :  { %v8056_v52 = vpack.c.bf16 %v133_v50, %v132_v49  ;;  %v8059_v55 = vpack.c.bf16 %v439_v54, %v438_v53  ;;  %v440_v58 = vld [vmem:[#allocation2 + $0x110] sm:$0xff]  ;;  %v441_v59 = vld [vmem:[#allocation2 + $0x118] sm:$0xff]  ;;  %v364_v62 = vld [vmem:[#allocation4 + $0x10] sm:$0xff] }
  0x33   :  { %8018 = vmatpush3.bf16.msra.mxu0 %v8017_v21  ;;  %v8062_v63 = vpack.c.bf16 %v441_v59, %v440_v58  ;;  %v442_v2 = vld [vmem:[#allocation2 + $0x120] sm:$0xff]  ;;  %v443_v3 = vld [vmem:[#allocation2 + $0x128] sm:$0xff]  ;;  %v445_v5 = vld [vmem:[#allocation2 + $0x138] sm:$0xff] }
  0x34   :  { %8042 = vmatpush3.bf16.msra.mxu1 %v8041_v22  ;;  %8019 = vmatprep.subr.bf16.mxu0 %v8552_v11  ;;  %v8065_v4 = vpack.c.bf16 %v443_v3, %v442_v2  ;;  %v446_v7 = vld [vmem:[#allocation2 + $0x140] sm:$0xff]  ;;  %v447_v8 = vld [vmem:[#allocation2 + $0x148] sm:$0xff]  ;;  %v448_v10 = vld [vmem:[#allocation2 + $0x150] sm:$0xff] }
  0x35   :  { %8043 = vmatprep.subr.bf16.mxu1 %v8552_v11  ;;  %v8071_v9 = vpack.c.bf16 %v447_v8, %v446_v7  ;;  %v449_v12 = vld [vmem:[#allocation2 + $0x158] sm:$0xff]  ;;  %v450_v14 = vld [vmem:[#allocation2 + $0x160] sm:$0xff]  ;;  %v451_v15 = vld [vmem:[#allocation2 + $0x168] sm:$0xff] }
  0x36   :  { %v8074_v13 = vpack.c.bf16 %v449_v12, %v448_v10  ;;  %v8077_v16 = vpack.c.bf16 %v451_v15, %v450_v14  ;;  %v452_v17 = vld [vmem:[#allocation2 + $0x170] sm:$0xff]  ;;  %v453_v18 = vld [vmem:[#allocation2 + $0x178] sm:$0xff]  ;;  %v555_v41 = vld [vmem:[#allocation4 + $0x28] sm:$0xff] }
  0x37   :  { %8021 = vmatpush3.bf16.msra.mxu0 %v8020_v27  ;;  %v8080_v19 = vpack.c.bf16 %v453_v18, %v452_v17  ;;  %v548_v36 = vld [vmem:[#allocation4 + $0x20] sm:$0xff]  ;;  %v903_v42 = vld [vmem:[#allocation4 + $0x48] sm:$0xff]  ;;  %v556_v54 = vld [vmem:[#allocation4 + $0x30] sm:$0xff] }
  0x38   :  { %8045 = vmatpush3.bf16.msra.mxu1 %v8044_v28  ;;  %8022 = vmatprep.subr.bf16.mxu0 %v8552_v11  ;;  %v525_v28 = vld [vmem:[#allocation2 + $0x180] sm:$0xff]  ;;  %v739_v58 = vld [vmem:[#allocation2 + $0x218] sm:$0xff]  ;;  %v749_v12 = vld [vmem:[#allocation2 + $0x268] sm:$0xff] }
  0x39   :  { %8046 = vmatprep.subr.bf16.mxu1 %v8552_v11  ;;  %v740_v59 = vld [vmem:[#allocation2 + $0x220] sm:$0xff]  ;;  %v743_v3 = vld [vmem:[#allocation2 + $0x238] sm:$0xff]  ;;  %v638_v18 = vld [vmem:[#allocation2 + $0x188] sm:$0xff] }
  0x3a   :  { %v747_v8 = vld [vmem:[#allocation2 + $0x258] sm:$0xff] }
  0x3b   :  { %8024 = vmatpush3.bf16.msra.mxu0 %v8023_v33  ;;  %v751_v15 = vld [vmem:[#allocation2 + $0x278] sm:$0xff] }
  0x3c   :  { %8048 = vmatpush3.bf16.msra.mxu1 %v8047_v34  ;;  %8025 = vmatprep.subr.bf16.mxu0 %v8552_v11  ;;  %v541_v34 = vld [vmem:[#allocation4 + $0x18] sm:$0xff] }
  0x3d   :  { %8049 = vmatprep.subr.bf16.mxu1 %v8552_v11  ;;  %544 = vperm.xlu1 %8476, %v541_v34   ;;  %v645_v34 = vld [vmem:[#allocation2 + $0x1c0] sm:$0xff] }
  0x3f   :  { %8027 = vmatpush3.bf16.msra.mxu0 %v8026_v39 }
  0x40   :  { %8051 = vmatpush3.bf16.msra.mxu1 %v8050_v40  ;;  %8028 = vmatprep.subr.bf16.mxu0 %v8552_v11 }
  0x41   :  { %8052 = vmatprep.subr.bf16.mxu1 %v8552_v11  ;;  %551 = vperm.xlu1 %8476, %v548_v36   ;;  %v646_v36 = vld [vmem:[#allocation2 + $0x1c8] sm:$0xff] }
  0x43   :  { %8030 = vmatpush3.bf16.msra.mxu0 %v8029_v45 }
  0x44   :  { %8054 = vmatpush3.bf16.msra.mxu1 %v8053_v46  ;;  %8031 = vmatprep.subr.bf16.mxu0 %v8552_v11 }
  0x45   :  { %8055 = vmatprep.subr.bf16.mxu1 %v8552_v11 }
  0x47   :  { %8033 = vmatpush3.bf16.msra.mxu0 %v8032_v51  ;;  %v737_v51 = vld [vmem:[#allocation2 + $0x208] sm:$0xff] }
  0x48   :  { %8057 = vmatpush3.bf16.msra.mxu1 %v8056_v52  ;;  %7134 = vmatprep.subr.mxu0 %v8550_v0  ;;  %v738_v52 = vld [vmem:[#allocation2 + $0x210] sm:$0xff] }
  0x49   :  { %8058 = vmatprep.subr.bf16.mxu1 %v8552_v11 }
  0xbc   :  { %v545_v46 = vpop.permute.xlu1 %544 }
  0xc0   :  { %v552_v50 = vpop.permute.xlu1 %551 }
  0xfc   :  { %v114_v56 = vpop.f32.mrb[0].mxu0  ;;  %v204_v57 = vpop.f32.mrb[0].mxu1 }
  0xfd   :  { %v7063_v60 = vpop.f32.mrb[1].mxu1  ;;  %7097 = vmatmul.mubr.f32.vlgmr.msra.gmra.mrb[2].mxu0 %v204_v57  ;;  %7132 = vmatmul.mubr.f32.vlgmr.msra.gmra.mrb[2].mxu1 %v114_v56  ;;  %v7058_v61 = vpop.f32.mrb[1].mxu0  ;;  %v8082_v56 = vpack.c.bf16 %v738_v52, %v737_v51  ;;  %v904_v57 = vld [vmem:[#allocation4 + $0x50] sm:$0xff]  ;;  %v988_v51 = vld [vmem:[#allocation2 + $0x298] sm:$0xff]  ;;  %v989_v52 = vld [vmem:[#allocation2 + $0x2a0] sm:$0xff] }
  0xfe   :  { %7135 = vmatpush3.msra.mxu0 %v8607_v1  ;;  %7136 = vmatprep.mubr.msk.f32.mxu0 %vm8551_vm0, %v8550_v0  ;;  %v444_v1 = vld [vmem:[#allocation2 + $0x130] sm:$0xff]  ;;  %v655_v60 = vld [vmem:[#allocation4 + $0x40] sm:$0xff]  ;;  %v8086_v61 = vpack.c.bf16 %v740_v59, %v739_v58  ;;  %v993_v59 = vld [vmem:[#allocation2 + $0x2c0] sm:$0xff] }
  0xff   :  { %8060 = vmatpush3.bf16.msra.mxu1 %v8059_v55  ;;  %7171 = vmatprep.mubr.msk.f32.mxu1 %vm8551_vm0, %v8550_v0  ;;  %v8068_v6 = vpack.c.bf16 %v445_v5, %v444_v1  ;;  %v654_v55 = vld [vmem:[#allocation4 + $0x38] sm:$0xff]  ;;  %v745_v5 = vld [vmem:[#allocation2 + $0x248] sm:$0xff]  ;;  %v992_v58 = vld [vmem:[#allocation2 + $0x2b8] sm:$0xff] }
 0x100   :  { %8061 = vmatprep.subr.bf16.mxu1 %v8552_v11 }
 0x101   :  { %7137 = vmatmul.mubr.msk.f32.vlgmr.msra.gmra.mrb[4].mxu0 %vm44_vm1, %v364_v62  ;;  %v741_v62 = vld [vmem:[#allocation2 + $0x228] sm:$0xff] }
 0x102   :  { %7176 = vmatprep.mubr.msk.f32.mxu0 %vm44_vm1, %v555_v41 }
 0x103   :  { %8063 = vmatpush3.bf16.msra.mxu1 %v8062_v63  ;;  %v742_v63 = vld [vmem:[#allocation2 + $0x230] sm:$0xff] }
 0x104   :  { %8064 = vmatprep.subr.bf16.mxu1 %v8552_v11  ;;  %v8090_v2 = vpack.c.bf16 %v742_v63, %v741_v62  ;;  %v995_v62 = vld [vmem:[#allocation2 + $0x2d0] sm:$0xff] }
 0x107   :  { %8066 = vmatpush3.bf16.msra.mxu1 %v8065_v4  ;;  %v744_v4 = vld [vmem:[#allocation2 + $0x240] sm:$0xff] }
 0x108   :  { %8067 = vmatprep.subr.bf16.mxu1 %v8552_v11  ;;  %v8094_v1 = vpack.c.bf16 %v744_v4, %v743_v3  ;;  %v997_v3 = vld [vmem:[#allocation2 + $0x2e0] sm:$0xff] }
 0x10b   :  { %8069 = vmatpush3.bf16.msra.mxu1 %v8068_v6  ;;  %v746_v6 = vld [vmem:[#allocation2 + $0x250] sm:$0xff] }
 0x10c   :  { %8070 = vmatprep.subr.bf16.mxu1 %v8552_v11  ;;  %v8098_v7 = vpack.c.bf16 %v746_v6, %v745_v5  ;;  %v999_v5 = vld [vmem:[#allocation2 + $0x2f0] sm:$0xff] }
 0x10f   :  { %8072 = vmatpush3.bf16.msra.mxu1 %v8071_v9  ;;  %v748_v9 = vld [vmem:[#allocation2 + $0x260] sm:$0xff] }
 0x110   :  { %8073 = vmatprep.subr.bf16.mxu1 %v8552_v11  ;;  %v8102_v10 = vpack.c.bf16 %v748_v9, %v747_v8  ;;  %v1001_v8 = vld [vmem:[#allocation2 + $0x300] sm:$0xff] }
 0x113   :  { %8075 = vmatpush3.bf16.msra.mxu1 %v8074_v13  ;;  %v750_v13 = vld [vmem:[#allocation2 + $0x270] sm:$0xff] }
 0x114   :  { %8076 = vmatprep.subr.bf16.mxu1 %v8552_v11  ;;  %v8106_v14 = vpack.c.bf16 %v750_v13, %v749_v12  ;;  %v1079_v12 = vld [vmem:[#allocation2 + $0x308] sm:$0xff] }
 0x117   :  { %8078 = vmatpush3.bf16.msra.mxu1 %v8077_v16  ;;  %v752_v16 = vld [vmem:[#allocation2 + $0x280] sm:$0xff] }
 0x118   :  { %8079 = vmatprep.subr.bf16.mxu1 %v8552_v11  ;;  %v8110_v17 = vpack.c.bf16 %v752_v16, %v751_v15 }
 0x11b   :  { %8081 = vmatpush3.bf16.msra.mxu1 %v8080_v19  ;;  %v639_v19 = vld [vmem:[#allocation2 + $0x190] sm:$0xff] }
 0x1d0   :  { %v290_v20 = vpop.f32.mrb[2].mxu0  ;;  %v360_v21 = vpop.f32.mrb[2].mxu1 }
 0x1d1   :  { %v361_v22 = vadd.f32 %v360_v21, %v290_v20  ;;  %v7098_v23 = vpop.f32.mrb[3].mxu0  ;;  %v7133_v24 = vpop.f32.mrb[3].mxu1  ;;  %v8114_v20 = vpack.c.bf16 %v639_v19, %v638_v18 }
 0x1d2   :  { %v640_v23 = vld [vmem:[#allocation2 + $0x198] sm:$0xff]  ;;  %v641_v24 = vld [vmem:[#allocation2 + $0x1a0] sm:$0xff] }
 0x1d4   :  { %v434_v25 = vpop.f32.mrb[4].mxu0 }
 0x1d5   :  { %v7138_v26 = vpop.f32.mrb[5].mxu0  ;;  %7172 = vmatmul.mubr.f32.vlgmr.msra.gmra.mrb[4].mxu1 %v434_v25 }
 0x1d6   :  { %7256 = vmatprep.mubr.msk.f32.mxu1 %vm44_vm1, %v903_v42  ;;  %v650_v42 = vld [vmem:[#allocation2 + $0x1e8] sm:$0xff] }
 0x2a8   :  { %v520_v27 = vpop.f32.mrb[4].mxu1 }
 0x2a9   :  { %v524_v29 = vadd.f32 %v520_v27, %v361_v22  ;;  %v7173_v30 = vpop.f32.mrb[5].mxu1 }
 0x2aa   :  { %v642_v30 = vld [vmem:[#allocation2 + $0x1a8] sm:$0xff] }
 0x2ab   :  { %v526_v31 = vadd.f32 %v525_v28, %v524_v29  ;;  %v8118_v29 = vpack.c.bf16 %v641_v24, %v640_v23  ;;  %v1117_v23 = vld [vmem:[#allocation4 + $0x60] sm:$0xff]  ;;  %v1130_v24 = vld [vmem:[#allocation4 + $0x68] sm:$0xff] }
 0x2ad   :  { %vm527_vm2 = vcmp.ge.f32.partialorder %v526_v31, 0.0  ;;  %v528_v32 = vmul.f32 0.01, %v526_v31 }
 0x2af   :  { %v529_v33 = vsel %vm527_vm2, %v526_v31, %v528_v32  ;;  %v643_v31 = vld [vmem:[#allocation2 + $0x1b0] sm:$0xff] }
 0x2b0   :  { %530 = vadd.xlane.f32.xlu0 %v529_v33  ;;  %v8122_v32 = vpack.c.bf16 %v643_v31, %v642_v30 }
 0x33d   :  { %v531_v37 = vpop.xlane.xlu0 %530 }
 0x33e   :  { %v532_v38 = vmul.f32 0.0078125, %v531_v37  ;;  %v647_v37 = vld [vmem:[#allocation2 + $0x1d0] sm:$0xff] }
 0x340   :  { %v533_v39 = vsub.f32 %v529_v33, %v532_v38  ;;  %v644_v33 = vld [vmem:[#allocation2 + $0x1b8] sm:$0xff]  ;;  %v8130_v38 = vpack.c.bf16 %v647_v37, %v646_v36  ;;  %v1131_v36 = vld [vmem:[#allocation4 + $0x70] sm:$0xff]  ;;  %v1144_v37 = vld [vmem:[#allocation4 + $0x78] sm:$0xff] }
 0x341   :  { %v8126_v35 = vpack.c.bf16 %v645_v34, %v644_v33 }
 0x342   :  { %v534_v40 = vmul.f32 %v533_v39, %v533_v39 }
 0x344   :  { %535 = vadd.xlane.f32.xlu0 %v534_v40  ;;  %v649_v40 = vld [vmem:[#allocation2 + $0x1e0] sm:$0xff] }
 0x3d1   :  { %v536_v43 = vpop.xlane.xlu0 %535 }
 0x3d2   :  { %v537_v44 = vmul.f32 0.0078125, %v536_v43  ;;  %v651_v43 = vld [vmem:[#allocation2 + $0x1f0] sm:$0xff] }
 0x3d4   :  { %v538_v45 = vadd.f32 1e-05, %v537_v44  ;;  %v8138_v44 = vpack.c.bf16 %v651_v43, %v650_v42 }
 0x3d6   :  { %8478 = vrsqrt.f32 %v538_v45  ;;  %v652_v45 = vld [vmem:[#allocation2 + $0x1f8] sm:$0xff] }
 0x3e0   :  { %v8479_v47 = vpop.eup %8478 }
 0x3e1   :  { %v540_v48 = vmul.f32 %v8479_v47, %v533_v39  ;;  %v648_v39 = vld [vmem:[#allocation2 + $0x1d8] sm:$0xff] }
 0x3e2   :  { %v8134_v41 = vpack.c.bf16 %v649_v40, %v648_v39 }
 0x3e3   :  { %v547_v49 = vmul.f32 %v545_v46, %v540_v48  ;;  %v653_v46 = vld [vmem:[#allocation2 + $0x200] sm:$0xff]  ;;  %v986_v48 = vld [vmem:[#allocation2 + $0x288] sm:$0xff] }
 0x3e4   :  { %v8142_v47 = vpack.c.bf16 %v653_v46, %v652_v45 }
 0x3e5   :  { %v8650_v53 = vadd.f32 %v552_v50, %v547_v49  ;;  %v987_v49 = vld [vmem:[#allocation2 + $0x290] sm:$0xff] }
 0x3e6   :  { %v8146_v50 = vpack.c.bf16 %v987_v49, %v986_v48 }
 0x3e7   :  { %7174 = vmatprep.subr.mxu0 %v8650_v53  ;;  %7254 = vmatprep.subr.mxu1 %v8650_v53 }
 0x3e8   :  { %7175 = vmatpush3.msra.mxu0 %v8650_v53  ;;  %7255 = vmatpush3.msra.mxu1 %v8650_v53 }
 0x3e9   :  { %7177 = vmatmul.mubr.msk.f32.vlgmr.msra.gmra.mrb[6].mxu0 %vm44_vm1, %v556_v54  ;;  %7179 = vmatprep.subr.mxu0 %v8650_v53  ;;  %v8150_v54 = vpack.c.bf16 %v989_v52, %v988_v51 }
 0x3ea   :  { %7180 = vmatpush3.msra.mxu0 %v8650_v53  ;;  %7181 = vmatprep.mubr.msk.f32.mxu0 %vm44_vm1, %v654_v55  ;;  %v990_v55 = vld [vmem:[#allocation2 + $0x2a8] sm:$0xff] }
 0x3eb   :  { %7257 = vmatmul.mubr.msk.f32.vlgmr.msra.gmra.mrb[6].mxu1 %vm44_vm1, %v904_v57  ;;  %8083 = vmatprep.subr.bf16.mxu0 %v8082_v56 }
 0x3ec   :  { %7298 = vmatprep.mubr.msk.f32.mxu1 %vm1148_vm6, %v1144_v37 }
 0x3ed   :  { %7182 = vmatmul.mubr.msk.f32.vlgmr.msra.gmra.mrb[8].mxu0 %vm44_vm1, %v655_v60  ;;  %v8158_v60 = vpack.c.bf16 %v993_v59, %v992_v58  ;;  %v1355_v58 = vld [vmem:[#allocation2 + $0x358] sm:$0xff]  ;;  %v1356_v59 = vld [vmem:[#allocation2 + $0x360] sm:$0xff] }
 0x3ee   :  { %8085 = vmatpush3.bf16.msra.mxu0 %v8082_v56  ;;  %v991_v56 = vld [vmem:[#allocation2 + $0x2b0] sm:$0xff] }
 0x3ef   :  { %8087 = vmatprep.subr.bf16.mxu0 %v8086_v61  ;;  %v8154_v57 = vpack.c.bf16 %v991_v56, %v990_v55 }
 0x3f2   :  { %8089 = vmatpush3.bf16.msra.mxu0 %v8086_v61  ;;  %v994_v61 = vld [vmem:[#allocation2 + $0x2c8] sm:$0xff] }
 0x3f3   :  { %8091 = vmatprep.subr.bf16.mxu0 %v8090_v2  ;;  %v8162_v63 = vpack.c.bf16 %v995_v62, %v994_v61  ;;  %v1146_v61 = vld [vmem:[#allocation4 + $0x88] sm:$0xff]  ;;  %v8186_v62 = vpack.c.bf16 %v1356_v59, %v1355_v58  ;;  %v1767_v58 = vld [vmem:[#allocation2 + $0x3d8] sm:$0xff] }
 0x3f6   :  { %8093 = vmatpush3.bf16.msra.mxu0 %v8090_v2  ;;  %v996_v2 = vld [vmem:[#allocation2 + $0x2d8] sm:$0xff] }
 0x3f7   :  { %8095 = vmatprep.subr.bf16.mxu0 %v8094_v1  ;;  %v8166_v4 = vpack.c.bf16 %v997_v3, %v996_v2  ;;  %v1254_v2 = vld [vmem:[#allocation4 + $0x98] sm:$0xff]  ;;  %v1357_v3 = vld [vmem:[#allocation2 + $0x368] sm:$0xff] }
 0x3fa   :  { %8097 = vmatpush3.bf16.msra.mxu0 %v8094_v1  ;;  %v998_v1 = vld [vmem:[#allocation2 + $0x2e8] sm:$0xff] }
 0x3fb   :  { %8099 = vmatprep.subr.bf16.mxu0 %v8098_v7  ;;  %v8170_v6 = vpack.c.bf16 %v999_v5, %v998_v1  ;;  %v1255_v1 = vld [vmem:[#allocation4 + $0xa0] sm:$0xff]  ;;  %v1256_v5 = vld [vmem:[#allocation4 + $0xa8] sm:$0xff] }
 0x3fe   :  { %8101 = vmatpush3.bf16.msra.mxu0 %v8098_v7  ;;  %v1000_v7 = vld [vmem:[#allocation2 + $0x2f8] sm:$0xff] }
 0x3ff   :  { %8103 = vmatprep.subr.bf16.mxu0 %v8102_v10  ;;  %v8174_v9 = vpack.c.bf16 %v1001_v8, %v1000_v7  ;;  %v1257_v7 = vld [vmem:[#allocation4 + $0xb0] sm:$0xff]  ;;  %v1359_v8 = vld [vmem:[#allocation2 + $0x378] sm:$0xff] }
 0x402   :  { %8105 = vmatpush3.bf16.msra.mxu0 %v8102_v10  ;;  %v1080_v10 = vld [vmem:[#allocation2 + $0x310] sm:$0xff] }
 0x403   :  { %8107 = vmatprep.subr.bf16.mxu0 %v8106_v14 }
 0x406   :  { %8109 = vmatpush3.bf16.msra.mxu0 %v8106_v14 }
 0x407   :  { %8111 = vmatprep.subr.bf16.mxu0 %v8110_v17 }
 0x40a   :  { %8113 = vmatpush3.bf16.msra.mxu0 %v8110_v17 }
 0x40b   :  { %8115 = vmatprep.subr.bf16.mxu0 %v8114_v20 }
 0x4bc   :  { %v7178_v21 = vpop.f32.mrb[6].mxu0 }
 0x4bd   :  { %v629_v22 = vpop.f32.mrb[7].mxu0 }
 0x4be   :  { %v8662_v25 = vpop.f32.mrb[6].mxu1 }
 0x4bf   :  { %v977_v26 = vpop.f32.mrb[7].mxu1 }
 0x4c0   :  { %v7183_v27 = vpop.f32.mrb[8].mxu0 }
 0x4c1   :  { %v728_v28 = vpop.f32.mrb[9].mxu0 }
 0x4c2   :  { %7216 = vmatprep.mubr.f32.mxu0 %v728_v28 }
 0x4c3   :  { %7217 = vmatmul.mubr.f32.vlgmr.msra.gmra.mrb[10].mxu0 %v7183_v27 }
 0x4c4   :  { %8117 = vmatpush3.bf16.msra.mxu0 %v8114_v20  ;;  %7251 = vmatprep.mubr.f32.mxu0 %v629_v22 }
 0x4c5   :  { %8119 = vmatprep.subr.bf16.mxu0 %v8118_v29 }
 0x4c8   :  { %8121 = vmatpush3.bf16.msra.mxu0 %v8118_v29 }
 0x4c9   :  { %8123 = vmatprep.subr.bf16.mxu0 %v8122_v32 }
 0x4cc   :  { %8125 = vmatpush3.bf16.msra.mxu0 %v8122_v32 }
 0x4cd   :  { %8127 = vmatprep.subr.bf16.mxu0 %v8126_v35 }
 0x4d0   :  { %8129 = vmatpush3.bf16.msra.mxu0 %v8126_v35 }
 0x4d1   :  { %8131 = vmatprep.subr.bf16.mxu0 %v8130_v38 }
 0x4d4   :  { %8133 = vmatpush3.bf16.msra.mxu0 %v8130_v38 }
 0x4d5   :  { %8135 = vmatprep.subr.bf16.mxu0 %v8134_v41 }
 0x4d8   :  { %8137 = vmatpush3.bf16.msra.mxu0 %v8134_v41 }
 0x4d9   :  { %8139 = vmatprep.subr.bf16.mxu0 %v8138_v44 }
 0x4dc   :  { %8141 = vmatpush3.bf16.msra.mxu0 %v8138_v44 }
 0x4dd   :  { %8143 = vmatprep.subr.bf16.mxu0 %v8142_v47 }
 0x4e0   :  { %8145 = vmatpush3.bf16.msra.mxu0 %v8142_v47 }
 0x4e1   :  { %8147 = vmatprep.subr.bf16.mxu0 %v8146_v50 }
 0x4e3   :  { %7252 = vmatmul.mubr.f32.vlgmr.msra.gmra.mrb[10].mxu0 %v7178_v21 }
 0x4e4   :  { %8149 = vmatpush3.bf16.msra.mxu0 %v8146_v50  ;;  %7291 = vmatprep.mubr.f32.mxu0 %v977_v26 }
 0x4e5   :  { %8151 = vmatprep.subr.bf16.mxu0 %v8150_v54 }
 0x4e8   :  { %8153 = vmatpush3.bf16.msra.mxu0 %v8150_v54 }
 0x4e9   :  { %8155 = vmatprep.subr.bf16.mxu0 %v8154_v57 }
 0x4ec   :  { %8157 = vmatpush3.bf16.msra.mxu0 %v8154_v57 }
 0x4ed   :  { %8159 = vmatprep.subr.bf16.mxu0 %v8158_v60 }
 0x4f0   :  { %8161 = vmatpush3.bf16.msra.mxu0 %v8158_v60  ;;  %v1145_v60 = vld [vmem:[#allocation4 + $0x80] sm:$0xff] }
 0x4f1   :  { %8163 = vmatprep.subr.bf16.mxu0 %v8162_v63 }
 0x4f4   :  { %8165 = vmatpush3.bf16.msra.mxu0 %v8162_v63  ;;  %v1147_v63 = vld [vmem:[#allocation4 + $0x90] sm:$0xff] }
 0x4f5   :  { %8167 = vmatprep.subr.bf16.mxu0 %v8166_v4 }
 0x4f8   :  { %8169 = vmatpush3.bf16.msra.mxu0 %v8166_v4  ;;  %v1358_v4 = vld [vmem:[#allocation2 + $0x370] sm:$0xff] }
 0x4f9   :  { %8171 = vmatprep.subr.bf16.mxu0 %v8170_v6 }
 0x4fc   :  { %8173 = vmatpush3.bf16.msra.mxu0 %v8170_v6  ;;  %v8190_v6 = vpack.c.bf16 %v1358_v4, %v1357_v3  ;;  %v1769_v3 = vld [vmem:[#allocation2 + $0x3e8] sm:$0xff] }
 0x4fd   :  { %8175 = vmatprep.subr.bf16.mxu0 %v8174_v9 }
 0x500   :  { %8177 = vmatpush3.bf16.msra.mxu0 %v8174_v9  ;;  %v1360_v9 = vld [vmem:[#allocation2 + $0x380] sm:$0xff] }
 0x503   :  { %7292 = vmatmul.mubr.f32.vlgmr.msra.gmra.mrb[10].mxu0 %v8662_v25  ;;  %v1116_v25 = vld [vmem:[#allocation4 + $0x58] sm:$0xff] }
 0x5d6   :  { %v7293_v13 = vpop.f32.mrb[10].mxu0 }
 0x5d7   :  { %v1082_v14 = vadd.f32 %v7293_v13, %v1080_v10  ;;  %v1068_v15 = vpop.f32.mrb[11].mxu0  ;;  %v8194_v10 = vpack.c.bf16 %v1360_v9, %v1359_v8  ;;  %v1362_v13 = vld [vmem:[#allocation2 + $0x390] sm:$0xff] }
 0x5d8   :  { %v1081_v16 = vadd.f32 %v1079_v12, %v1068_v15  ;;  %v1361_v12 = vld [vmem:[#allocation2 + $0x388] sm:$0xff]  ;;  %v1246_v15 = vld [vmem:[#allocation2 + $0x318] sm:$0xff] }
 0x5d9   :  { %v1086_v17 = vmul.f32 0.01, %v1082_v14  ;;  %vm1084_vm3 = vcmp.ge.f32.partialorder %v1082_v14, 0.0 }
 0x5da   :  { %v1085_v18 = vmul.f32 0.01, %v1081_v16  ;;  %vm1083_vm5 = vcmp.ge.f32.partialorder %v1081_v16, 0.0 }
 0x5db   :  { %v1088_v19 = vsel %vm1084_vm3, %v1082_v14, %v1086_v17  ;;  %v8198_v14 = vpack.c.bf16 %v1362_v13, %v1361_v12 }
 0x5dc   :  { %v1093_v20 = vsel %vm1089_vm4, %v1088_v19, 0.0  ;;  %v1087_v21 = vsel %vm1083_vm5, %v1081_v16, %v1085_v18  ;;  %v1247_v16 = vld [vmem:[#allocation2 + $0x320] sm:$0xff] }
 0x5dd   :  { %1094 = vadd.xlane.f32.xlu1 %v1093_v20  ;;  %v1090_v22 = vsel %vm1089_vm4, %v1087_v21, 0.0  ;;  %v8202_v17 = vpack.c.bf16 %v1247_v16, %v1246_v15 }
 0x5de   :  { %1091 = vadd.xlane.f32.xlu0 %v1090_v22  ;;  %v1248_v22 = vld [vmem:[#allocation2 + $0x328] sm:$0xff] }
 0x5ee   :  { %1125 = vperm.xlu1 %8476, %v1117_v23   ;;  %v1249_v23 = vld [vmem:[#allocation2 + $0x330] sm:$0xff] }
 0x5f2   :  { %1134 = vperm.xlu1 %8476, %v1130_v24  }
 0x5f4   :  { %1120 = vperm.xlu0 %8477, %v1116_v25  }
 0x66a   :  { %v1095_v26 = vpop.xlane.xlu1 %1094 }
 0x66b   :  { %v1097_v27 = vmul.f32 0.015625, %v1095_v26  ;;  %v1092_v28 = vpop.xlane.xlu0 %1091  ;;  %v8206_v26 = vpack.c.bf16 %v1249_v23, %v1248_v22  ;;  %v1842_v22 = vld [vmem:[#allocation4 + $0xe8] sm:$0xff]  ;;  %v1869_v23 = vld [vmem:[#allocation4 + $0x100] sm:$0xff] }
 0x66c   :  { %v1096_v29 = vmul.f32 0.015625, %v1092_v28  ;;  %v1251_v28 = vld [vmem:[#allocation2 + $0x340] sm:$0xff] }
 0x66d   :  { %v1099_v30 = vsub.f32 %v1088_v19, %v1097_v27  ;;  %v1250_v27 = vld [vmem:[#allocation2 + $0x338] sm:$0xff] }
 0x66e   :  { %v1098_v31 = vsub.f32 %v1087_v21, %v1096_v29  ;;  %v1126_v47 = vpop.permute.xlu1 %1125 }
 0x66f   :  { %v1101_v32 = vmul.f32 %v1099_v30, %v1099_v30 }
 0x670   :  { %v1100_v34 = vmul.f32 %v1098_v31, %v1098_v31 }
 0x671   :  { %v1105_v33 = vsel %vm1089_vm4, %v1101_v32, 0.0  ;;  %v1252_v32 = vld [vmem:[#allocation2 + $0x348] sm:$0xff] }
 0x672   :  { %1106 = vadd.xlane.f32.xlu0 %v1105_v33  ;;  %v1102_v35 = vsel %vm1089_vm4, %v1100_v34, 0.0  ;;  %v1135_v52 = vpop.permute.xlu1 %1134  ;;  %v1253_v33 = vld [vmem:[#allocation2 + $0x350] sm:$0xff] }
 0x673   :  { %v1121_v38 = vpop.permute.xlu0 %1120  ;;  %v8214_v34 = vpack.c.bf16 %v1253_v33, %v1252_v32 }
 0x676   :  { %1103 = vadd.xlane.f32.xlu0 %v1102_v35  ;;  %v1658_v35 = vld [vmem:[#allocation2 + $0x398] sm:$0xff] }
 0x68c   :  { %1139 = vperm.xlu0 %8477, %v1131_v36   ;;  %v1659_v36 = vld [vmem:[#allocation2 + $0x3a0] sm:$0xff] }
 0x68d   :  { %v8222_v37 = vpack.c.bf16 %v1659_v36, %v1658_v35 }
 0x6ff   :  { %v1107_v39 = vpop.xlane.xlu0 %1106 }
 0x700   :  { %v1109_v40 = vmul.f32 0.015625, %v1107_v39  ;;  %v1660_v39 = vld [vmem:[#allocation2 + $0x3a8] sm:$0xff] }
 0x702   :  { %v1111_v41 = vadd.f32 1e-05, %v1109_v40  ;;  %v1661_v40 = vld [vmem:[#allocation2 + $0x3b0] sm:$0xff] }
 0x703   :  { %v1104_v42 = vpop.xlane.xlu0 %1103 }
 0x704   :  { %8480 = vrsqrt.f32 %v1111_v41  ;;  %v1108_v43 = vmul.f32 0.015625, %v1104_v42  ;;  %v1558_v41 = vld [vmem:[#allocation4 + $0xc0] sm:$0xff]  ;;  %v1559_v42 = vld [vmem:[#allocation4 + $0xc8] sm:$0xff] }
 0x706   :  { %v1110_v44 = vadd.f32 1e-05, %v1108_v43  ;;  %v8226_v43 = vpack.c.bf16 %v1661_v40, %v1660_v39 }
 0x708   :  { %8482 = vrsqrt.f32 %v1110_v44  ;;  %v1662_v44 = vld [vmem:[#allocation2 + $0x3b8] sm:$0xff] }
 0x70b   :  { %v1140_v54 = vpop.permute.xlu0 %1139 }
 0x70e   :  { %v8481_v45 = vpop.eup %8480 }
 0x70f   :  { %v1115_v46 = vmul.f32 %v8481_v45, %v1099_v30  ;;  %v1663_v45 = vld [vmem:[#allocation2 + $0x3c0] sm:$0xff] }
 0x711   :  { %v1129_v50 = vmul.f32 %v1126_v47, %v1115_v46  ;;  %v1560_v46 = vld [vmem:[#allocation4 + $0xd0] sm:$0xff]  ;;  %v8230_v47 = vpack.c.bf16 %v1663_v45, %v1662_v44  ;;  %v1870_v45 = vld [vmem:[#allocation4 + $0x108] sm:$0xff] }
 0x712   :  { %v8483_v48 = vpop.eup %8482 }
 0x713   :  { %v1114_v49 = vmul.f32 %v8483_v48, %v1098_v31  ;;  %v1143_v56 = vadd.f32 %v1140_v54, %v1129_v50  ;;  %v8210_v31 = vpack.c.bf16 %v1251_v28, %v1250_v27  ;;  %v1664_v48 = vld [vmem:[#allocation2 + $0x3c8] sm:$0xff] }
 0x715   :  { %v1128_v51 = vmul.f32 %v1121_v38, %v1114_v49  ;;  %v1557_v38 = vld [vmem:[#allocation4 + $0xb8] sm:$0xff] }
 0x716   :  { %v1665_v49 = vld [vmem:[#allocation2 + $0x3d0] sm:$0xff] }
 0x717   :  { %v1142_v55 = vadd.f32 %v1135_v52, %v1128_v51  ;;  %v8234_v50 = vpack.c.bf16 %v1665_v49, %v1664_v48  ;;  %v2731_v48 = vld [vmem:[#allocation4 + $0x810] sm:$0xff]  ;;  %v2730_v49 = vld [vmem:[#allocation4 + $0x808] sm:$0xff] }
 0x719   :  { %v8670_v57 = vpack.c.bf16 %v1143_v56, %v1142_v55  ;;  %v1768_v56 = vld [vmem:[#allocation2 + $0x3e0] sm:$0xff] }
 0x71b   :  { %8179 = vmatprep.subr.bf16.mxu1 %v8670_v57 }
 0x71c   :  { %8181 = vmatpush3.bf16.msra.mxu1 %v8670_v57 }
 0x71d   :  { %8183 = vmatprep.subr.bf16.mxu1 %v8670_v57 }
 0x71f   :  { %7299 = vmatmul.mubr.msk.f32.vlgmr.msra.gmra.mrb[8].mxu1 %vm1148_vm6, %v1145_v60 }
 0x720   :  { %8185 = vmatpush3.bf16.msra.mxu1 %v8670_v57  ;;  %7301 = vmatprep.mubr.msk.f32.mxu1 %vm1148_vm6, %v1146_v61 }
 0x721   :  { %8187 = vmatprep.subr.bf16.mxu1 %v8186_v62 }
 0x723   :  { %7302 = vmatmul.mubr.msk.f32.gmra.mrb[10].mxu1 %vm1148_vm6, %v1147_v63  ;;  %v1770_v63 = vld [vmem:[#allocation2 + $0x3f0] sm:$0xff] }
 0x724   :  { %7308 = vmatprep.mubr.msk.f32.mxu1 %vm1148_vm6, %v1254_v2 }
 0x727   :  { %7309 = vmatmul.mubr.msk.f32.vlgmr.msra.gmra.mrb[12].mxu1 %vm1148_vm6, %v1255_v1 }
 0x728   :  { %7311 = vmatprep.mubr.msk.f32.mxu1 %vm1148_vm6, %v1256_v5  ;;  %8189 = vmatpush3.bf16.msra.mxu1 %v8186_v62 }
 0x729   :  { %8191 = vmatprep.subr.bf16.mxu1 %v8190_v6 }
 0x72b   :  { %7312 = vmatmul.mubr.msk.f32.gmra.mrb[14].mxu1 %vm1148_vm6, %v1257_v7 }
 0x72c   :  { %8193 = vmatpush3.bf16.msra.mxu1 %v8190_v6 }
 0x72d   :  { %8195 = vmatprep.subr.bf16.mxu1 %v8194_v10 }
 0x730   :  { %8197 = vmatpush3.bf16.msra.mxu1 %v8194_v10 }
 0x731   :  { %8199 = vmatprep.subr.bf16.mxu1 %v8198_v14 }
 0x734   :  { %8201 = vmatpush3.bf16.msra.mxu1 %v8198_v14 }
 0x735   :  { %8203 = vmatprep.subr.bf16.mxu1 %v8202_v17 }
 0x7f2   :  { %v7300_v18 = vpop.f32.mrb[8].mxu1 }
 0x7f3   :  { %v1227_v19 = vpop.f32.mrb[9].mxu1 }
 0x7f6   :  { %v7303_v20 = vpop.f32.mrb[10].mxu1 }
 0x7f7   :  { %v1237_v21 = vpop.f32.mrb[11].mxu1 }
 0x7fa   :  { %v7310_v24 = vpop.f32.mrb[12].mxu1 }
 0x7fb   :  { %v1336_v25 = vpop.f32.mrb[13].mxu1 }
 0x7fc   :  { %7330 = vmatprep.mubr.msk.f32.mxu1 %vm1089_vm4, %v1336_v25 }
 0x7fd   :  { %7331 = vmatmul.mubr.msk.f32.vlgmr.msra.gmra.mrb[16].mxu1 %vm1089_vm4, %v7310_v24  ;;  %v1843_v24 = vld [vmem:[#allocation4 + $0xf0] sm:$0xff] }
 0x7fe   :  { %8205 = vmatpush3.bf16.msra.mxu1 %v8202_v17  ;;  %v7313_v29 = vpop.f32.mrb[14].mxu1 }
 0x7ff   :  { %v1346_v30 = vpop.f32.mrb[15].mxu1  ;;  %8207 = vmatprep.subr.bf16.mxu1 %v8206_v26 }
 0x800   :  { %7333 = vmatprep.mubr.msk.f32.mxu1 %vm1089_vm4, %v1346_v30 }
 0x801   :  { %7334 = vmatmul.mubr.msk.f32.gmra.mrb[18].mxu1 %vm1089_vm4, %v7313_v29 }
 0x802   :  { %8209 = vmatpush3.bf16.msra.mxu1 %v8206_v26  ;;  %7352 = vmatprep.mubr.msk.f32.mxu1 %vm1089_vm4, %v1227_v19  ;;  %v1841_v19 = vld [vmem:[#allocation4 + $0xe0] sm:$0xff] }
 0x803   :  { %8211 = vmatprep.subr.bf16.mxu1 %v8210_v31 }
 0x806   :  { %8213 = vmatpush3.bf16.msra.mxu1 %v8210_v31 }
 0x807   :  { %8215 = vmatprep.subr.bf16.mxu1 %v8214_v34 }
 0x80a   :  { %8217 = vmatpush3.bf16.msra.mxu1 %v8214_v34 }
 0x80b   :  { %8219 = vmatprep.subr.bf16.mxu1 %v8670_v57 }
 0x80d   :  { %7353 = vmatmul.mubr.msk.f32.vlgmr.msra.gmra.mrb[16].mxu1 %vm1089_vm4, %v7300_v18 }
 0x80e   :  { %7355 = vmatprep.mubr.msk.f32.mxu1 %vm1089_vm4, %v1237_v21  ;;  %8221 = vmatpush3.bf16.msra.mxu1 %v8670_v57  ;;  %v1840_v21 = vld [vmem:[#allocation4 + $0xd8] sm:$0xff] }
 0x80f   :  { %8223 = vmatprep.subr.bf16.mxu1 %v8222_v37 }
 0x811   :  { %7356 = vmatmul.mubr.msk.f32.gmra.mrb[18].mxu1 %vm1089_vm4, %v7303_v20  ;;  %v1868_v20 = vld [vmem:[#allocation4 + $0xf8] sm:$0xff] }
 0x812   :  { %7362 = vmatprep.mubr.msk.f32.mxu1 %vm1148_vm6, %v1557_v38 }
 0x815   :  { %7363 = vmatmul.mubr.msk.f32.vlgmr.msra.gmra.mrb[20].mxu1 %vm1148_vm6, %v1558_v41 }
 0x816   :  { %7365 = vmatprep.mubr.msk.f32.mxu1 %vm1148_vm6, %v1559_v42  ;;  %8225 = vmatpush3.bf16.msra.mxu1 %v8222_v37 }
 0x817   :  { %8227 = vmatprep.subr.bf16.mxu1 %v8226_v43 }
 0x819   :  { %7366 = vmatmul.mubr.msk.f32.gmra.mrb[22].mxu1 %vm1148_vm6, %v1560_v46  ;;  %v2729_v46 = vld [vmem:[#allocation4 + $0x800] sm:$0xff] }
 0x81a   :  { %8229 = vmatpush3.bf16.msra.mxu1 %v8226_v43 }
 0x81b   :  { %8231 = vmatprep.subr.bf16.mxu1 %v8230_v47 }
 0x81e   :  { %8233 = vmatpush3.bf16.msra.mxu1 %v8230_v47  ;;  %v1871_v47 = vld [vmem:[#allocation4 + $0x110] sm:$0xff] }
 0x81f   :  { %8235 = vmatprep.subr.bf16.mxu1 %v8234_v50 }
 0x822   :  { %8237 = vmatpush3.bf16.msra.mxu1 %v8234_v50  ;;  %v2732_v50 = vld [vmem:[#allocation4 + $0x818] sm:$0xff] }
 0x8e8   :  { %v7364_v51 = vpop.f32.mrb[20].mxu1 }
 0x8e9   :  { %v1639_v52 = vpop.f32.mrb[21].mxu1 }
 0x8ea   :  { %7384 = vmatprep.mubr.msk.f32.mxu1 %vm1089_vm4, %v1639_v52  ;;  %v1902_v52 = vld [vmem:[#allocation4 + $0x208] sm:$0xff] }
 0x8eb   :  { %7385 = vmatmul.mubr.msk.f32.vlgmr.msra.gmra.mrb[16].mxu1 %vm1089_vm4, %v7364_v51  ;;  %v1896_v51 = vld [vmem:[#allocation4 + $0x1d8] sm:$0xff] }
 0x8ec   :  { %v7367_v54 = vpop.f32.mrb[22].mxu1  ;;  %7398 = vmatprep.mubr.msk.f32.mxu0 %vm1787_vm8, %v1896_v51  ;;  %v1918_v51 = vld [vmem:[#allocation4 + $0x288] sm:$0xff] }
 0x8ed   :  { %v1649_v55 = vpop.f32.mrb[23].mxu1 }
 0x8ee   :  { %7387 = vmatprep.mubr.msk.f32.mxu1 %vm1089_vm4, %v1649_v55 }
 0x8ef   :  { %7388 = vmatmul.mubr.msk.f32.gmra.mrb[18].mxu1 %vm1089_vm4, %v7367_v54 }
 0x8f0   :  { %7407 = vmatprep.mubr.msk.f32.mxu1 %vm1787_vm8, %v1902_v52  ;;  %v1919_v52 = vld [vmem:[#allocation4 + $0x290] sm:$0xff] }
 0x9be   :  { %v7386_v59 = vpop.f32.mrb[16].mxu1 }
 0x9bf   :  { %v1772_v60 = vadd.f32 %v7386_v59, %v1768_v56  ;;  %v1744_v61 = vpop.f32.mrb[17].mxu1 }
 0x9c0   :  { %v1771_v62 = vadd.f32 %v1767_v58, %v1744_v61 }
 0x9c1   :  { %v1780_v2 = vmul.f32 0.01, %v1772_v60  ;;  %vm1776_vm7 = vcmp.ge.f32.partialorder %v1772_v60, 0.0 }
 0x9c2   :  { %v1779_v4 = vmul.f32 0.01, %v1771_v62  ;;  %v7389_v1 = vpop.f32.mrb[18].mxu1  ;;  %vm1775_vm9 = vcmp.ge.f32.partialorder %v1771_v62, 0.0 }
 0x9c3   :  { %v1774_v5 = vadd.f32 %v7389_v1, %v1770_v63  ;;  %v1754_v6 = vpop.f32.mrb[19].mxu1  ;;  %v1784_v7 = vsel %vm1776_vm7, %v1772_v60, %v1780_v2 }
 0x9c4   :  { %v1773_v8 = vadd.f32 %v1769_v3, %v1754_v6  ;;  %v1791_v9 = vsel %vm1787_vm8, %v1784_v7, 0.0  ;;  %v1783_v10 = vsel %vm1775_vm9, %v1771_v62, %v1779_v4 }
 0x9c5   :  { %v1782_v12 = vmul.f32 0.01, %v1774_v5  ;;  %1792 = vadd.xlane.f32.xlu0 %v1791_v9  ;;  %v1788_v13 = vsel %vm1787_vm8, %v1783_v10, 0.0  ;;  %vm1778_vm10 = vcmp.ge.f32.partialorder %v1774_v5, 0.0 }
 0x9c6   :  { %v1781_v14 = vmul.f32 0.01, %v1773_v8  ;;  %1789 = vadd.xlane.f32.xlu1 %v1788_v13  ;;  %vm1777_vm11 = vcmp.ge.f32.partialorder %v1773_v8, 0.0 }
 0x9c7   :  { %v1786_v15 = vsel %vm1778_vm10, %v1774_v5, %v1782_v12 }
 0x9c8   :  { %v1797_v16 = vsel %vm1787_vm8, %v1786_v15, 0.0  ;;  %v1785_v17 = vsel %vm1777_vm11, %v1773_v8, %v1781_v14 }
 0x9c9   :  { %v1794_v18 = vsel %vm1787_vm8, %v1785_v17, 0.0 }
 0x9ca   :  { %1798 = vadd.xlane.f32.xlu1 %v1797_v16  ;;  %1795 = vadd.xlane.f32.xlu0 %v1794_v18 }
 0x9db   :  { %1851 = vperm.xlu1 %8476, %v1841_v19  }
 0x9df   :  { %1874 = vperm.xlu1 %8476, %v1868_v20  }
 0x9e0   :  { %1846 = vperm.xlu0 %8477, %v1840_v21  }
 0x9e3   :  { %1856 = vperm.xlu1 %8476, %v1842_v22  }
 0x9e4   :  { %1879 = vperm.xlu0 %8477, %v1869_v23  }
 0x9e8   :  { %1861 = vperm.xlu0 %8477, %v1843_v24  }
 0xa52   :  { %v1793_v25 = vpop.xlane.xlu0 %1792 }
 0xa53   :  { %v1801_v26 = vmul.f32 0.03125, %v1793_v25  ;;  %v1790_v27 = vpop.xlane.xlu1 %1789 }
 0xa54   :  { %v1800_v28 = vmul.f32 0.03125, %v1790_v27 }
 0xa55   :  { %v1805_v29 = vsub.f32 %v1784_v7, %v1801_v26 }
 0xa56   :  { %v1804_v30 = vsub.f32 %v1783_v10, %v1800_v28 }
 0xa57   :  { %v1799_v31 = vpop.xlane.xlu1 %1798  ;;  %v1796_v32 = vpop.xlane.xlu0 %1795  ;;  %v1809_v33 = vmul.f32 %v1805_v29, %v1805_v29 }
 0xa58   :  { %v1803_v34 = vmul.f32 0.03125, %v1799_v31  ;;  %v1802_v35 = vmul.f32 0.03125, %v1796_v32  ;;  %v1808_v36 = vmul.f32 %v1804_v30, %v1804_v30  ;;  %v1903_v32 = vld [vmem:[#allocation4 + $0x210] sm:$0xff] }
 0xa59   :  { %v1815_v37 = vsel %vm1787_vm8, %v1809_v33, 0.0  ;;  %v1898_v33 = vld [vmem:[#allocation4 + $0x1e8] sm:$0xff] }
 0xa5a   :  { %v1807_v38 = vsub.f32 %v1786_v15, %v1803_v34  ;;  %v1806_v39 = vsub.f32 %v1785_v17, %v1802_v35  ;;  %1816 = vadd.xlane.f32.xlu1 %v1815_v37  ;;  %v1812_v40 = vsel %vm1787_vm8, %v1808_v36, 0.0  ;;  %v1904_v34 = vld [vmem:[#allocation4 + $0x218] sm:$0xff]  ;;  %v1899_v35 = vld [vmem:[#allocation4 + $0x1f0] sm:$0xff]  ;;  %v1905_v36 = vld [vmem:[#allocation4 + $0x220] sm:$0xff] }
 0xa5b   :  { %1813 = vadd.xlane.f32.xlu0 %v1812_v40  ;;  %v1852_v54 = vpop.permute.xlu1 %1851  ;;  %v1900_v37 = vld [vmem:[#allocation4 + $0x1f8] sm:$0xff]  ;;  %v1907_v40 = vld [vmem:[#allocation4 + $0x230] sm:$0xff] }
 0xa5c   :  { %v1811_v41 = vmul.f32 %v1807_v38, %v1807_v38  ;;  %v1810_v42 = vmul.f32 %v1806_v39, %v1806_v39 }
 0xa5e   :  { %v1821_v43 = vsel %vm1787_vm8, %v1811_v41, 0.0  ;;  %v1818_v44 = vsel %vm1787_vm8, %v1810_v42, 0.0  ;;  %v1908_v41 = vld [vmem:[#allocation4 + $0x238] sm:$0xff]  ;;  %v1909_v42 = vld [vmem:[#allocation4 + $0x240] sm:$0xff] }
 0xa5f   :  { %1822 = vadd.xlane.f32.xlu1 %v1821_v43  ;;  %1819 = vadd.xlane.f32.xlu0 %v1818_v44  ;;  %v1847_v55 = vpop.permute.xlu0 %1846  ;;  %v1875_v56 = vpop.permute.xlu1 %1874  ;;  %v1910_v43 = vld [vmem:[#allocation4 + $0x248] sm:$0xff]  ;;  %v1911_v44 = vld [vmem:[#allocation4 + $0x250] sm:$0xff] }
 0xa63   :  { %v1880_v58 = vpop.permute.xlu0 %1879  ;;  %v1857_v59 = vpop.permute.xlu1 %1856 }
 0xa67   :  { %v1862_v60 = vpop.permute.xlu0 %1861 }
 0xa70   :  { %1884 = vperm.xlu1 %8476, %v1870_v45   ;;  %v1912_v45 = vld [vmem:[#allocation4 + $0x258] sm:$0xff] }
 0xa74   :  { %2735 = vperm.xlu1 %8476, %v2729_v46   ;;  %v1913_v46 = vld [vmem:[#allocation4 + $0x260] sm:$0xff] }
 0xa75   :  { %1889 = vperm.xlu0 %8477, %v1871_v47   ;;  %v1914_v47 = vld [vmem:[#allocation4 + $0x268] sm:$0xff] }
 0xa78   :  { %2745 = vperm.xlu1 %8476, %v2731_v48   ;;  %v1915_v48 = vld [vmem:[#allocation4 + $0x270] sm:$0xff] }
 0xa79   :  { %2740 = vperm.xlu0 %8477, %v2730_v49   ;;  %v1916_v49 = vld [vmem:[#allocation4 + $0x278] sm:$0xff] }
 0xa7d   :  { %2750 = vperm.xlu0 %8477, %v2732_v50   ;;  %v1917_v50 = vld [vmem:[#allocation4 + $0x280] sm:$0xff] }
 0xae7   :  { %v1817_v61 = vpop.xlane.xlu1 %1816 }
 0xae8   :  { %v1825_v62 = vmul.f32 0.03125, %v1817_v61  ;;  %v1814_v63 = vpop.xlane.xlu0 %1813  ;;  %v1926_v61 = vld [vmem:[#allocation4 + $0x2c8] sm:$0xff] }
 0xae9   :  { %v1824_v2 = vmul.f32 0.03125, %v1814_v63  ;;  %v1928_v63 = vld [vmem:[#allocation4 + $0x2d8] sm:$0xff] }
 0xaea   :  { %v1829_v3 = vadd.f32 1e-05, %v1825_v62  ;;  %v1927_v62 = vld [vmem:[#allocation4 + $0x2d0] sm:$0xff] }
 0xaeb   :  { %v1828_v4 = vadd.f32 1e-05, %v1824_v2  ;;  %v1929_v2 = vld [vmem:[#allocation4 + $0x2e0] sm:$0xff] }
 0xaec   :  { %8484 = vrsqrt.f32 %v1829_v3  ;;  %v1823_v1 = vpop.xlane.xlu1 %1822  ;;  %v1820_v5 = vpop.xlane.xlu0 %1819  ;;  %v1930_v3 = vld [vmem:[#allocation4 + $0x2e8] sm:$0xff] }
 0xaed   :  { %8486 = vrsqrt.f32 %v1828_v4  ;;  %v1827_v6 = vmul.f32 0.03125, %v1823_v1  ;;  %v1826_v7 = vmul.f32 0.03125, %v1820_v5  ;;  %v1931_v4 = vld [vmem:[#allocation4 + $0x2f0] sm:$0xff]  ;;  %v1932_v1 = vld [vmem:[#allocation4 + $0x2f8] sm:$0xff]  ;;  %v1933_v5 = vld [vmem:[#allocation4 + $0x300] sm:$0xff] }
 0xaef   :  { %v1831_v8 = vadd.f32 1e-05, %v1827_v6  ;;  %v1830_v9 = vadd.f32 1e-05, %v1826_v7  ;;  %v1934_v6 = vld [vmem:[#allocation4 + $0x308] sm:$0xff]  ;;  %v1935_v7 = vld [vmem:[#allocation4 + $0x310] sm:$0xff] }
 0xaf0   :  { %v1885_v27 = vpop.permute.xlu1 %1884 }
 0xaf1   :  { %8488 = vrsqrt.f32 %v1831_v8  ;;  %v1936_v8 = vld [vmem:[#allocation4 + $0x318] sm:$0xff] }
 0xaf2   :  { %8490 = vrsqrt.f32 %v1830_v9  ;;  %v1937_v9 = vld [vmem:[#allocation4 + $0x320] sm:$0xff] }
 0xaf4   :  { %v1890_v26 = vpop.permute.xlu0 %1889 }
 0xaf6   :  { %v8485_v10 = vpop.eup %8484 }
 0xaf7   :  { %v8487_v12 = vpop.eup %8486  ;;  %v1837_v13 = vmul.f32 %v8485_v10, %v1805_v29  ;;  %v1938_v10 = vld [vmem:[#allocation4 + $0x328] sm:$0xff] }
 0xaf8   :  { %v1836_v14 = vmul.f32 %v8487_v12, %v1804_v30  ;;  %v1897_v30 = vld [vmem:[#allocation4 + $0x1e0] sm:$0xff]  ;;  %v1939_v12 = vld [vmem:[#allocation4 + $0x330] sm:$0xff] }
 0xaf9   :  { %v1865_v15 = vmul.f32 %v1852_v54, %v1837_v13  ;;  %v1920_v54 = vld [vmem:[#allocation4 + $0x298] sm:$0xff] }
 0xafa   :  { %v1864_v16 = vmul.f32 %v1847_v55, %v1836_v14  ;;  %v1921_v55 = vld [vmem:[#allocation4 + $0x2a0] sm:$0xff]  ;;  %v1940_v13 = vld [vmem:[#allocation4 + $0x338] sm:$0xff] }
 0xafb   :  { %v8489_v17 = vpop.eup %8488  ;;  %v1893_v18 = vadd.f32 %v1880_v58, %v1865_v15  ;;  %v1923_v58 = vld [vmem:[#allocation4 + $0x2b0] sm:$0xff]  ;;  %v1941_v14 = vld [vmem:[#allocation4 + $0x340] sm:$0xff]  ;;  %v1942_v15 = vld [vmem:[#allocation4 + $0x348] sm:$0xff] }
 0xafc   :  { %v8491_v19 = vpop.eup %8490  ;;  %v1839_v20 = vmul.f32 %v8489_v17, %v1807_v38  ;;  %v1892_v21 = vadd.f32 %v1875_v56, %v1864_v16  ;;  %v1906_v38 = vld [vmem:[#allocation4 + $0x228] sm:$0xff]  ;;  %v1943_v16 = vld [vmem:[#allocation4 + $0x350] sm:$0xff]  ;;  %v1944_v17 = vld [vmem:[#allocation4 + $0x358] sm:$0xff] }
 0xafd   :  { %v1838_v22 = vmul.f32 %v8491_v19, %v1806_v39  ;;  %v1901_v39 = vld [vmem:[#allocation4 + $0x200] sm:$0xff]  ;;  %v1922_v56 = vld [vmem:[#allocation4 + $0x2a8] sm:$0xff] }
 0xafe   :  { %v1867_v23 = vmul.f32 %v1862_v60, %v1839_v20  ;;  %v8238_v24 = vpack.c.bf16 %v1893_v18, %v1892_v21  ;;  %v1925_v60 = vld [vmem:[#allocation4 + $0x2c0] sm:$0xff]  ;;  %v1946_v19 = vld [vmem:[#allocation4 + $0x368] sm:$0xff]  ;;  %v1947_v20 = vld [vmem:[#allocation4 + $0x370] sm:$0xff] }
 0xaff   :  { %v1866_v25 = vmul.f32 %v1857_v59, %v1838_v22  ;;  %v1924_v59 = vld [vmem:[#allocation4 + $0x2b8] sm:$0xff]  ;;  %v1945_v18 = vld [vmem:[#allocation4 + $0x360] sm:$0xff] }
 0xb00   :  { %v1895_v28 = vadd.f32 %v1890_v26, %v1867_v23  ;;  %8239 = vmatprep.subr.bf16.mxu0 %v8238_v24  ;;  %8436 = vmatprep.subr.bf16.mxu1 %v8238_v24  ;;  %v1948_v21 = vld [vmem:[#allocation4 + $0x378] sm:$0xff]  ;;  %v1949_v22 = vld [vmem:[#allocation4 + $0x380] sm:$0xff]  ;;  %v1950_v23 = vld [vmem:[#allocation4 + $0x388] sm:$0xff] }
 0xb01   :  { %v1894_v31 = vadd.f32 %v1885_v27, %v1866_v25  ;;  %8241 = vmatpush3.bf16.msra.mxu0 %v8238_v24  ;;  %8438 = vmatpush3.bf16.msra.mxu1 %v8238_v24  ;;  %v1951_v24 = vld [vmem:[#allocation4 + $0x390] sm:$0xff]  ;;  %v1952_v25 = vld [vmem:[#allocation4 + $0x398] sm:$0xff]  ;;  %v1953_v26 = vld [vmem:[#allocation4 + $0x3a0] sm:$0xff] }
 0xb02   :  { %v1954_v27 = vld [vmem:[#allocation4 + $0x3a8] sm:$0xff] }
 0xb03   :  { %v8242_v29 = vpack.c.bf16 %v1895_v28, %v1894_v31  ;;  %v1955_v28 = vld [vmem:[#allocation4 + $0x3b0] sm:$0xff]  ;;  %v1956_v31 = vld [vmem:[#allocation4 + $0x3b8] sm:$0xff] }
 0xb05   :  { %8243 = vmatprep.subr.bf16.mxu0 %v8242_v29  ;;  %8437 = vmatprep.subr.bf16.mxu1 %v8242_v29 }
 0xb06   :  { %8245 = vmatpush3.bf16.msra.mxu0 %v8242_v29  ;;  %8439 = vmatpush3.bf16.msra.mxu1 %v8242_v29  ;;  %v1957_v29 = vld [vmem:[#allocation4 + $0x3c0] sm:$0xff] }
 0xb09   :  { %7399 = vmatmul.mubr.msk.f32.vlgmr.msra.gmra.mrb[12].mxu0 %vm1787_vm8, %v1897_v30  ;;  %7408 = vmatmul.mubr.msk.f32.vlgmr.msra.gmra.mrb[24].mxu1 %vm1787_vm8, %v1903_v32  ;;  %v1958_v30 = vld [vmem:[#allocation4 + $0x3c8] sm:$0xff]  ;;  %v1959_v32 = vld [vmem:[#allocation4 + $0x3d0] sm:$0xff] }
 0xb0a   :  { %7401 = vmatprep.mubr.msk.f32.mxu0 %vm1787_vm8, %v1898_v33  ;;  %7410 = vmatprep.mubr.msk.f32.mxu1 %vm1787_vm8, %v1904_v34  ;;  %v2725_v33 = vld [vmem:[#allocation4 + $0x7d8] sm:$0xff]  ;;  %v2726_v34 = vld [vmem:[#allocation4 + $0x7e0] sm:$0xff] }
 0xb0d   :  { %7402 = vmatmul.mubr.msk.f32.gmra.mrb[14].mxu0 %vm1787_vm8, %v1899_v35  ;;  %7411 = vmatmul.mubr.msk.f32.gmra.mrb[26].mxu1 %vm1787_vm8, %v1905_v36  ;;  %v8246_v35 = vpack.c.bf16 %v2726_v34, %v2725_v33  ;;  %v2727_v36 = vld [vmem:[#allocation4 + $0x7e8] sm:$0xff] }
 0xb0e   :  { %7404 = vmatprep.mubr.msk.f32.mxu0 %vm1787_vm8, %v1900_v37  ;;  %7413 = vmatprep.mubr.msk.f32.mxu1 %vm1787_vm8, %v1906_v38  ;;  %v2728_v37 = vld [vmem:[#allocation4 + $0x7f0] sm:$0xff] }
 0xb0f   :  { %8247 = vmatprep.subr.bf16.mxu0 %v8246_v35  ;;  %v8250_v38 = vpack.c.bf16 %v2728_v37, %v2727_v36  ;;  %v2554_v37 = vld [vmem:[#allocation4 + $0x460] sm:$0xff] }
 0xb10   :  { %8249 = vmatpush3.bf16.msra.mxu0 %v8246_v35 }
 0xb11   :  { %7405 = vmatmul.mubr.msk.f32.gmra.mrb[16].mxu0 %vm1787_vm8, %v1901_v39  ;;  %7414 = vmatmul.mubr.msk.f32.gmra.mrb[28].mxu1 %vm1787_vm8, %v1907_v40 }
 0xb12   :  { %7416 = vmatprep.mubr.msk.f32.mxu1 %vm1787_vm8, %v1908_v41  ;;  %8251 = vmatprep.subr.bf16.mxu0 %v8250_v38 }
 0xb14   :  { %8253 = vmatpush3.bf16.msra.mxu0 %v8250_v38 }
 0xb15   :  { %7417 = vmatmul.mubr.msk.f32.gmra.mrb[30].mxu1 %vm1787_vm8, %v1909_v42 }
 0xb16   :  { %7419 = vmatprep.mubr.msk.f32.mxu1 %vm1787_vm8, %v1910_v43  ;;  %v2544_v43 = vld [vmem:[#allocation4 + $0x410] sm:$0xff] }
 0xb19   :  { %7420 = vmatmul.mubr.msk.f32.gmra.mrb[32].mxu1 %vm1787_vm8, %v1911_v44  ;;  %v2540_v44 = vld [vmem:[#allocation4 + $0x3f0] sm:$0xff] }
 0xb1a   :  { %7422 = vmatprep.mubr.msk.f32.mxu1 %vm1787_vm8, %v1912_v45  ;;  %v2543_v45 = vld [vmem:[#allocation4 + $0x408] sm:$0xff] }
 0xb1d   :  { %7423 = vmatmul.mubr.msk.f32.gmra.mrb[34].mxu1 %vm1787_vm8, %v1913_v46  ;;  %v2539_v46 = vld [vmem:[#allocation4 + $0x3e8] sm:$0xff] }
 0xb1e   :  { %7425 = vmatprep.mubr.msk.f32.mxu1 %vm1787_vm8, %v1914_v47  ;;  %v2538_v47 = vld [vmem:[#allocation4 + $0x3e0] sm:$0xff] }
 0xb21   :  { %7426 = vmatmul.mubr.msk.f32.gmra.mrb[36].mxu1 %vm1787_vm8, %v1915_v48 }
 0xb22   :  { %7428 = vmatprep.mubr.msk.f32.mxu1 %vm1787_vm8, %v1916_v49 }
 0xb25   :  { %7429 = vmatmul.mubr.msk.f32.gmra.mrb[38].mxu1 %vm1787_vm8, %v1917_v50 }
 0xb26   :  { %7431 = vmatprep.mubr.msk.f32.mxu1 %vm1787_vm8, %v1918_v51  ;;  %v2537_v51 = vld [vmem:[#allocation4 + $0x3d8] sm:$0xff] }
 0xb29   :  { %7432 = vmatmul.mubr.msk.f32.gmra.mrb[40].mxu1 %vm1787_vm8, %v1919_v52 }
 0xb2a   :  { %7434 = vmatprep.mubr.msk.f32.mxu1 %vm1787_vm8, %v1920_v54 }
 0xb2d   :  { %7435 = vmatmul.mubr.msk.f32.gmra.mrb[42].mxu1 %vm1787_vm8, %v1921_v55 }
 0xb2e   :  { %7437 = vmatprep.mubr.msk.f32.mxu1 %vm1787_vm8, %v1922_v56 }
 0xb31   :  { %7438 = vmatmul.mubr.msk.f32.gmra.mrb[44].mxu1 %vm1787_vm8, %v1923_v58 }
 0xb32   :  { %7440 = vmatprep.mubr.msk.f32.mxu1 %vm1787_vm8, %v1924_v59  ;;  %v2542_v59 = vld [vmem:[#allocation4 + $0x400] sm:$0xff] }
 0xb35   :  { %7441 = vmatmul.mubr.msk.f32.gmra.mrb[46].mxu1 %vm1787_vm8, %v1925_v60  ;;  %v2548_v60 = vld [vmem:[#allocation4 + $0x430] sm:$0xff] }
 0xb36   :  { %7443 = vmatprep.mubr.msk.f32.mxu1 %vm1787_vm8, %v1926_v61 }
 0xb39   :  { %7444 = vmatmul.mubr.msk.f32.gmra.mrb[48].mxu1 %vm1787_vm8, %v1927_v62 }
 0xb3a   :  { %7446 = vmatprep.mubr.msk.f32.mxu1 %vm1787_vm8, %v1928_v63  ;;  %v2541_v63 = vld [vmem:[#allocation4 + $0x3f8] sm:$0xff] }
 0xb3d   :  { %7447 = vmatmul.mubr.msk.f32.gmra.mrb[50].mxu1 %vm1787_vm8, %v1929_v2  ;;  %v2547_v2 = vld [vmem:[#allocation4 + $0x428] sm:$0xff] }
 0xb3e   :  { %7449 = vmatprep.mubr.msk.f32.mxu1 %vm1787_vm8, %v1930_v3 }
 0xb41   :  { %7450 = vmatmul.mubr.msk.f32.gmra.mrb[52].mxu1 %vm1787_vm8, %v1931_v4  ;;  %v2546_v4 = vld [vmem:[#allocation4 + $0x420] sm:$0xff] }
 0xb42   :  { %7452 = vmatprep.mubr.msk.f32.mxu1 %vm1787_vm8, %v1932_v1 }
 0xb45   :  { %7453 = vmatmul.mubr.msk.f32.gmra.mrb[54].mxu1 %vm1787_vm8, %v1933_v5 }
 0xb46   :  { %7455 = vmatprep.mubr.msk.f32.mxu1 %vm1787_vm8, %v1934_v6 }
 0xb49   :  { %7456 = vmatmul.mubr.msk.f32.gmra.mrb[56].mxu1 %vm1787_vm8, %v1935_v7  ;;  %v2545_v7 = vld [vmem:[#allocation4 + $0x418] sm:$0xff] }
 0xb4a   :  { %7458 = vmatprep.mubr.msk.f32.mxu1 %vm1787_vm8, %v1936_v8 }
 0xb4d   :  { %7459 = vmatmul.mubr.msk.f32.gmra.mrb[58].mxu1 %vm1787_vm8, %v1937_v9 }
 0xb4e   :  { %7461 = vmatprep.mubr.msk.f32.mxu1 %vm1787_vm8, %v1938_v10 }
 0xb51   :  { %7462 = vmatmul.mubr.msk.f32.gmra.mrb[60].mxu1 %vm1787_vm8, %v1939_v12 }
 0xb52   :  { %7464 = vmatprep.mubr.msk.f32.mxu1 %vm1787_vm8, %v1940_v13 }
 0xb55   :  { %7465 = vmatmul.mubr.msk.f32.gmra.mrb[62].mxu1 %vm1787_vm8, %v1941_v14 }
 0xb56   :  { %7467 = vmatprep.mubr.msk.f32.mxu1 %vm1787_vm8, %v1942_v15  ;;  %v2550_v15 = vld [vmem:[#allocation4 + $0x440] sm:$0xff] }
 0xb59   :  { %7468 = vmatmul.mubr.msk.f32.gmra.mrb[64].mxu1 %vm1787_vm8, %v1943_v16 }
 0xb5a   :  { %7470 = vmatprep.mubr.msk.f32.mxu1 %vm1787_vm8, %v1944_v17 }
 0xb5d   :  { %7471 = vmatmul.mubr.msk.f32.gmra.mrb[66].mxu1 %vm1787_vm8, %v1945_v18 }
 0xb5e   :  { %7473 = vmatprep.mubr.msk.f32.mxu1 %vm1787_vm8, %v1946_v19  ;;  %v2549_v19 = vld [vmem:[#allocation4 + $0x438] sm:$0xff] }
 0xb61   :  { %7474 = vmatmul.mubr.msk.f32.gmra.mrb[68].mxu1 %vm1787_vm8, %v1947_v20 }
 0xb62   :  { %7476 = vmatprep.mubr.msk.f32.mxu1 %vm1787_vm8, %v1948_v21 }
 0xb65   :  { %7477 = vmatmul.mubr.msk.f32.gmra.mrb[70].mxu1 %vm1787_vm8, %v1949_v22 }
 0xb66   :  { %7479 = vmatprep.mubr.msk.f32.mxu1 %vm1787_vm8, %v1950_v23 }
 0xb69   :  { %7480 = vmatmul.mubr.msk.f32.gmra.mrb[72].mxu1 %vm1787_vm8, %v1951_v24 }
 0xb6a   :  { %7482 = vmatprep.mubr.msk.f32.mxu1 %vm1787_vm8, %v1952_v25 }
 0xb6d   :  { %7483 = vmatmul.mubr.msk.f32.gmra.mrb[74].mxu1 %vm1787_vm8, %v1953_v26 }
 0xb6e   :  { %7485 = vmatprep.mubr.msk.f32.mxu1 %vm1787_vm8, %v1954_v27 }
 0xb71   :  { %7486 = vmatmul.mubr.msk.f32.gmra.mrb[76].mxu1 %vm1787_vm8, %v1955_v28 }
 0xb72   :  { %7488 = vmatprep.mubr.msk.f32.mxu1 %vm1787_vm8, %v1956_v31  ;;  %v2552_v31 = vld [vmem:[#allocation4 + $0x450] sm:$0xff] }
 0xb75   :  { %7489 = vmatmul.mubr.msk.f32.gmra.mrb[78].mxu1 %vm1787_vm8, %v1957_v29 }
 0xb76   :  { %7491 = vmatprep.mubr.msk.f32.mxu1 %vm1787_vm8, %v1958_v30  ;;  %v2551_v30 = vld [vmem:[#allocation4 + $0x448] sm:$0xff] }
 0xb79   :  { %7492 = vmatmul.mubr.msk.f32.gmra.mrb[80].mxu1 %vm1787_vm8, %v1959_v32 }
 0xbdc   :  { %v7409_v39 = vpop.f32.mrb[24].mxu1  ;;  %v7400_v40 = vpop.f32.mrb[12].mxu0 }
 0xbdd   :  { %v2248_v41 = vpop.f32.mrb[25].mxu1  ;;  %v2218_v42 = vpop.f32.mrb[13].mxu0  ;;  %v2608_v50 = vmul.f32 %v7409_v39, %v2544_v43  ;;  %v2602_v61 = vmul.f32 %v7400_v40, %v2538_v47  ;;  %v2553_v39 = vld [vmem:[#allocation4 + $0x458] sm:$0xff]  ;;  %v2555_v47 = vld [vmem:[#allocation4 + $0x468] sm:$0xff] }
 0xbde   :  { %v2607_v56 = vmul.f32 %v2543_v45, %v2248_v41  ;;  %v2601_v3 = vmul.f32 %v2537_v51, %v2218_v42  ;;  %v2556_v45 = vld [vmem:[#allocation4 + $0x470] sm:$0xff] }
 0xbe0   :  { %v7403_v48 = vpop.f32.mrb[14].mxu0  ;;  %v7412_v49 = vpop.f32.mrb[26].mxu1 }
 0xbe1   :  { %v2604_v52 = vmul.f32 %v7403_v48, %v2540_v44  ;;  %v2228_v54 = vpop.f32.mrb[15].mxu0  ;;  %v2258_v55 = vpop.f32.mrb[27].mxu1  ;;  %v2610_v16 = vmul.f32 %v7412_v49, %v2546_v4 }
 0xbe2   :  { %v2603_v58 = vmul.f32 %v2539_v46, %v2228_v54  ;;  %v2609_v20 = vmul.f32 %v2545_v7, %v2258_v55  ;;  %v2558_v54 = vld [vmem:[#allocation4 + $0x480] sm:$0xff] }
 0xbe3   :  { %v2668_v62 = vadd.f32 %v2608_v50, %v2604_v52 }
 0xbe4   :  { %v2667_v1 = vadd.f32 %v2607_v56, %v2603_v58  ;;  %v7406_v5 = vpop.f32.mrb[16].mxu0  ;;  %v7415_v6 = vpop.f32.mrb[28].mxu1  ;;  %v2557_v56 = vld [vmem:[#allocation4 + $0x478] sm:$0xff] }
 0xbe5   :  { %v2606_v8 = vmul.f32 %v7406_v5, %v2542_v59  ;;  %v2612_v9 = vmul.f32 %v7415_v6, %v2548_v60  ;;  %v2238_v10 = vpop.f32.mrb[17].mxu0  ;;  %v2268_v12 = vpop.f32.mrb[29].mxu1 }
 0xbe6   :  { %v2605_v13 = vmul.f32 %v2541_v63, %v2238_v10  ;;  %v2611_v14 = vmul.f32 %v2547_v2, %v2268_v12  ;;  %v2560_v63 = vld [vmem:[#allocation4 + $0x490] sm:$0xff]  ;;  %v2561_v10 = vld [vmem:[#allocation4 + $0x498] sm:$0xff] }
 0xbe7   :  { %v2666_v17 = vadd.f32 %v2606_v8, %v2602_v61  ;;  %v2672_v18 = vadd.f32 %v2668_v62, %v2612_v9  ;;  %v2562_v8 = vld [vmem:[#allocation4 + $0x4a0] sm:$0xff] }
 0xbe8   :  { %v2665_v21 = vadd.f32 %v2605_v13, %v2601_v3  ;;  %v2671_v22 = vadd.f32 %v2667_v1, %v2611_v14  ;;  %v7418_v23 = vpop.f32.mrb[30].mxu1  ;;  %v2559_v3 = vld [vmem:[#allocation4 + $0x488] sm:$0xff] }
 0xbe9   :  { %v2614_v24 = vmul.f32 %v7418_v23, %v2550_v15  ;;  %v2670_v25 = vadd.f32 %v2666_v17, %v2610_v16  ;;  %v2278_v26 = vpop.f32.mrb[31].mxu1  ;;  %v2564_v17 = vld [vmem:[#allocation4 + $0x4b0] sm:$0xff] }
 0xbea   :  { %v2613_v27 = vmul.f32 %v2549_v19, %v2278_v26  ;;  %v2669_v28 = vadd.f32 %v2665_v21, %v2609_v20  ;;  %v2563_v19 = vld [vmem:[#allocation4 + $0x4a8] sm:$0xff] }
 0xbeb   :  { %v2674_v29 = vadd.f32 %v2670_v25, %v2614_v24  ;;  %v2566_v25 = vld [vmem:[#allocation4 + $0x4c0] sm:$0xff] }
 0xbec   :  { %v2673_v32 = vadd.f32 %v2669_v28, %v2613_v27  ;;  %v7421_v33 = vpop.f32.mrb[32].mxu1  ;;  %v2565_v27 = vld [vmem:[#allocation4 + $0x4b8] sm:$0xff] }
 0xbed   :  { %v2616_v34 = vmul.f32 %v7421_v33, %v2552_v31  ;;  %v2288_v35 = vpop.f32.mrb[33].mxu1  ;;  %v2568_v33 = vld [vmem:[#allocation4 + $0x4d0] sm:$0xff] }
 0xbee   :  { %v2615_v36 = vmul.f32 %v2551_v30, %v2288_v35  ;;  %v2567_v35 = vld [vmem:[#allocation4 + $0x4c8] sm:$0xff] }
 0xbef   :  { %v2676_v38 = vadd.f32 %v2672_v18, %v2616_v34 }
 0xbf0   :  { %v2675_v40 = vadd.f32 %v2671_v22, %v2615_v36  ;;  %v7424_v41 = vpop.f32.mrb[34].mxu1 }
 0xbf1   :  { %v2618_v42 = vmul.f32 %v7424_v41, %v2554_v37  ;;  %v2298_v43 = vpop.f32.mrb[35].mxu1  ;;  %v2570_v41 = vld [vmem:[#allocation4 + $0x4e0] sm:$0xff] }
 0xbf2   :  { %v2617_v44 = vmul.f32 %v2553_v39, %v2298_v43  ;;  %v2569_v43 = vld [vmem:[#allocation4 + $0x4d8] sm:$0xff] }
 0xbf3   :  { %v2678_v46 = vadd.f32 %v2674_v29, %v2618_v42 }
 0xbf4   :  { %v2677_v48 = vadd.f32 %v2673_v32, %v2617_v44  ;;  %v7427_v49 = vpop.f32.mrb[36].mxu1 }
 0xbf5   :  { %v2620_v50 = vmul.f32 %v7427_v49, %v2556_v45  ;;  %v2308_v51 = vpop.f32.mrb[37].mxu1  ;;  %v2572_v49 = vld [vmem:[#allocation4 + $0x4f0] sm:$0xff] }
 0xbf6   :  { %v2619_v52 = vmul.f32 %v2555_v47, %v2308_v51  ;;  %v2571_v51 = vld [vmem:[#allocation4 + $0x4e8] sm:$0xff] }
 0xbf7   :  { %v2680_v55 = vadd.f32 %v2676_v38, %v2620_v50 }
 0xbf8   :  { %v2679_v58 = vadd.f32 %v2675_v40, %v2619_v52  ;;  %v7430_v59 = vpop.f32.mrb[38].mxu1 }
 0xbf9   :  { %v2622_v60 = vmul.f32 %v7430_v59, %v2558_v54  ;;  %v2318_v61 = vpop.f32.mrb[39].mxu1  ;;  %v2574_v59 = vld [vmem:[#allocation4 + $0x500] sm:$0xff] }
 0xbfa   :  { %v2621_v62 = vmul.f32 %v2557_v56, %v2318_v61  ;;  %v2573_v61 = vld [vmem:[#allocation4 + $0x4f8] sm:$0xff] }
 0xbfb   :  { %v2682_v2 = vadd.f32 %v2678_v46, %v2622_v60 }
 0xbfc   :  { %v2681_v4 = vadd.f32 %v2677_v48, %v2621_v62  ;;  %v7433_v1 = vpop.f32.mrb[40].mxu1 }
 0xbfd   :  { %v2624_v5 = vmul.f32 %v7433_v1, %v2560_v63  ;;  %v2328_v6 = vpop.f32.mrb[41].mxu1  ;;  %v2576_v1 = vld [vmem:[#allocation4 + $0x510] sm:$0xff] }
 0xbfe   :  { %v2623_v7 = vmul.f32 %v2559_v3, %v2328_v6  ;;  %v2575_v6 = vld [vmem:[#allocation4 + $0x508] sm:$0xff] }
 0xbff   :  { %v2684_v9 = vadd.f32 %v2680_v55, %v2624_v5 }
 0xc00   :  { %v2683_v12 = vadd.f32 %v2679_v58, %v2623_v7  ;;  %v7436_v13 = vpop.f32.mrb[42].mxu1 }
 0xc01   :  { %v2626_v14 = vmul.f32 %v7436_v13, %v2562_v8  ;;  %v2338_v15 = vpop.f32.mrb[43].mxu1  ;;  %v2578_v13 = vld [vmem:[#allocation4 + $0x520] sm:$0xff] }
 0xc02   :  { %v2625_v16 = vmul.f32 %v2561_v10, %v2338_v15  ;;  %v2577_v15 = vld [vmem:[#allocation4 + $0x518] sm:$0xff] }
 0xc03   :  { %v2686_v18 = vadd.f32 %v2682_v2, %v2626_v14 }
 0xc04   :  { %v2685_v20 = vadd.f32 %v2681_v4, %v2625_v16  ;;  %v7439_v21 = vpop.f32.mrb[44].mxu1 }
 0xc05   :  { %v2628_v22 = vmul.f32 %v7439_v21, %v2564_v17  ;;  %v2348_v23 = vpop.f32.mrb[45].mxu1  ;;  %v2580_v21 = vld [vmem:[#allocation4 + $0x530] sm:$0xff] }
 0xc06   :  { %v2627_v24 = vmul.f32 %v2563_v19, %v2348_v23  ;;  %v2579_v23 = vld [vmem:[#allocation4 + $0x528] sm:$0xff] }
 0xc07   :  { %v2688_v26 = vadd.f32 %v2684_v9, %v2628_v22 }
 0xc08   :  { %v2687_v28 = vadd.f32 %v2683_v12, %v2627_v24  ;;  %v7442_v31 = vpop.f32.mrb[46].mxu1 }
 0xc09   :  { %v2630_v29 = vmul.f32 %v7442_v31, %v2566_v25  ;;  %v2358_v30 = vpop.f32.mrb[47].mxu1  ;;  %v2582_v31 = vld [vmem:[#allocation4 + $0x540] sm:$0xff] }
 0xc0a   :  { %v2629_v32 = vmul.f32 %v2565_v27, %v2358_v30  ;;  %v2581_v30 = vld [vmem:[#allocation4 + $0x538] sm:$0xff] }
 0xc0b   :  { %v2690_v34 = vadd.f32 %v2686_v18, %v2630_v29 }
 0xc0c   :  { %v2689_v36 = vadd.f32 %v2685_v20, %v2629_v32  ;;  %v7445_v37 = vpop.f32.mrb[48].mxu1 }
 0xc0d   :  { %v2632_v38 = vmul.f32 %v7445_v37, %v2568_v33  ;;  %v2368_v39 = vpop.f32.mrb[49].mxu1  ;;  %v2584_v37 = vld [vmem:[#allocation4 + $0x550] sm:$0xff] }
 0xc0e   :  { %v2631_v40 = vmul.f32 %v2567_v35, %v2368_v39  ;;  %v2583_v39 = vld [vmem:[#allocation4 + $0x548] sm:$0xff] }
 0xc0f   :  { %v2692_v42 = vadd.f32 %v2688_v26, %v2632_v38 }
 0xc10   :  { %v2691_v44 = vadd.f32 %v2687_v28, %v2631_v40  ;;  %v7448_v45 = vpop.f32.mrb[50].mxu1 }
 0xc11   :  { %v2634_v46 = vmul.f32 %v7448_v45, %v2570_v41  ;;  %v2378_v47 = vpop.f32.mrb[51].mxu1  ;;  %v2586_v45 = vld [vmem:[#allocation4 + $0x560] sm:$0xff] }
 0xc12   :  { %v2633_v48 = vmul.f32 %v2569_v43, %v2378_v47  ;;  %v2585_v47 = vld [vmem:[#allocation4 + $0x558] sm:$0xff] }
 0xc13   :  { %v2694_v50 = vadd.f32 %v2690_v34, %v2634_v46 }
 0xc14   :  { %v2693_v52 = vadd.f32 %v2689_v36, %v2633_v48  ;;  %v7451_v54 = vpop.f32.mrb[52].mxu1 }
 0xc15   :  { %v2636_v55 = vmul.f32 %v7451_v54, %v2572_v49  ;;  %v2388_v56 = vpop.f32.mrb[53].mxu1  ;;  %v2588_v54 = vld [vmem:[#allocation4 + $0x570] sm:$0xff] }
 0xc16   :  { %v2635_v58 = vmul.f32 %v2571_v51, %v2388_v56  ;;  %v2587_v56 = vld [vmem:[#allocation4 + $0x568] sm:$0xff] }
 0xc17   :  { %v2696_v60 = vadd.f32 %v2692_v42, %v2636_v55 }
 0xc18   :  { %v2695_v62 = vadd.f32 %v2691_v44, %v2635_v58  ;;  %v7454_v63 = vpop.f32.mrb[54].mxu1 }
 0xc19   :  { %v2638_v2 = vmul.f32 %v7454_v63, %v2574_v59  ;;  %v2398_v3 = vpop.f32.mrb[55].mxu1  ;;  %v2590_v63 = vld [vmem:[#allocation4 + $0x580] sm:$0xff] }
 0xc1a   :  { %v2637_v4 = vmul.f32 %v2573_v61, %v2398_v3  ;;  %v2589_v3 = vld [vmem:[#allocation4 + $0x578] sm:$0xff] }
 0xc1b   :  { %v2698_v5 = vadd.f32 %v2694_v50, %v2638_v2 }
 0xc1c   :  { %v2697_v7 = vadd.f32 %v2693_v52, %v2637_v4  ;;  %v7457_v8 = vpop.f32.mrb[56].mxu1 }
 0xc1d   :  { %v2640_v9 = vmul.f32 %v7457_v8, %v2576_v1  ;;  %v2408_v10 = vpop.f32.mrb[57].mxu1  ;;  %v2592_v8 = vld [vmem:[#allocation4 + $0x590] sm:$0xff] }
 0xc1e   :  { %v2639_v12 = vmul.f32 %v2575_v6, %v2408_v10  ;;  %v2591_v10 = vld [vmem:[#allocation4 + $0x588] sm:$0xff] }
 0xc1f   :  { %v2700_v14 = vadd.f32 %v2696_v60, %v2640_v9 }
 0xc20   :  { %v2699_v16 = vadd.f32 %v2695_v62, %v2639_v12  ;;  %v7460_v17 = vpop.f32.mrb[58].mxu1 }
 0xc21   :  { %v2642_v18 = vmul.f32 %v7460_v17, %v2578_v13  ;;  %v2418_v19 = vpop.f32.mrb[59].mxu1  ;;  %v2594_v17 = vld [vmem:[#allocation4 + $0x5a0] sm:$0xff] }
 0xc22   :  { %v2641_v20 = vmul.f32 %v2577_v15, %v2418_v19  ;;  %v2593_v19 = vld [vmem:[#allocation4 + $0x598] sm:$0xff] }
 0xc23   :  { %v2702_v22 = vadd.f32 %v2698_v5, %v2642_v18 }
 0xc24   :  { %v2701_v24 = vadd.f32 %v2697_v7, %v2641_v20  ;;  %v7463_v25 = vpop.f32.mrb[60].mxu1 }
 0xc25   :  { %v2644_v26 = vmul.f32 %v7463_v25, %v2580_v21  ;;  %v2428_v27 = vpop.f32.mrb[61].mxu1  ;;  %v2596_v25 = vld [vmem:[#allocation4 + $0x5b0] sm:$0xff] }
 0xc26   :  { %v2643_v28 = vmul.f32 %v2579_v23, %v2428_v27  ;;  %v2595_v27 = vld [vmem:[#allocation4 + $0x5a8] sm:$0xff] }
 0xc27   :  { %v2704_v29 = vadd.f32 %v2700_v14, %v2644_v26 }
 0xc28   :  { %v2703_v32 = vadd.f32 %v2699_v16, %v2643_v28  ;;  %v7466_v33 = vpop.f32.mrb[62].mxu1 }
 0xc29   :  { %v2646_v34 = vmul.f32 %v7466_v33, %v2582_v31  ;;  %v2438_v35 = vpop.f32.mrb[63].mxu1  ;;  %v2598_v33 = vld [vmem:[#allocation4 + $0x5c0] sm:$0xff] }
 0xc2a   :  { %v2645_v36 = vmul.f32 %v2581_v30, %v2438_v35  ;;  %v2597_v35 = vld [vmem:[#allocation4 + $0x5b8] sm:$0xff] }
 0xc2b   :  { %v2706_v38 = vadd.f32 %v2702_v22, %v2646_v34 }
 0xc2c   :  { %v2705_v40 = vadd.f32 %v2701_v24, %v2645_v36  ;;  %v7469_v41 = vpop.f32.mrb[64].mxu1 }
 0xc2d   :  { %v2648_v42 = vmul.f32 %v7469_v41, %v2584_v37  ;;  %v2448_v43 = vpop.f32.mrb[65].mxu1  ;;  %v2600_v41 = vld [vmem:[#allocation4 + $0x5d0] sm:$0xff] }
 0xc2e   :  { %v2647_v44 = vmul.f32 %v2583_v39, %v2448_v43  ;;  %v2599_v43 = vld [vmem:[#allocation4 + $0x5c8] sm:$0xff] }
 0xc2f   :  { %v2708_v46 = vadd.f32 %v2704_v29, %v2648_v42 }
 0xc30   :  { %v2707_v48 = vadd.f32 %v2703_v32, %v2647_v44  ;;  %v7472_v49 = vpop.f32.mrb[66].mxu1 }
 0xc31   :  { %v2650_v50 = vmul.f32 %v7472_v49, %v2586_v45  ;;  %v2458_v51 = vpop.f32.mrb[67].mxu1 }
 0xc32   :  { %v2649_v52 = vmul.f32 %v2585_v47, %v2458_v51  ;;  %v2850_v51 = vld [vmem:[#allocation4 + $0x820] sm:$0xff] }
 0xc33   :  { %v2710_v55 = vadd.f32 %v2706_v38, %v2650_v50 }
 0xc34   :  { %v2709_v58 = vadd.f32 %v2705_v40, %v2649_v52  ;;  %v7475_v59 = vpop.f32.mrb[68].mxu1  ;;  %v2741_v52 = vpop.permute.xlu0 %2740 }
 0xc35   :  { %v2652_v60 = vmul.f32 %v7475_v59, %v2588_v54  ;;  %v2468_v61 = vpop.f32.mrb[69].mxu1  ;;  %v2736_v54 = vpop.permute.xlu1 %2735 }
 0xc36   :  { %v2651_v62 = vmul.f32 %v2587_v56, %v2468_v61 }
 0xc37   :  { %v2712_v2 = vadd.f32 %v2708_v46, %v2652_v60 }
 0xc38   :  { %v2711_v4 = vadd.f32 %v2707_v48, %v2651_v62  ;;  %v7478_v1 = vpop.f32.mrb[70].mxu1  ;;  %v2751_v60 = vpop.permute.xlu0 %2750 }
 0xc39   :  { %v2654_v5 = vmul.f32 %v7478_v1, %v2590_v63  ;;  %v2478_v6 = vpop.f32.mrb[71].mxu1  ;;  %v2746_v63 = vpop.permute.xlu1 %2745 }
 0xc3a   :  { %v2653_v7 = vmul.f32 %v2589_v3, %v2478_v6  ;;  %v2852_v6 = vld [vmem:[#allocation4 + $0x830] sm:$0xff] }
 0xc3b   :  { %v2714_v9 = vadd.f32 %v2710_v55, %v2654_v5  ;;  %v2851_v5 = vld [vmem:[#allocation4 + $0x828] sm:$0xff] }
 0xc3c   :  { %v2713_v12 = vadd.f32 %v2709_v58, %v2653_v7  ;;  %v7481_v13 = vpop.f32.mrb[72].mxu1  ;;  %v2853_v7 = vld [vmem:[#allocation4 + $0x838] sm:$0xff] }
 0xc3d   :  { %v2656_v14 = vmul.f32 %v7481_v13, %v2592_v8  ;;  %v2488_v15 = vpop.f32.mrb[73].mxu1  ;;  %v2854_v8 = vld [vmem:[#allocation4 + $0x840] sm:$0xff] }
 0xc3e   :  { %v2655_v16 = vmul.f32 %v2591_v10, %v2488_v15  ;;  %v2856_v10 = vld [vmem:[#allocation4 + $0x850] sm:$0xff]  ;;  %v2858_v13 = vld [vmem:[#allocation4 + $0x860] sm:$0xff] }
 0xc3f   :  { %v2716_v18 = vadd.f32 %v2712_v2, %v2656_v14  ;;  %v2859_v14 = vld [vmem:[#allocation4 + $0x868] sm:$0xff]  ;;  %v2860_v15 = vld [vmem:[#allocation4 + $0x870] sm:$0xff] }
 0xc40   :  { %v2715_v20 = vadd.f32 %v2711_v4, %v2655_v16  ;;  %v7484_v21 = vpop.f32.mrb[74].mxu1  ;;  %v2861_v16 = vld [vmem:[#allocation4 + $0x878] sm:$0xff] }
 0xc41   :  { %v2658_v22 = vmul.f32 %v7484_v21, %v2594_v17  ;;  %v2498_v23 = vpop.f32.mrb[75].mxu1  ;;  %v2862_v17 = vld [vmem:[#allocation4 + $0x880] sm:$0xff] }
 0xc42   :  { %v2657_v24 = vmul.f32 %v2593_v19, %v2498_v23  ;;  %v2864_v19 = vld [vmem:[#allocation4 + $0x890] sm:$0xff]  ;;  %v2866_v21 = vld [vmem:[#allocation4 + $0x8a0] sm:$0xff] }
 0xc43   :  { %v2718_v26 = vadd.f32 %v2714_v9, %v2658_v22  ;;  %v2855_v9 = vld [vmem:[#allocation4 + $0x848] sm:$0xff]  ;;  %v2868_v23 = vld [vmem:[#allocation4 + $0x8b0] sm:$0xff] }
 0xc44   :  { %v2717_v28 = vadd.f32 %v2713_v12, %v2657_v24  ;;  %v7487_v31 = vpop.f32.mrb[76].mxu1  ;;  %v2857_v12 = vld [vmem:[#allocation4 + $0x858] sm:$0xff]  ;;  %v2867_v22 = vld [vmem:[#allocation4 + $0x8a8] sm:$0xff] }
 0xc45   :  { %v2660_v29 = vmul.f32 %v7487_v31, %v2596_v25  ;;  %v2508_v30 = vpop.f32.mrb[77].mxu1  ;;  %v2869_v24 = vld [vmem:[#allocation4 + $0x8b8] sm:$0xff]  ;;  %v2870_v25 = vld [vmem:[#allocation4 + $0x8c0] sm:$0xff] }
 0xc46   :  { %v2659_v32 = vmul.f32 %v2595_v27, %v2508_v30  ;;  %v2872_v27 = vld [vmem:[#allocation4 + $0x8d0] sm:$0xff]  ;;  %v2874_v31 = vld [vmem:[#allocation4 + $0x8e0] sm:$0xff] }
 0xc47   :  { %v2720_v34 = vadd.f32 %v2716_v18, %v2660_v29  ;;  %v2863_v18 = vld [vmem:[#allocation4 + $0x888] sm:$0xff]  ;;  %v2876_v30 = vld [vmem:[#allocation4 + $0x8f0] sm:$0xff] }
 0xc48   :  { %v2719_v36 = vadd.f32 %v2715_v20, %v2659_v32  ;;  %v7490_v37 = vpop.f32.mrb[78].mxu1  ;;  %v2865_v20 = vld [vmem:[#allocation4 + $0x898] sm:$0xff]  ;;  %v2875_v29 = vld [vmem:[#allocation4 + $0x8e8] sm:$0xff] }
 0xc49   :  { %v2662_v38 = vmul.f32 %v7490_v37, %v2598_v33  ;;  %v2518_v39 = vpop.f32.mrb[79].mxu1  ;;  %v2877_v32 = vld [vmem:[#allocation4 + $0x8f8] sm:$0xff]  ;;  %v2878_v33 = vld [vmem:[#allocation4 + $0x900] sm:$0xff] }
 0xc4a   :  { %v2661_v40 = vmul.f32 %v2597_v35, %v2518_v39  ;;  %v2880_v35 = vld [vmem:[#allocation4 + $0x910] sm:$0xff]  ;;  %v2882_v37 = vld [vmem:[#allocation4 + $0x920] sm:$0xff] }
 0xc4b   :  { %v2722_v42 = vadd.f32 %v2718_v26, %v2662_v38  ;;  %v2871_v26 = vld [vmem:[#allocation4 + $0x8c8] sm:$0xff]  ;;  %v2884_v39 = vld [vmem:[#allocation4 + $0x930] sm:$0xff] }
 0xc4c   :  { %v2721_v44 = vadd.f32 %v2717_v28, %v2661_v40  ;;  %v7493_v45 = vpop.f32.mrb[80].mxu1  ;;  %v2873_v28 = vld [vmem:[#allocation4 + $0x8d8] sm:$0xff]  ;;  %v2883_v38 = vld [vmem:[#allocation4 + $0x928] sm:$0xff] }
 0xc4d   :  { %v2664_v46 = vmul.f32 %v7493_v45, %v2600_v41  ;;  %v2528_v47 = vpop.f32.mrb[81].mxu1  ;;  %v2885_v40 = vld [vmem:[#allocation4 + $0x938] sm:$0xff]  ;;  %v2886_v41 = vld [vmem:[#allocation4 + $0x940] sm:$0xff] }
 0xc4e   :  { %v2663_v48 = vmul.f32 %v2599_v43, %v2528_v47  ;;  %7502 = vmatprep.mubr.msk.f32.mxu0 %vm1787_vm8, %v2721_v44  ;;  %v2888_v43 = vld [vmem:[#allocation4 + $0x950] sm:$0xff]  ;;  %v2889_v44 = vld [vmem:[#allocation4 + $0x958] sm:$0xff]  ;;  %v2890_v45 = vld [vmem:[#allocation4 + $0x960] sm:$0xff] }
 0xc4f   :  { %v2724_v49 = vadd.f32 %v2720_v34, %v2664_v46  ;;  %7503 = vmatmul.mubr.msk.f32.vlgmr.msra.gmra.mrb[18].mxu0 %vm1787_vm8, %v2722_v42  ;;  %v2879_v34 = vld [vmem:[#allocation4 + $0x908] sm:$0xff]  ;;  %v2892_v47 = vld [vmem:[#allocation4 + $0x970] sm:$0xff] }
 0xc50   :  { %v2723_v50 = vadd.f32 %v2719_v36, %v2663_v48  ;;  %v2881_v36 = vld [vmem:[#allocation4 + $0x918] sm:$0xff]  ;;  %v2887_v42 = vld [vmem:[#allocation4 + $0x948] sm:$0xff] }
 0xc51   :  { %v2891_v46 = vld [vmem:[#allocation4 + $0x968] sm:$0xff]  ;;  %v2893_v48 = vld [vmem:[#allocation4 + $0x978] sm:$0xff] }
 0xc52   :  { %7505 = vmatprep.mubr.msk.f32.mxu0 %vm1787_vm8, %v2723_v50  ;;  %v3491_v50 = vld [vmem:[#allocation4 + $0x7f8] sm:$0x3] }
 0xc53   :  { %7506 = vmatmul.mubr.msk.f32.gmra.mrb[20].mxu0 %vm1787_vm8, %v2724_v49  ;;  %v2894_v49 = vld [vmem:[#allocation4 + $0x980] sm:$0xff]  ;;  %7612 = vmatprep.subr.msk.mxu1 %vm3685_vm12, %v3491_v50 }
 0xc54   :  { %7516 = vmatprep.mubr.msk.f32.mxu0 %vm1787_vm8, %v2850_v51  ;;  %7613 = vmatpush3.msk.msra.mxu1 %vm3685_vm12, %v3491_v50  ;;  %v2895_v51 = vld [vmem:[#allocation4 + $0x988] sm:$0xff] }
 0xc55   :  { %7885 = vmatprep.subr.mxu1 %v8550_v0 }
 0xd22   :  { %v7504_v55 = vpop.f32.mrb[18].mxu0 }
 0xd23   :  { %v2837_v56 = vadd.f32 %v7504_v55, %v2741_v52  ;;  %v2831_v58 = vpop.f32.mrb[19].mxu0  ;;  %v2896_v52 = vld [vmem:[#allocation4 + $0x990] sm:$0xff]  ;;  %v2898_v55 = vld [vmem:[#allocation4 + $0x9a0] sm:$0xff] }
 0xd24   :  { %v2832_v59 = vadd.f32 %v2831_v58, %v2736_v54  ;;  %v2897_v54 = vld [vmem:[#allocation4 + $0x998] sm:$0xff]  ;;  %v2900_v58 = vld [vmem:[#allocation4 + $0x9b0] sm:$0xff] }
 0xd26   :  { %v8254_v61 = vpack.c.bf16 %v2837_v56, %v2832_v59  ;;  %v7507_v62 = vpop.f32.mrb[20].mxu0  ;;  %v2899_v56 = vld [vmem:[#allocation4 + $0x9a8] sm:$0xff]  ;;  %v2901_v59 = vld [vmem:[#allocation4 + $0x9b8] sm:$0xff] }
 0xd27   :  { %v2847_v2 = vadd.f32 %v7507_v62, %v2751_v60  ;;  %v2841_v3 = vpop.f32.mrb[21].mxu0  ;;  %v2902_v60 = vld [vmem:[#allocation4 + $0x9c0] sm:$0xff]  ;;  %v2904_v62 = vld [vmem:[#allocation4 + $0x9d0] sm:$0xff] }
 0xd28   :  { %v2842_v4 = vadd.f32 %v2841_v3, %v2746_v63  ;;  %8255 = vmatprep.subr.bf16.mxu0 %v8254_v61  ;;  %v2905_v63 = vld [vmem:[#allocation4 + $0x9d8] sm:$0xff]  ;;  %v2907_v3 = vld [vmem:[#allocation4 + $0x9e8] sm:$0xff] }
 0xd29   :  { %8257 = vmatpush3.bf16.msra.mxu0 %v8254_v61  ;;  %v2903_v61 = vld [vmem:[#allocation4 + $0x9c8] sm:$0xff] }
 0xd2a   :  { %v8258_v1 = vpack.c.bf16 %v2847_v2, %v2842_v4  ;;  %v2906_v2 = vld [vmem:[#allocation4 + $0x9e0] sm:$0xff]  ;;  %v2908_v4 = vld [vmem:[#allocation4 + $0x9f0] sm:$0xff] }
 0xd2c   :  { %8259 = vmatprep.subr.bf16.mxu0 %v8258_v1 }
 0xd2d   :  { %8261 = vmatpush3.bf16.msra.mxu0 %v8258_v1  ;;  %v2909_v1 = vld [vmem:[#allocation4 + $0x9f8] sm:$0xff] }
 0xd30   :  { %7517 = vmatmul.mubr.msk.f32.vlgmr.msra.gmra.mrb[22].mxu0 %vm1787_vm8, %v2851_v5  ;;  %v2910_v5 = vld [vmem:[#allocation4 + $0xa00] sm:$0xff] }
 0xd31   :  { %7519 = vmatprep.mubr.msk.f32.mxu0 %vm1787_vm8, %v2852_v6  ;;  %v2911_v6 = vld [vmem:[#allocation4 + $0xa08] sm:$0xff] }
 0xd34   :  { %7520 = vmatmul.mubr.msk.f32.gmra.mrb[24].mxu0 %vm1787_vm8, %v2853_v7  ;;  %v2912_v7 = vld [vmem:[#allocation4 + $0xa10] sm:$0xff] }
 0xd35   :  { %7522 = vmatprep.mubr.msk.f32.mxu0 %vm1787_vm8, %v2854_v8  ;;  %v2913_v8 = vld [vmem:[#allocation4 + $0xa18] sm:$0xff] }
 0xd38   :  { %7523 = vmatmul.mubr.msk.f32.gmra.mrb[26].mxu0 %vm1787_vm8, %v2855_v9 }
 0xd39   :  { %7525 = vmatprep.mubr.msk.f32.mxu0 %vm1787_vm8, %v2856_v10 }
 0xd3c   :  { %7526 = vmatmul.mubr.msk.f32.gmra.mrb[28].mxu0 %vm1787_vm8, %v2857_v12 }
 0xd3d   :  { %7528 = vmatprep.mubr.msk.f32.mxu0 %vm1787_vm8, %v2858_v13 }
 0xd40   :  { %7529 = vmatmul.mubr.msk.f32.gmra.mrb[30].mxu0 %vm1787_vm8, %v2859_v14 }
 0xd41   :  { %7531 = vmatprep.mubr.msk.f32.mxu0 %vm1787_vm8, %v2860_v15 }
 0xd44   :  { %7532 = vmatmul.mubr.msk.f32.gmra.mrb[32].mxu0 %vm1787_vm8, %v2861_v16 }
 0xd45   :  { %7534 = vmatprep.mubr.msk.f32.mxu0 %vm1787_vm8, %v2862_v17 }
 0xd48   :  { %7535 = vmatmul.mubr.msk.f32.gmra.mrb[34].mxu0 %vm1787_vm8, %v2863_v18 }
 0xd49   :  { %7537 = vmatprep.mubr.msk.f32.mxu0 %vm1787_vm8, %v2864_v19 }
 0xd4c   :  { %7538 = vmatmul.mubr.msk.f32.gmra.mrb[36].mxu0 %vm1787_vm8, %v2865_v20 }
 0xd4d   :  { %7540 = vmatprep.mubr.msk.f32.mxu0 %vm1787_vm8, %v2866_v21 }
 0xd50   :  { %7541 = vmatmul.mubr.msk.f32.gmra.mrb[38].mxu0 %vm1787_vm8, %v2867_v22 }
 0xd51   :  { %7543 = vmatprep.mubr.msk.f32.mxu0 %vm1787_vm8, %v2868_v23 }
 0xd54   :  { %7544 = vmatmul.mubr.msk.f32.gmra.mrb[40].mxu0 %vm1787_vm8, %v2869_v24 }
 0xd55   :  { %7546 = vmatprep.mubr.msk.f32.mxu0 %vm1787_vm8, %v2870_v25 }
 0xd58   :  { %7547 = vmatmul.mubr.msk.f32.gmra.mrb[42].mxu0 %vm1787_vm8, %v2871_v26 }
 0xd59   :  { %7549 = vmatprep.mubr.msk.f32.mxu0 %vm1787_vm8, %v2872_v27 }
 0xd5c   :  { %7550 = vmatmul.mubr.msk.f32.gmra.mrb[44].mxu0 %vm1787_vm8, %v2873_v28 }
 0xd5d   :  { %7552 = vmatprep.mubr.msk.f32.mxu0 %vm1787_vm8, %v2874_v31 }
 0xd60   :  { %7553 = vmatmul.mubr.msk.f32.gmra.mrb[46].mxu0 %vm1787_vm8, %v2875_v29 }
 0xd61   :  { %7555 = vmatprep.mubr.msk.f32.mxu0 %vm1787_vm8, %v2876_v30 }
 0xd64   :  { %7556 = vmatmul.mubr.msk.f32.gmra.mrb[48].mxu0 %vm1787_vm8, %v2877_v32 }
 0xd65   :  { %7558 = vmatprep.mubr.msk.f32.mxu0 %vm1787_vm8, %v2878_v33 }
 0xd68   :  { %7559 = vmatmul.mubr.msk.f32.gmra.mrb[50].mxu0 %vm1787_vm8, %v2879_v34 }
 0xd69   :  { %7561 = vmatprep.mubr.msk.f32.mxu0 %vm1787_vm8, %v2880_v35 }
 0xd6c   :  { %7562 = vmatmul.mubr.msk.f32.gmra.mrb[52].mxu0 %vm1787_vm8, %v2881_v36 }
 0xd6d   :  { %7564 = vmatprep.mubr.msk.f32.mxu0 %vm1787_vm8, %v2882_v37 }
 0xd70   :  { %7565 = vmatmul.mubr.msk.f32.gmra.mrb[54].mxu0 %vm1787_vm8, %v2883_v38 }
 0xd71   :  { %7567 = vmatprep.mubr.msk.f32.mxu0 %vm1787_vm8, %v2884_v39 }
 0xd74   :  { %7568 = vmatmul.mubr.msk.f32.gmra.mrb[56].mxu0 %vm1787_vm8, %v2885_v40 }
 0xd75   :  { %7570 = vmatprep.mubr.msk.f32.mxu0 %vm1787_vm8, %v2886_v41 }
 0xd78   :  { %7571 = vmatmul.mubr.msk.f32.gmra.mrb[58].mxu0 %vm1787_vm8, %v2887_v42 }
 0xd79   :  { %7573 = vmatprep.mubr.msk.f32.mxu0 %vm1787_vm8, %v2888_v43 }
 0xd7c   :  { %7574 = vmatmul.mubr.msk.f32.gmra.mrb[60].mxu0 %vm1787_vm8, %v2889_v44 }
 0xd7d   :  { %7576 = vmatprep.mubr.msk.f32.mxu0 %vm1787_vm8, %v2890_v45 }
 0xd80   :  { %7577 = vmatmul.mubr.msk.f32.gmra.mrb[62].mxu0 %vm1787_vm8, %v2891_v46 }
 0xd81   :  { %7579 = vmatprep.mubr.msk.f32.mxu0 %vm1787_vm8, %v2892_v47 }
 0xd84   :  { %7580 = vmatmul.mubr.msk.f32.gmra.mrb[64].mxu0 %vm1787_vm8, %v2893_v48 }
 0xd85   :  { %7582 = vmatprep.mubr.msk.f32.mxu0 %vm1787_vm8, %v2894_v49 }
 0xd88   :  { %7583 = vmatmul.mubr.msk.f32.gmra.mrb[66].mxu0 %vm1787_vm8, %v2895_v51 }
 0xd89   :  { %7585 = vmatprep.mubr.msk.f32.mxu0 %vm1787_vm8, %v2896_v52 }
 0xd8c   :  { %7586 = vmatmul.mubr.msk.f32.gmra.mrb[68].mxu0 %vm1787_vm8, %v2897_v54 }
 0xd8d   :  { %7588 = vmatprep.mubr.msk.f32.mxu0 %vm1787_vm8, %v2898_v55 }
 0xd90   :  { %7589 = vmatmul.mubr.msk.f32.gmra.mrb[70].mxu0 %vm1787_vm8, %v2899_v56 }
 0xd91   :  { %7591 = vmatprep.mubr.msk.f32.mxu0 %vm1787_vm8, %v2900_v58 }
 0xd94   :  { %7592 = vmatmul.mubr.msk.f32.gmra.mrb[72].mxu0 %vm1787_vm8, %v2901_v59 }
 0xd95   :  { %7594 = vmatprep.mubr.msk.f32.mxu0 %vm1787_vm8, %v2902_v60 }
 0xd98   :  { %7595 = vmatmul.mubr.msk.f32.gmra.mrb[74].mxu0 %vm1787_vm8, %v2903_v61 }
 0xd99   :  { %7597 = vmatprep.mubr.msk.f32.mxu0 %vm1787_vm8, %v2904_v62 }
 0xd9c   :  { %7598 = vmatmul.mubr.msk.f32.gmra.mrb[76].mxu0 %vm1787_vm8, %v2905_v63 }
 0xd9d   :  { %7600 = vmatprep.mubr.msk.f32.mxu0 %vm1787_vm8, %v2906_v2 }
 0xda0   :  { %7601 = vmatmul.mubr.msk.f32.gmra.mrb[78].mxu0 %vm1787_vm8, %v2907_v3 }
 0xda1   :  { %7603 = vmatprep.mubr.msk.f32.mxu0 %vm1787_vm8, %v2908_v4 }
 0xda4   :  { %7604 = vmatmul.mubr.msk.f32.gmra.mrb[80].mxu0 %vm1787_vm8, %v2909_v1 }
 0xda5   :  { %7606 = vmatprep.mubr.msk.f32.mxu0 %vm1787_vm8, %v2910_v5 }
 0xda8   :  { %7607 = vmatmul.mubr.msk.f32.gmra.mrb[82].mxu0 %vm1787_vm8, %v2911_v6 }
 0xda9   :  { %7609 = vmatprep.mubr.msk.f32.mxu0 %vm1787_vm8, %v2912_v7 }
 0xdac   :  { %7610 = vmatmul.mubr.msk.f32.gmra.mrb[84].mxu0 %vm1787_vm8, %v2913_v8 }
 0xe03   :  { %v7518_v9 = vpop.f32.mrb[22].mxu0 }
 0xe04   :  { %v3172_v10 = vpop.f32.mrb[23].mxu0 }
 0xe05   :  { %7614 = vmatprep.mubr.msk.f32.mxu1 %vm3492_vm13, %v3172_v10 }
 0xe06   :  { %7615 = vmatmul.mubr.msk.f32.vlgmr.msra.gmra.mrb[82].mxu1 %vm3492_vm13, %v7518_v9 }
 0xe07   :  { %7886 = vmatpush3.msra.mxu1 %v8650_v53  ;;  %v7521_v12 = vpop.f32.mrb[24].mxu0 }
 0xe08   :  { %v3182_v13 = vpop.f32.mrb[25].mxu0  ;;  %7890 = vmatprep.subr.mxu1 %v8550_v0 }
 0xe09   :  { %7617 = vmatprep.mubr.msk.f32.mxu1 %vm3492_vm13, %v3182_v13 }
 0xe0a   :  { %7618 = vmatmul.mubr.msk.f32.gmra.mrb[84].mxu1 %vm3492_vm13, %v7521_v12 }
 0xe0b   :  { %v7524_v14 = vpop.f32.mrb[26].mxu0 }
 0xe0c   :  { %v3192_v15 = vpop.f32.mrb[27].mxu0 }
 0xe0d   :  { %7620 = vmatprep.mubr.msk.f32.mxu1 %vm3492_vm13, %v3192_v15 }
 0xe0e   :  { %7621 = vmatmul.mubr.msk.f32.gmra.mrb[86].mxu1 %vm3492_vm13, %v7524_v14 }
 0xe0f   :  { %v7527_v16 = vpop.f32.mrb[28].mxu0 }
 0xe10   :  { %v3202_v17 = vpop.f32.mrb[29].mxu0 }
 0xe11   :  { %7623 = vmatprep.mubr.msk.f32.mxu1 %vm3492_vm13, %v3202_v17 }
 0xe12   :  { %7624 = vmatmul.mubr.msk.f32.gmra.mrb[88].mxu1 %vm3492_vm13, %v7527_v16 }
 0xe13   :  { %v7530_v18 = vpop.f32.mrb[30].mxu0 }
 0xe14   :  { %v3212_v19 = vpop.f32.mrb[31].mxu0 }
 0xe15   :  { %7626 = vmatprep.mubr.msk.f32.mxu1 %vm3492_vm13, %v3212_v19  ;;  %v4079_v19 = vld [vmem:[#allocation4 + $0x600] sm:$0xff] }
 0xe16   :  { %7627 = vmatmul.mubr.msk.f32.gmra.mrb[90].mxu1 %vm3492_vm13, %v7530_v18  ;;  %v4075_v18 = vld [vmem:[#allocation4 + $0x5e0] sm:$0xff] }
 0xe17   :  { %v7533_v20 = vpop.f32.mrb[32].mxu0 }
 0xe18   :  { %v3222_v21 = vpop.f32.mrb[33].mxu0 }
 0xe19   :  { %7629 = vmatprep.mubr.msk.f32.mxu1 %vm3492_vm13, %v3222_v21  ;;  %v4078_v21 = vld [vmem:[#allocation4 + $0x5f8] sm:$0xff] }
 0xe1a   :  { %7630 = vmatmul.mubr.msk.f32.gmra.mrb[92].mxu1 %vm3492_vm13, %v7533_v20  ;;  %v4074_v20 = vld [vmem:[#allocation4 + $0x5d8] sm:$0xff] }
 0xe1b   :  { %v7536_v22 = vpop.f32.mrb[34].mxu0 }
 0xe1c   :  { %v3232_v23 = vpop.f32.mrb[35].mxu0 }
 0xe1d   :  { %7632 = vmatprep.mubr.msk.f32.mxu1 %vm3492_vm13, %v3232_v23  ;;  %v4270_v23 = vld [vmem:[#allocation4 + $0x118] sm:$0xff] }
 0xe1e   :  { %7633 = vmatmul.mubr.msk.f32.gmra.mrb[94].mxu1 %vm3492_vm13, %v7536_v22  ;;  %7718 = vmatprep.mubr.msk.f32.mxu0 %vm1787_vm8, %v4270_v23  ;;  %v4092_v23 = vld [vmem:[#allocation4 + $0x668] sm:$0xff] }
 0xe1f   :  { %v7539_v24 = vpop.f32.mrb[36].mxu0 }
 0xe20   :  { %v3242_v25 = vpop.f32.mrb[37].mxu0 }
 0xe21   :  { %7635 = vmatprep.mubr.msk.f32.mxu1 %vm3492_vm13, %v3242_v25 }
 0xe22   :  { %7636 = vmatmul.mubr.msk.f32.gmra.mrb[96].mxu1 %vm3492_vm13, %v7539_v24 }
 0xe23   :  { %v7542_v26 = vpop.f32.mrb[38].mxu0 }
 0xe24   :  { %v3252_v27 = vpop.f32.mrb[39].mxu0 }
 0xe25   :  { %7638 = vmatprep.mubr.msk.f32.mxu1 %vm3492_vm13, %v3252_v27 }
 0xe26   :  { %7639 = vmatmul.mubr.msk.f32.gmra.mrb[98].mxu1 %vm3492_vm13, %v7542_v26 }
 0xe27   :  { %v7545_v28 = vpop.f32.mrb[40].mxu0 }
 0xe28   :  { %v3262_v31 = vpop.f32.mrb[41].mxu0 }
 0xe29   :  { %7641 = vmatprep.mubr.msk.f32.mxu1 %vm3492_vm13, %v3262_v31 }
 0xe2a   :  { %7642 = vmatmul.mubr.msk.f32.gmra.mrb[100].mxu1 %vm3492_vm13, %v7545_v28  ;;  %v4077_v28 = vld [vmem:[#allocation4 + $0x5f0] sm:$0xff] }
 0xe2b   :  { %v7548_v29 = vpop.f32.mrb[42].mxu0 }
 0xe2c   :  { %v3272_v30 = vpop.f32.mrb[43].mxu0 }
 0xe2d   :  { %7644 = vmatprep.mubr.msk.f32.mxu1 %vm3492_vm13, %v3272_v30  ;;  %v4076_v30 = vld [vmem:[#allocation4 + $0x5e8] sm:$0xff] }
 0xe2e   :  { %7645 = vmatmul.mubr.msk.f32.gmra.mrb[102].mxu1 %vm3492_vm13, %v7548_v29  ;;  %v4081_v29 = vld [vmem:[#allocation4 + $0x610] sm:$0xff] }
 0xe2f   :  { %v7551_v32 = vpop.f32.mrb[44].mxu0 }
 0xe30   :  { %v3282_v33 = vpop.f32.mrb[45].mxu0 }
 0xe31   :  { %7647 = vmatprep.mubr.msk.f32.mxu1 %vm3492_vm13, %v3282_v33  ;;  %v4080_v33 = vld [vmem:[#allocation4 + $0x608] sm:$0xff] }
 0xe32   :  { %7648 = vmatmul.mubr.msk.f32.gmra.mrb[104].mxu1 %vm3492_vm13, %v7551_v32 }
 0xe33   :  { %v7554_v34 = vpop.f32.mrb[46].mxu0 }
 0xe34   :  { %v3292_v35 = vpop.f32.mrb[47].mxu0 }
 0xe35   :  { %7650 = vmatprep.mubr.msk.f32.mxu1 %vm3492_vm13, %v3292_v35 }
 0xe36   :  { %7651 = vmatmul.mubr.msk.f32.gmra.mrb[106].mxu1 %vm3492_vm13, %v7554_v34 }
 0xe37   :  { %v7557_v36 = vpop.f32.mrb[48].mxu0 }
 0xe38   :  { %v3302_v37 = vpop.f32.mrb[49].mxu0 }
 0xe39   :  { %7653 = vmatprep.mubr.msk.f32.mxu1 %vm3492_vm13, %v3302_v37 }
 0xe3a   :  { %7654 = vmatmul.mubr.msk.f32.gmra.mrb[108].mxu1 %vm3492_vm13, %v7557_v36 }
 0xe3b   :  { %v7560_v38 = vpop.f32.mrb[50].mxu0 }
 0xe3c   :  { %v3312_v39 = vpop.f32.mrb[51].mxu0 }
 0xe3d   :  { %7656 = vmatprep.mubr.msk.f32.mxu1 %vm3492_vm13, %v3312_v39 }
 0xe3e   :  { %7657 = vmatmul.mubr.msk.f32.gmra.mrb[110].mxu1 %vm3492_vm13, %v7560_v38 }
 0xe3f   :  { %v7563_v40 = vpop.f32.mrb[52].mxu0 }
 0xe40   :  { %v3322_v41 = vpop.f32.mrb[53].mxu0 }
 0xe41   :  { %7659 = vmatprep.mubr.msk.f32.mxu1 %vm3492_vm13, %v3322_v41  ;;  %v4083_v41 = vld [vmem:[#allocation4 + $0x620] sm:$0xff] }
 0xe42   :  { %7660 = vmatmul.mubr.msk.f32.gmra.mrb[112].mxu1 %vm3492_vm13, %v7563_v40 }
 0xe43   :  { %v7566_v42 = vpop.f32.mrb[54].mxu0 }
 0xe44   :  { %v3332_v43 = vpop.f32.mrb[55].mxu0 }
 0xe45   :  { %7662 = vmatprep.mubr.msk.f32.mxu1 %vm3492_vm13, %v3332_v43  ;;  %v4082_v43 = vld [vmem:[#allocation4 + $0x618] sm:$0xff] }
 0xe46   :  { %7663 = vmatmul.mubr.msk.f32.gmra.mrb[114].mxu1 %vm3492_vm13, %v7566_v42 }
 0xe47   :  { %v7569_v44 = vpop.f32.mrb[56].mxu0 }
 0xe48   :  { %v3342_v45 = vpop.f32.mrb[57].mxu0 }
 0xe49   :  { %7665 = vmatprep.mubr.msk.f32.mxu1 %vm3492_vm13, %v3342_v45 }
 0xe4a   :  { %7666 = vmatmul.mubr.msk.f32.gmra.mrb[116].mxu1 %vm3492_vm13, %v7569_v44 }
 0xe4b   :  { %v7572_v46 = vpop.f32.mrb[58].mxu0 }
 0xe4c   :  { %v3352_v47 = vpop.f32.mrb[59].mxu0 }
 0xe4d   :  { %7668 = vmatprep.mubr.msk.f32.mxu1 %vm3492_vm13, %v3352_v47 }
 0xe4e   :  { %7669 = vmatmul.mubr.msk.f32.gmra.mrb[118].mxu1 %vm3492_vm13, %v7572_v46 }
 0xe4f   :  { %v7575_v48 = vpop.f32.mrb[60].mxu0 }
 0xe50   :  { %v3362_v49 = vpop.f32.mrb[61].mxu0 }
 0xe51   :  { %7671 = vmatprep.mubr.msk.f32.mxu1 %vm3492_vm13, %v3362_v49  ;;  %v4085_v49 = vld [vmem:[#allocation4 + $0x630] sm:$0xff] }
 0xe52   :  { %7672 = vmatmul.mubr.msk.f32.gmra.mrb[120].mxu1 %vm3492_vm13, %v7575_v48 }
 0xe53   :  { %v7578_v50 = vpop.f32.mrb[62].mxu0 }
 0xe54   :  { %v3372_v51 = vpop.f32.mrb[63].mxu0 }
 0xe55   :  { %7674 = vmatprep.mubr.msk.f32.mxu1 %vm3492_vm13, %v3372_v51  ;;  %v4084_v51 = vld [vmem:[#allocation4 + $0x628] sm:$0xff] }
 0xe56   :  { %7675 = vmatmul.mubr.msk.f32.gmra.mrb[122].mxu1 %vm3492_vm13, %v7578_v50 }
 0xe57   :  { %v7581_v52 = vpop.f32.mrb[64].mxu0 }
 0xe58   :  { %v3382_v54 = vpop.f32.mrb[65].mxu0 }
 0xe59   :  { %7677 = vmatprep.mubr.msk.f32.mxu1 %vm3492_vm13, %v3382_v54 }
 0xe5a   :  { %7678 = vmatmul.mubr.msk.f32.gmra.mrb[124].mxu1 %vm3492_vm13, %v7581_v52 }
 0xe5b   :  { %v7584_v55 = vpop.f32.mrb[66].mxu0 }
 0xe5c   :  { %v3392_v56 = vpop.f32.mrb[67].mxu0 }
 0xe5d   :  { %7680 = vmatprep.mubr.msk.f32.mxu1 %vm3492_vm13, %v3392_v56 }
 0xe5e   :  { %7681 = vmatmul.mubr.msk.f32.gmra.mrb[126].mxu1 %vm3492_vm13, %v7584_v55 }
 0xe5f   :  { %v7587_v58 = vpop.f32.mrb[68].mxu0 }
 0xe60   :  { %v3402_v59 = vpop.f32.mrb[69].mxu0 }
 0xe61   :  { %7683 = vmatprep.mubr.msk.f32.mxu1 %vm3492_vm13, %v3402_v59  ;;  %v4087_v59 = vld [vmem:[#allocation4 + $0x640] sm:$0xff] }
 0xe62   :  { %7684 = vmatmul.mubr.msk.f32.gmra.mrb[128].mxu1 %vm3492_vm13, %v7587_v58 }
 0xe63   :  { %v7590_v60 = vpop.f32.mrb[70].mxu0 }
 0xe64   :  { %v3412_v61 = vpop.f32.mrb[71].mxu0 }
 0xe65   :  { %7686 = vmatprep.mubr.msk.f32.mxu1 %vm3492_vm13, %v3412_v61  ;;  %v4086_v61 = vld [vmem:[#allocation4 + $0x638] sm:$0xff] }
 0xe66   :  { %7687 = vmatmul.mubr.msk.f32.gmra.mrb[130].mxu1 %vm3492_vm13, %v7590_v60 }
 0xe67   :  { %v7593_v62 = vpop.f32.mrb[72].mxu0 }
 0xe68   :  { %v3422_v63 = vpop.f32.mrb[73].mxu0 }
 0xe69   :  { %7689 = vmatprep.mubr.msk.f32.mxu1 %vm3492_vm13, %v3422_v63 }
 0xe6a   :  { %7690 = vmatmul.mubr.msk.f32.gmra.mrb[132].mxu1 %vm3492_vm13, %v7593_v62 }
 0xe6b   :  { %v7596_v2 = vpop.f32.mrb[74].mxu0 }
 0xe6c   :  { %v3432_v3 = vpop.f32.mrb[75].mxu0 }
 0xe6d   :  { %7692 = vmatprep.mubr.msk.f32.mxu1 %vm3492_vm13, %v3432_v3 }
 0xe6e   :  { %7693 = vmatmul.mubr.msk.f32.gmra.mrb[134].mxu1 %vm3492_vm13, %v7596_v2 }
 0xe6f   :  { %v7599_v4 = vpop.f32.mrb[76].mxu0 }
 0xe70   :  { %v3442_v1 = vpop.f32.mrb[77].mxu0 }
 0xe71   :  { %7695 = vmatprep.mubr.msk.f32.mxu1 %vm3492_vm13, %v3442_v1  ;;  %v4089_v1 = vld [vmem:[#allocation4 + $0x650] sm:$0xff] }
 0xe72   :  { %7696 = vmatmul.mubr.msk.f32.gmra.mrb[136].mxu1 %vm3492_vm13, %v7599_v4 }
 0xe73   :  { %v7602_v5 = vpop.f32.mrb[78].mxu0 }
 0xe74   :  { %v3452_v6 = vpop.f32.mrb[79].mxu0 }
 0xe75   :  { %7698 = vmatprep.mubr.msk.f32.mxu1 %vm3492_vm13, %v3452_v6  ;;  %v4088_v6 = vld [vmem:[#allocation4 + $0x648] sm:$0xff] }
 0xe76   :  { %7699 = vmatmul.mubr.msk.f32.gmra.mrb[138].mxu1 %vm3492_vm13, %v7602_v5 }
 0xe77   :  { %v7605_v7 = vpop.f32.mrb[80].mxu0 }
 0xe78   :  { %v3462_v8 = vpop.f32.mrb[81].mxu0 }
 0xe79   :  { %7701 = vmatprep.mubr.msk.f32.mxu1 %vm3492_vm13, %v3462_v8 }
 0xe7a   :  { %7702 = vmatmul.mubr.msk.f32.gmra.mrb[140].mxu1 %vm3492_vm13, %v7605_v7 }
 0xe7b   :  { %v7608_v9 = vpop.f32.mrb[82].mxu0 }
 0xe7c   :  { %v3472_v10 = vpop.f32.mrb[83].mxu0 }
 0xe7d   :  { %7704 = vmatprep.mubr.msk.f32.mxu1 %vm3492_vm13, %v3472_v10 }
 0xe7e   :  { %7705 = vmatmul.mubr.msk.f32.gmra.mrb[142].mxu1 %vm3492_vm13, %v7608_v9 }
 0xe7f   :  { %v7611_v12 = vpop.f32.mrb[84].mxu0 }
 0xe80   :  { %v3482_v13 = vpop.f32.mrb[85].mxu0 }
 0xe81   :  { %7707 = vmatprep.mubr.msk.f32.mxu1 %vm3492_vm13, %v3482_v13  ;;  %v4091_v13 = vld [vmem:[#allocation4 + $0x660] sm:$0xff] }
 0xe82   :  { %7708 = vmatmul.mubr.msk.f32.gmra.mrb[144].mxu1 %vm3492_vm13, %v7611_v12 }
 0xe83   :  { %7887 = vmatprep.mubr.msk.f32.mxu1 %vm8551_vm0, %v8550_v0 }
 0xed9   :  { %v7616_v14 = vpop.f32.mrb[82].mxu1 }
 0xeda   :  { %v3755_v15 = vpop.f32.mrb[83].mxu1  ;;  %v4139_v24 = vmul.f32 %v7616_v14, %v4075_v18 }
 0xedb   :  { %v4138_v27 = vmul.f32 %v4074_v20, %v3755_v15  ;;  %v4090_v15 = vld [vmem:[#allocation4 + $0x658] sm:$0xff] }
 0xedd   :  { %v7619_v16 = vpop.f32.mrb[84].mxu1 }
 0xede   :  { %v3765_v17 = vpop.f32.mrb[85].mxu1  ;;  %v4141_v36 = vmul.f32 %v7619_v16, %v4077_v28 }
 0xedf   :  { %v4140_v39 = vmul.f32 %v4076_v30, %v3765_v17  ;;  %v4094_v30 = vld [vmem:[#allocation4 + $0x678] sm:$0xff] }
 0xee1   :  { %v7622_v22 = vpop.f32.mrb[86].mxu1 }
 0xee2   :  { %v4143_v25 = vmul.f32 %v7622_v22, %v4079_v19  ;;  %v3775_v26 = vpop.f32.mrb[87].mxu1 }
 0xee3   :  { %v4142_v31 = vmul.f32 %v4078_v21, %v3775_v26  ;;  %v4093_v21 = vld [vmem:[#allocation4 + $0x670] sm:$0xff] }
 0xee4   :  { %v4203_v32 = vadd.f32 %v4143_v25, %v4139_v24 }
 0xee5   :  { %v4202_v34 = vadd.f32 %v4142_v31, %v4138_v27  ;;  %v7625_v35 = vpop.f32.mrb[88].mxu1  ;;  %v4095_v31 = vld [vmem:[#allocation4 + $0x680] sm:$0xff] }
 0xee6   :  { %v4145_v37 = vmul.f32 %v7625_v35, %v4081_v29  ;;  %v3785_v38 = vpop.f32.mrb[89].mxu1 }
 0xee7   :  { %v4144_v40 = vmul.f32 %v4080_v33, %v3785_v38 }
 0xee8   :  { %v4205_v42 = vadd.f32 %v4145_v37, %v4141_v36  ;;  %v4097_v37 = vld [vmem:[#allocation4 + $0x690] sm:$0xff] }
 0xee9   :  { %v4204_v44 = vadd.f32 %v4144_v40, %v4140_v39  ;;  %v7628_v45 = vpop.f32.mrb[90].mxu1  ;;  %v4096_v39 = vld [vmem:[#allocation4 + $0x688] sm:$0xff] }
 0xeea   :  { %v4147_v46 = vmul.f32 %v7628_v45, %v4083_v41  ;;  %v3795_v47 = vpop.f32.mrb[91].mxu1  ;;  %v4099_v45 = vld [vmem:[#allocation4 + $0x6a0] sm:$0xff] }
 0xeeb   :  { %v4146_v48 = vmul.f32 %v4082_v43, %v3795_v47  ;;  %v4098_v47 = vld [vmem:[#allocation4 + $0x698] sm:$0xff] }
 0xeec   :  { %v4207_v50 = vadd.f32 %v4203_v32, %v4147_v46 }
 0xeed   :  { %v4206_v52 = vadd.f32 %v4202_v34, %v4146_v48  ;;  %v7631_v54 = vpop.f32.mrb[92].mxu1 }
 0xeee   :  { %v4149_v55 = vmul.f32 %v7631_v54, %v4085_v49  ;;  %v3805_v56 = vpop.f32.mrb[93].mxu1  ;;  %v4101_v54 = vld [vmem:[#allocation4 + $0x6b0] sm:$0xff] }
 0xeef   :  { %v4148_v58 = vmul.f32 %v4084_v51, %v3805_v56  ;;  %v4100_v56 = vld [vmem:[#allocation4 + $0x6a8] sm:$0xff] }
 0xef0   :  { %v4209_v60 = vadd.f32 %v4205_v42, %v4149_v55 }
 0xef1   :  { %v4208_v62 = vadd.f32 %v4204_v44, %v4148_v58  ;;  %v7634_v63 = vpop.f32.mrb[94].mxu1 }
 0xef2   :  { %v4151_v2 = vmul.f32 %v7634_v63, %v4087_v59  ;;  %v3815_v3 = vpop.f32.mrb[95].mxu1  ;;  %v4103_v63 = vld [vmem:[#allocation4 + $0x6c0] sm:$0xff] }
 0xef3   :  { %v4150_v4 = vmul.f32 %v4086_v61, %v3815_v3  ;;  %v4102_v3 = vld [vmem:[#allocation4 + $0x6b8] sm:$0xff] }
 0xef4   :  { %v4211_v5 = vadd.f32 %v4207_v50, %v4151_v2 }
 0xef5   :  { %v4210_v7 = vadd.f32 %v4206_v52, %v4150_v4  ;;  %v7637_v8 = vpop.f32.mrb[96].mxu1 }
 0xef6   :  { %v4153_v9 = vmul.f32 %v7637_v8, %v4089_v1  ;;  %v3825_v10 = vpop.f32.mrb[97].mxu1  ;;  %v4105_v8 = vld [vmem:[#allocation4 + $0x6d0] sm:$0xff] }
 0xef7   :  { %v4152_v12 = vmul.f32 %v4088_v6, %v3825_v10  ;;  %v4104_v10 = vld [vmem:[#allocation4 + $0x6c8] sm:$0xff] }
 0xef8   :  { %v4213_v14 = vadd.f32 %v4209_v60, %v4153_v9 }
 0xef9   :  { %v4212_v16 = vadd.f32 %v4208_v62, %v4152_v12  ;;  %v7640_v17 = vpop.f32.mrb[98].mxu1 }
 0xefa   :  { %v4155_v18 = vmul.f32 %v7640_v17, %v4091_v13  ;;  %v3835_v19 = vpop.f32.mrb[99].mxu1  ;;  %v4107_v17 = vld [vmem:[#allocation4 + $0x6e0] sm:$0xff] }
 0xefb   :  { %v4154_v20 = vmul.f32 %v4090_v15, %v3835_v19  ;;  %v4106_v19 = vld [vmem:[#allocation4 + $0x6d8] sm:$0xff] }
 0xefc   :  { %v4215_v22 = vadd.f32 %v4211_v5, %v4155_v18 }
 0xefd   :  { %v4214_v24 = vadd.f32 %v4210_v7, %v4154_v20  ;;  %v7643_v25 = vpop.f32.mrb[100].mxu1 }
 0xefe   :  { %v4157_v26 = vmul.f32 %v7643_v25, %v4093_v21  ;;  %v3845_v27 = vpop.f32.mrb[101].mxu1  ;;  %v4109_v25 = vld [vmem:[#allocation4 + $0x6f0] sm:$0xff] }
 0xeff   :  { %v4156_v28 = vmul.f32 %v4092_v23, %v3845_v27  ;;  %v4108_v27 = vld [vmem:[#allocation4 + $0x6e8] sm:$0xff] }
 0xf00   :  { %v4217_v29 = vadd.f32 %v4213_v14, %v4157_v26 }
 0xf01   :  { %v4216_v32 = vadd.f32 %v4212_v16, %v4156_v28  ;;  %v7646_v33 = vpop.f32.mrb[102].mxu1 }
 0xf02   :  { %v4159_v34 = vmul.f32 %v7646_v33, %v4095_v31  ;;  %v3855_v35 = vpop.f32.mrb[103].mxu1  ;;  %v4111_v33 = vld [vmem:[#allocation4 + $0x700] sm:$0xff] }
 0xf03   :  { %v4158_v36 = vmul.f32 %v4094_v30, %v3855_v35  ;;  %v4110_v35 = vld [vmem:[#allocation4 + $0x6f8] sm:$0xff] }
 0xf04   :  { %v4219_v38 = vadd.f32 %v4215_v22, %v4159_v34 }
 0xf05   :  { %v4218_v40 = vadd.f32 %v4214_v24, %v4158_v36  ;;  %v7649_v41 = vpop.f32.mrb[104].mxu1 }
 0xf06   :  { %v4161_v42 = vmul.f32 %v7649_v41, %v4097_v37  ;;  %v3865_v43 = vpop.f32.mrb[105].mxu1  ;;  %v4113_v41 = vld [vmem:[#allocation4 + $0x710] sm:$0xff] }
 0xf07   :  { %v4160_v44 = vmul.f32 %v4096_v39, %v3865_v43  ;;  %v4112_v43 = vld [vmem:[#allocation4 + $0x708] sm:$0xff] }
 0xf08   :  { %v4221_v46 = vadd.f32 %v4217_v29, %v4161_v42 }
 0xf09   :  { %v4220_v48 = vadd.f32 %v4216_v32, %v4160_v44  ;;  %v7652_v49 = vpop.f32.mrb[106].mxu1 }
 0xf0a   :  { %v4163_v50 = vmul.f32 %v7652_v49, %v4099_v45  ;;  %v3875_v51 = vpop.f32.mrb[107].mxu1  ;;  %v4115_v49 = vld [vmem:[#allocation4 + $0x720] sm:$0xff] }
 0xf0b   :  { %v4162_v52 = vmul.f32 %v4098_v47, %v3875_v51  ;;  %v4114_v51 = vld [vmem:[#allocation4 + $0x718] sm:$0xff] }
 0xf0c   :  { %v4223_v55 = vadd.f32 %v4219_v38, %v4163_v50 }
 0xf0d   :  { %v4222_v58 = vadd.f32 %v4218_v40, %v4162_v52  ;;  %v7655_v59 = vpop.f32.mrb[108].mxu1 }
 0xf0e   :  { %v4165_v60 = vmul.f32 %v7655_v59, %v4101_v54  ;;  %v3885_v61 = vpop.f32.mrb[109].mxu1  ;;  %v4117_v59 = vld [vmem:[#allocation4 + $0x730] sm:$0xff] }
 0xf0f   :  { %v4164_v62 = vmul.f32 %v4100_v56, %v3885_v61  ;;  %v4116_v61 = vld [vmem:[#allocation4 + $0x728] sm:$0xff] }
 0xf10   :  { %v4225_v2 = vadd.f32 %v4221_v46, %v4165_v60 }
 0xf11   :  { %v4224_v4 = vadd.f32 %v4220_v48, %v4164_v62  ;;  %v7658_v1 = vpop.f32.mrb[110].mxu1 }
 0xf12   :  { %v4167_v5 = vmul.f32 %v7658_v1, %v4103_v63  ;;  %v3895_v6 = vpop.f32.mrb[111].mxu1  ;;  %v4119_v1 = vld [vmem:[#allocation4 + $0x740] sm:$0xff] }
 0xf13   :  { %v4166_v7 = vmul.f32 %v4102_v3, %v3895_v6  ;;  %v4118_v6 = vld [vmem:[#allocation4 + $0x738] sm:$0xff] }
 0xf14   :  { %v4227_v9 = vadd.f32 %v4223_v55, %v4167_v5 }
 0xf15   :  { %v4226_v12 = vadd.f32 %v4222_v58, %v4166_v7  ;;  %v7661_v13 = vpop.f32.mrb[112].mxu1 }
 0xf16   :  { %v4169_v14 = vmul.f32 %v7661_v13, %v4105_v8  ;;  %v3905_v15 = vpop.f32.mrb[113].mxu1  ;;  %v4121_v13 = vld [vmem:[#allocation4 + $0x750] sm:$0xff] }
 0xf17   :  { %v4168_v16 = vmul.f32 %v4104_v10, %v3905_v15  ;;  %v4120_v15 = vld [vmem:[#allocation4 + $0x748] sm:$0xff] }
 0xf18   :  { %v4229_v18 = vadd.f32 %v4225_v2, %v4169_v14 }
 0xf19   :  { %v4228_v20 = vadd.f32 %v4224_v4, %v4168_v16  ;;  %v7664_v21 = vpop.f32.mrb[114].mxu1 }
 0xf1a   :  { %v4171_v22 = vmul.f32 %v7664_v21, %v4107_v17  ;;  %v3915_v23 = vpop.f32.mrb[115].mxu1  ;;  %v4123_v21 = vld [vmem:[#allocation4 + $0x760] sm:$0xff] }
 0xf1b   :  { %v4170_v24 = vmul.f32 %v4106_v19, %v3915_v23  ;;  %v4122_v23 = vld [vmem:[#allocation4 + $0x758] sm:$0xff] }
 0xf1c   :  { %v4231_v26 = vadd.f32 %v4227_v9, %v4171_v22 }
 0xf1d   :  { %v4230_v28 = vadd.f32 %v4226_v12, %v4170_v24  ;;  %v7667_v31 = vpop.f32.mrb[116].mxu1 }
 0xf1e   :  { %v4173_v29 = vmul.f32 %v7667_v31, %v4109_v25  ;;  %v3925_v30 = vpop.f32.mrb[117].mxu1  ;;  %v4125_v31 = vld [vmem:[#allocation4 + $0x770] sm:$0xff] }
 0xf1f   :  { %v4172_v32 = vmul.f32 %v4108_v27, %v3925_v30  ;;  %v4124_v30 = vld [vmem:[#allocation4 + $0x768] sm:$0xff] }
 0xf20   :  { %v4233_v34 = vadd.f32 %v4229_v18, %v4173_v29 }
 0xf21   :  { %v4232_v36 = vadd.f32 %v4228_v20, %v4172_v32  ;;  %v7670_v37 = vpop.f32.mrb[118].mxu1 }
 0xf22   :  { %v4175_v38 = vmul.f32 %v7670_v37, %v4111_v33  ;;  %v3935_v39 = vpop.f32.mrb[119].mxu1  ;;  %v4127_v37 = vld [vmem:[#allocation4 + $0x780] sm:$0xff] }
 0xf23   :  { %v4174_v40 = vmul.f32 %v4110_v35, %v3935_v39  ;;  %v4126_v39 = vld [vmem:[#allocation4 + $0x778] sm:$0xff] }
 0xf24   :  { %v4235_v42 = vadd.f32 %v4231_v26, %v4175_v38 }
 0xf25   :  { %v4234_v44 = vadd.f32 %v4230_v28, %v4174_v40  ;;  %v7673_v45 = vpop.f32.mrb[120].mxu1 }
 0xf26   :  { %v4177_v46 = vmul.f32 %v7673_v45, %v4113_v41  ;;  %v3945_v47 = vpop.f32.mrb[121].mxu1  ;;  %v4129_v45 = vld [vmem:[#allocation4 + $0x790] sm:$0xff] }
 0xf27   :  { %v4176_v48 = vmul.f32 %v4112_v43, %v3945_v47  ;;  %v4128_v47 = vld [vmem:[#allocation4 + $0x788] sm:$0xff] }
 0xf28   :  { %v4237_v50 = vadd.f32 %v4233_v34, %v4177_v46 }
 0xf29   :  { %v4236_v52 = vadd.f32 %v4232_v36, %v4176_v48  ;;  %v7676_v54 = vpop.f32.mrb[122].mxu1 }
 0xf2a   :  { %v4179_v55 = vmul.f32 %v7676_v54, %v4115_v49  ;;  %v3955_v56 = vpop.f32.mrb[123].mxu1  ;;  %v4131_v54 = vld [vmem:[#allocation4 + $0x7a0] sm:$0xff] }
 0xf2b   :  { %v4178_v58 = vmul.f32 %v4114_v51, %v3955_v56  ;;  %v4130_v56 = vld [vmem:[#allocation4 + $0x798] sm:$0xff] }
 0xf2c   :  { %v4239_v60 = vadd.f32 %v4235_v42, %v4179_v55 }
 0xf2d   :  { %v4238_v62 = vadd.f32 %v4234_v44, %v4178_v58  ;;  %v7679_v63 = vpop.f32.mrb[124].mxu1 }
 0xf2e   :  { %v4181_v2 = vmul.f32 %v7679_v63, %v4117_v59  ;;  %v3965_v3 = vpop.f32.mrb[125].mxu1  ;;  %v4133_v63 = vld [vmem:[#allocation4 + $0x7b0] sm:$0xff] }
 0xf2f   :  { %v4180_v4 = vmul.f32 %v4116_v61, %v3965_v3  ;;  %v4132_v3 = vld [vmem:[#allocation4 + $0x7a8] sm:$0xff] }
 0xf30   :  { %v4241_v5 = vadd.f32 %v4237_v50, %v4181_v2 }
 0xf31   :  { %v4240_v7 = vadd.f32 %v4236_v52, %v4180_v4  ;;  %v7682_v8 = vpop.f32.mrb[126].mxu1 }
 0xf32   :  { %v4183_v9 = vmul.f32 %v7682_v8, %v4119_v1  ;;  %v3975_v10 = vpop.f32.mrb[127].mxu1  ;;  %v4135_v8 = vld [vmem:[#allocation4 + $0x7c0] sm:$0xff] }
 0xf33   :  { %v4182_v12 = vmul.f32 %v4118_v6, %v3975_v10  ;;  %v4134_v10 = vld [vmem:[#allocation4 + $0x7b8] sm:$0xff] }
 0xf34   :  { %v4243_v14 = vadd.f32 %v4239_v60, %v4183_v9 }
 0xf35   :  { %v4242_v16 = vadd.f32 %v4238_v62, %v4182_v12  ;;  %v7685_v17 = vpop.f32.mrb[128].mxu1 }
 0xf36   :  { %v4185_v18 = vmul.f32 %v7685_v17, %v4121_v13  ;;  %v3985_v19 = vpop.f32.mrb[129].mxu1 }
 0xf37   :  { %v4184_v20 = vmul.f32 %v4120_v15, %v3985_v19 }
 0xf38   :  { %v4245_v22 = vadd.f32 %v4241_v5, %v4185_v18  ;;  %v4137_v18 = vld [vmem:[#allocation4 + $0x7d0] sm:$0xff] }
 0xf39   :  { %v4244_v24 = vadd.f32 %v4240_v7, %v4184_v20  ;;  %v7688_v25 = vpop.f32.mrb[130].mxu1  ;;  %v4262_v20 = vld [vmem:[#allocation4 + $0xa20] sm:$0xff] }
 0xf3a   :  { %v4187_v26 = vmul.f32 %v7688_v25, %v4123_v21  ;;  %v3995_v27 = vpop.f32.mrb[131].mxu1  ;;  %v4136_v21 = vld [vmem:[#allocation4 + $0x7c8] sm:$0xff] }
 0xf3b   :  { %v4186_v28 = vmul.f32 %v4122_v23, %v3995_v27 }
 0xf3c   :  { %v4247_v29 = vadd.f32 %v4243_v14, %v4187_v26 }
 0xf3d   :  { %v4246_v32 = vadd.f32 %v4242_v16, %v4186_v28  ;;  %v7691_v33 = vpop.f32.mrb[132].mxu1  ;;  %v4263_v16 = vld [vmem:[#allocation4 + $0xa28] sm:$0xff]  ;;  %v4265_v28 = vld [vmem:[#allocation4 + $0xa38] sm:$0xff] }
 0xf3e   :  { %v4189_v34 = vmul.f32 %v7691_v33, %v4125_v31  ;;  %v4005_v35 = vpop.f32.mrb[133].mxu1 }
 0xf3f   :  { %v4188_v36 = vmul.f32 %v4124_v30, %v4005_v35  ;;  %v4264_v30 = vld [vmem:[#allocation4 + $0xa30] sm:$0xff] }
 0xf40   :  { %v4249_v38 = vadd.f32 %v4245_v22, %v4189_v34 }
 0xf41   :  { %v4248_v40 = vadd.f32 %v4244_v24, %v4188_v36  ;;  %v7694_v41 = vpop.f32.mrb[134].mxu1 }
 0xf42   :  { %v4191_v42 = vmul.f32 %v7694_v41, %v4127_v37  ;;  %v4015_v43 = vpop.f32.mrb[135].mxu1  ;;  %v4271_v37 = vld [vmem:[#allocation4 + $0x120] sm:$0xff] }
 0xf43   :  { %v4190_v44 = vmul.f32 %v4126_v39, %v4015_v43  ;;  %v4440_v39 = vld [vmem:[#allocation2 + $0x418] sm:$0xff]  ;;  %v4442_v43 = vld [vmem:[#allocation2 + $0x428] sm:$0xff] }
 0xf44   :  { %v4251_v46 = vadd.f32 %v4247_v29, %v4191_v42  ;;  %v4358_v42 = vld [vmem:[#allocation4 + $0x130] sm:$0xff] }
 0xf45   :  { %v4250_v48 = vadd.f32 %v4246_v32, %v4190_v44  ;;  %v7697_v49 = vpop.f32.mrb[136].mxu1  ;;  %v4443_v44 = vld [vmem:[#allocation2 + $0x430] sm:$0xff] }
 0xf46   :  { %v4193_v50 = vmul.f32 %v7697_v49, %v4129_v45  ;;  %v4025_v51 = vpop.f32.mrb[137].mxu1  ;;  %v8282_v45 = vpack.c.bf16 %v4443_v44, %v4442_v43 }
 0xf47   :  { %v4192_v52 = vmul.f32 %v4128_v47, %v4025_v51  ;;  %v4354_v47 = vld [vmem:[#allocation2 + $0x400] sm:$0xff]  ;;  %v4355_v51 = vld [vmem:[#allocation2 + $0x408] sm:$0xff] }
 0xf48   :  { %v4253_v55 = vadd.f32 %v4249_v38, %v4193_v50  ;;  %v4357_v38 = vld [vmem:[#allocation4 + $0x128] sm:$0xff] }
 0xf49   :  { %v4252_v58 = vadd.f32 %v4248_v40, %v4192_v52  ;;  %v7700_v59 = vpop.f32.mrb[138].mxu1  ;;  %v4441_v40 = vld [vmem:[#allocation2 + $0x420] sm:$0xff]  ;;  %v4356_v52 = vld [vmem:[#allocation2 + $0x410] sm:$0xff] }
 0xf4a   :  { %v4195_v60 = vmul.f32 %v7700_v59, %v4131_v54  ;;  %v4035_v61 = vpop.f32.mrb[139].mxu1  ;;  %v8278_v41 = vpack.c.bf16 %v4441_v40, %v4440_v39  ;;  %v4689_v59 = vld [vmem:[#allocation2 + $0x438] sm:$0xff] }
 0xf4b   :  { %v4194_v62 = vmul.f32 %v4130_v56, %v4035_v61  ;;  %v8290_v56 = vpack.c.bf16 %v4356_v52, %v4355_v51  ;;  %v4840_v52 = vld [vmem:[#allocation4 + $0x168] sm:$0xff] }
 0xf4c   :  { %v4255_v2 = vadd.f32 %v4251_v46, %v4195_v60  ;;  %v4353_v46 = vld [vmem:[#allocation2 + $0x3f8] sm:$0xff]  ;;  %v4690_v60 = vld [vmem:[#allocation2 + $0x440] sm:$0xff] }
 0xf4d   :  { %v4254_v4 = vadd.f32 %v4250_v48, %v4194_v62  ;;  %v7703_v1 = vpop.f32.mrb[140].mxu1  ;;  %v8286_v48 = vpack.c.bf16 %v4354_v47, %v4353_v46  ;;  %v8302_v61 = vpack.c.bf16 %v4690_v60, %v4689_v59  ;;  %v4691_v62 = vld [vmem:[#allocation2 + $0x448] sm:$0xff]  ;;  %v5146_v60 = vld [vmem:[#allocation2 + $0x4b8] sm:$0xff] }
 0xf4e   :  { %v4197_v5 = vmul.f32 %v7703_v1, %v4133_v63  ;;  %v4045_v6 = vpop.f32.mrb[141].mxu1  ;;  %v4692_v63 = vld [vmem:[#allocation2 + $0x450] sm:$0xff] }
 0xf4f   :  { %v4196_v7 = vmul.f32 %v4132_v3, %v4045_v6  ;;  %v8306_v3 = vpack.c.bf16 %v4692_v63, %v4691_v62  ;;  %v4776_v6 = vld [vmem:[#allocation2 + $0x458] sm:$0xff]  ;;  %v5148_v63 = vld [vmem:[#allocation2 + $0x4c8] sm:$0xff] }
 0xf50   :  { %v4257_v9 = vadd.f32 %v4253_v55, %v4197_v5  ;;  %v4777_v5 = vld [vmem:[#allocation2 + $0x460] sm:$0xff] }
 0xf51   :  { %v4256_v12 = vadd.f32 %v4252_v58, %v4196_v7  ;;  %v7706_v13 = vpop.f32.mrb[142].mxu1  ;;  %v4606_v58 = vld [vmem:[#allocation4 + $0x138] sm:$0xff] }
 0xf52   :  { %v4199_v14 = vmul.f32 %v7706_v13, %v4135_v8  ;;  %v4055_v15 = vpop.f32.mrb[143].mxu1 }
 0xf53   :  { %v4198_v17 = vmul.f32 %v4134_v10, %v4055_v15 }
 0xf54   :  { %v4259_v19 = vadd.f32 %v4255_v2, %v4199_v14  ;;  %v4607_v2 = vld [vmem:[#allocation4 + $0x140] sm:$0xff] }
 0xf55   :  { %v4258_v22 = vadd.f32 %v4254_v4, %v4198_v17  ;;  %v7709_v23 = vpop.f32.mrb[144].mxu1 }
 0xf56   :  { %v4267_v24 = vadd.f32 %v4263_v16, %v4259_v19  ;;  %v4201_v25 = vmul.f32 %v7709_v23, %v4137_v18  ;;  %v4065_v26 = vpop.f32.mrb[145].mxu1  ;;  %v4813_v18 = vld [vmem:[#allocation4 + $0x150] sm:$0xff]  ;;  %v4812_v19 = vld [vmem:[#allocation4 + $0x148] sm:$0xff] }
 0xf57   :  { %v4266_v27 = vadd.f32 %v4262_v20, %v4258_v22  ;;  %v4200_v31 = vmul.f32 %v4136_v21, %v4065_v26 }
 0xf58   :  { %v4261_v29 = vadd.f32 %v4257_v9, %v4201_v25 }
 0xf59   :  { %v8262_v32 = vpack.c.bf16 %v4267_v24, %v4266_v27  ;;  %v4260_v33 = vadd.f32 %v4256_v12, %v4200_v31 }
 0xf5a   :  { %v4269_v34 = vadd.f32 %v4265_v28, %v4261_v29  ;;  %v4826_v29 = vld [vmem:[#allocation4 + $0x158] sm:$0xff] }
 0xf5b   :  { %v4268_v35 = vadd.f32 %v4264_v30, %v4260_v33  ;;  %8263 = vmatprep.subr.bf16.mxu0 %v8262_v32  ;;  %v4827_v30 = vld [vmem:[#allocation4 + $0x160] sm:$0xff] }
 0xf5c   :  { %8265 = vmatpush3.bf16.msra.mxu0 %v8262_v32 }
 0xf5d   :  { %v8266_v36 = vpack.c.bf16 %v4269_v34, %v4268_v35 }
 0xf5f   :  { %8267 = vmatprep.subr.bf16.mxu0 %v8266_v36 }
 0xf60   :  { %8269 = vmatpush3.bf16.msra.mxu0 %v8266_v36 }
 0xf61   :  { %8271 = vmatprep.subr.bf16.mxu0 %v8262_v32 }
 0xf63   :  { %7719 = vmatmul.mubr.msk.f32.vlgmr.msra.gmra.mrb[86].mxu0 %vm1787_vm8, %v4271_v37 }
 0xf64   :  { %8273 = vmatpush3.bf16.msra.mxu0 %v8262_v32  ;;  %7729 = vmatprep.mubr.msk.f32.mxu0 %vm1787_vm8, %v4357_v38 }
 0xf65   :  { %8275 = vmatprep.subr.bf16.mxu0 %v8266_v36 }
 0xf68   :  { %8277 = vmatpush3.bf16.msra.mxu0 %v8266_v36 }
 0xf69   :  { %8279 = vmatprep.subr.bf16.mxu0 %v8278_v41 }
 0xf6b   :  { %7730 = vmatmul.mubr.msk.f32.vlgmr.msra.gmra.mrb[88].mxu0 %vm1787_vm8, %v4358_v42 }
 0xf6c   :  { %8281 = vmatpush3.bf16.msra.mxu0 %v8278_v41 }
 0xf6d   :  { %8283 = vmatprep.subr.bf16.mxu0 %v8282_v45 }
 0xf70   :  { %8285 = vmatpush3.bf16.msra.mxu0 %v8282_v45 }
 0xf71   :  { %8287 = vmatprep.subr.bf16.mxu0 %v8286_v48 }
0x1036   :  { %v7720_v49 = vpop.f32.mrb[86].mxu0 }
0x1037   :  { %v4344_v50 = vpop.f32.mrb[87].mxu0 }
0x103e   :  { %v7731_v54 = vpop.f32.mrb[88].mxu0 }
0x103f   :  { %v4431_v55 = vpop.f32.mrb[89].mxu0 }
0x1040   :  { %7740 = vmatprep.mubr.msk.f32.mxu0 %vm1787_vm8, %v4431_v55  ;;  %v5144_v55 = vld [vmem:[#allocation2 + $0x4a8] sm:$0xff] }
0x1041   :  { %7741 = vmatmul.mubr.msk.f32.vlgmr.msra.gmra.mrb[90].mxu0 %vm1787_vm8, %v7731_v54  ;;  %v4997_v54 = vld [vmem:[#allocation4 + $0x180] sm:$0xff] }
0x1042   :  { %8289 = vmatpush3.bf16.msra.mxu0 %v8286_v48  ;;  %7751 = vmatprep.mubr.msk.f32.mxu0 %vm1787_vm8, %v4344_v50 }
0x1043   :  { %8291 = vmatprep.subr.bf16.mxu0 %v8290_v56 }
0x1046   :  { %8293 = vmatpush3.bf16.msra.mxu0 %v8290_v56  ;;  %v5145_v56 = vld [vmem:[#allocation2 + $0x4b0] sm:$0xff] }
0x1047   :  { %8295 = vmatprep.subr.bf16.mxu0 %v8262_v32  ;;  %v8323_v59 = vpack.c.bf16 %v5145_v56, %v5144_v55  ;;  %v5544_v56 = vld [vmem:[#allocation4 + $0x198] sm:$0xff] }
0x1049   :  { %7752 = vmatmul.mubr.msk.f32.vlgmr.msra.gmra.mrb[90].mxu0 %vm1787_vm8, %v7720_v49 }
0x104a   :  { %8297 = vmatpush3.bf16.msra.mxu0 %v8262_v32  ;;  %7762 = vmatprep.mubr.msk.f32.mxu0 %vm1787_vm8, %v4606_v58  ;;  %v4841_v32 = vld [vmem:[#allocation4 + $0x170] sm:$0xff]  ;;  %v4996_v58 = vld [vmem:[#allocation4 + $0x178] sm:$0xff] }
0x104b   :  { %8299 = vmatprep.subr.bf16.mxu0 %v8266_v36 }
0x104e   :  { %8301 = vmatpush3.bf16.msra.mxu0 %v8266_v36 }
0x104f   :  { %8303 = vmatprep.subr.bf16.mxu0 %v8302_v61 }
0x1051   :  { %7763 = vmatmul.mubr.msk.f32.vlgmr.msra.gmra.mrb[92].mxu0 %vm1787_vm8, %v4607_v2  ;;  %v5149_v2 = vld [vmem:[#allocation2 + $0x4d0] sm:$0xff] }
0x1052   :  { %8305 = vmatpush3.bf16.msra.mxu0 %v8302_v61  ;;  %v5147_v61 = vld [vmem:[#allocation2 + $0x4c0] sm:$0xff] }
0x1053   :  { %8307 = vmatprep.subr.bf16.mxu0 %v8306_v3  ;;  %v8326_v62 = vpack.c.bf16 %v5147_v61, %v5146_v60 }
0x1056   :  { %8309 = vmatpush3.bf16.msra.mxu0 %v8306_v3  ;;  %v8329_v3 = vpack.c.bf16 %v5149_v2, %v5148_v63 }
0x1057   :  { %8310 = vmatprep.subr.bf16.mxu0 %v8552_v11 }
0x1124   :  { %v7764_v4 = vpop.f32.mrb[92].mxu0 }
0x1125   :  { %v4680_v1 = vpop.f32.mrb[93].mxu0 }
0x1126   :  { %7773 = vmatprep.mubr.msk.f32.mxu0 %vm1787_vm8, %v4680_v1  ;;  %v5151_v1 = vld [vmem:[#allocation2 + $0x4e0] sm:$0xff] }
0x1127   :  { %7774 = vmatmul.mubr.msk.f32.vlgmr.msra.gmra.mrb[90].mxu0 %vm1787_vm8, %v7764_v4  ;;  %v5150_v4 = vld [vmem:[#allocation2 + $0x4d8] sm:$0xff] }
0x1128   :  { %8312 = vmatpush3.bf16.msra.mxu0 %v8670_v57  ;;  %7780 = vmatprep.mubr.msk.f32.mxu0 %vm8551_vm0, %v8550_v0 }
0x1129   :  { %8313 = vmatprep.subr.bf16.mxu0 %v8552_v11 }
0x112b   :  { %7781 = vmatmul.mubr.msk.f32.vlgmr.msra.gmra.mrb[94].mxu0 %vm1148_vm6, %v4841_v32 }
0x112c   :  { %7787 = vmatprep.mubr.msk.f32.mxu0 %vm8551_vm0, %v8550_v0 }
0x11fa   :  { %v7775_v7 = vpop.f32.mrb[90].mxu0 }
0x11fb   :  { %v4779_v8 = vadd.f32 %v7775_v7, %v4777_v5  ;;  %v4765_v9 = vpop.f32.mrb[91].mxu0  ;;  %v8332_v5 = vpack.c.bf16 %v5151_v1, %v5150_v4  ;;  %v5870_v1 = vld [vmem:[#allocation2 + $0x5b0] sm:$0xff] }
0x11fc   :  { %v4778_v10 = vadd.f32 %v4776_v6, %v4765_v9  ;;  %v4989_v9 = vld [vmem:[#allocation2 + $0x470] sm:$0xff] }
0x11fd   :  { %v4783_v12 = vmul.f32 0.01, %v4779_v8  ;;  %vm4781_vm14 = vcmp.ge.f32.partialorder %v4779_v8, 0.0 }
0x11fe   :  { %v4782_v13 = vmul.f32 0.01, %v4778_v10  ;;  %vm4780_vm15 = vcmp.ge.f32.partialorder %v4778_v10, 0.0 }
0x11ff   :  { %v4785_v14 = vsel %vm4781_vm14, %v4779_v8, %v4783_v12  ;;  %v4988_v8 = vld [vmem:[#allocation2 + $0x468] sm:$0xff]  ;;  %v4990_v12 = vld [vmem:[#allocation2 + $0x478] sm:$0xff] }
0x1200   :  { %v4789_v15 = vsel %vm1089_vm4, %v4785_v14, 0.0  ;;  %v4784_v16 = vsel %vm4780_vm15, %v4778_v10, %v4782_v13  ;;  %v8335_v10 = vpack.c.bf16 %v4989_v9, %v4988_v8  ;;  %v4991_v13 = vld [vmem:[#allocation2 + $0x480] sm:$0xff]  ;;  %v5722_v8 = vld [vmem:[#allocation4 + $0x1b8] sm:$0xff] }
0x1201   :  { %4790 = vadd.xlane.f32.xlu0 %v4789_v15  ;;  %v4786_v17 = vsel %vm1089_vm4, %v4784_v16, 0.0  ;;  %v5558_v9 = vld [vmem:[#allocation4 + $0x1a8] sm:$0xff] }
0x1202   :  { %4787 = vadd.xlane.f32.xlu1 %v4786_v17  ;;  %v4992_v17 = vld [vmem:[#allocation2 + $0x488] sm:$0xff] }
0x1213   :  { %4821 = vperm.xlu1 %8476, %v4813_v18   ;;  %v4993_v18 = vld [vmem:[#allocation2 + $0x490] sm:$0xff] }
0x1217   :  { %4816 = vperm.xlu0 %8477, %v4812_v19   ;;  %v8341_v19 = vpack.c.bf16 %v4993_v18, %v4992_v17  ;;  %v5876_v18 = vld [vmem:[#allocation2 + $0x5e0] sm:$0xff] }
0x128e   :  { %v4791_v20 = vpop.xlane.xlu0 %4790 }
0x128f   :  { %v4793_v21 = vmul.f32 0.015625, %v4791_v20  ;;  %v4788_v22 = vpop.xlane.xlu1 %4787  ;;  %v4994_v20 = vld [vmem:[#allocation2 + $0x498] sm:$0xff] }
0x1290   :  { %v4792_v23 = vmul.f32 0.015625, %v4788_v22 }
0x1291   :  { %v4795_v24 = vsub.f32 %v4785_v14, %v4793_v21  ;;  %v4995_v21 = vld [vmem:[#allocation2 + $0x4a0] sm:$0xff] }
0x1292   :  { %v4794_v25 = vsub.f32 %v4784_v16, %v4792_v23  ;;  %v8338_v16 = vpack.c.bf16 %v4991_v13, %v4990_v12  ;;  %v8344_v22 = vpack.c.bf16 %v4995_v21, %v4994_v20  ;;  %v5299_v23 = vld [vmem:[#allocation4 + $0x190] sm:$0xff]  ;;  %v5872_v12 = vld [vmem:[#allocation2 + $0x5c0] sm:$0xff]  ;;  %v5878_v21 = vld [vmem:[#allocation2 + $0x5f0] sm:$0xff] }
0x1293   :  { %v4797_v26 = vmul.f32 %v4795_v24, %v4795_v24  ;;  %v4822_v33 = vpop.permute.xlu1 %4821  ;;  %v5873_v13 = vld [vmem:[#allocation2 + $0x5c8] sm:$0xff] }
0x1294   :  { %v4796_v27 = vmul.f32 %v4794_v25, %v4794_v25 }
0x1295   :  { %v4801_v28 = vsel %vm1089_vm4, %v4797_v26, 0.0  ;;  %v5298_v26 = vld [vmem:[#allocation4 + $0x188] sm:$0xff] }
0x1296   :  { %4802 = vadd.xlane.f32.xlu1 %v4801_v28  ;;  %v4798_v31 = vsel %vm1089_vm4, %v4796_v27, 0.0  ;;  %v4817_v34 = vpop.permute.xlu0 %4816  ;;  %v5449_v28 = vld [vmem:[#allocation2 + $0x500] sm:$0xff] }
0x1297   :  { %4799 = vadd.xlane.f32.xlu0 %v4798_v31 }
0x12a7   :  { %4830 = vperm.xlu1 %8476, %v4826_v29   ;;  %v5450_v29 = vld [vmem:[#allocation2 + $0x508] sm:$0xff] }
0x12ad   :  { %4835 = vperm.xlu0 %8477, %v4827_v30   ;;  %v5451_v30 = vld [vmem:[#allocation2 + $0x510] sm:$0xff] }
0x12ae   :  { %v8359_v32 = vpack.c.bf16 %v5451_v30, %v5450_v29  ;;  %v5885_v29 = vld [vmem:[#allocation2 + $0x628] sm:$0xff] }
0x1323   :  { %v4803_v35 = vpop.xlane.xlu1 %4802 }
0x1324   :  { %v4805_v36 = vmul.f32 0.015625, %v4803_v35  ;;  %v4800_v37 = vpop.xlane.xlu0 %4799 }
0x1325   :  { %v4804_v38 = vmul.f32 0.015625, %v4800_v37 }
0x1326   :  { %v4807_v39 = vadd.f32 1e-05, %v4805_v36 }
0x1327   :  { %v4806_v40 = vadd.f32 1e-05, %v4804_v38  ;;  %v4831_v48 = vpop.permute.xlu1 %4830 }
0x1328   :  { %8492 = vrsqrt.f32 %v4807_v39 }
0x1329   :  { %8494 = vrsqrt.f32 %v4806_v40 }
0x132c   :  { %v4836_v47 = vpop.permute.xlu0 %4835 }
0x1332   :  { %v8493_v41 = vpop.eup %8492 }
0x1333   :  { %v8495_v42 = vpop.eup %8494  ;;  %v4811_v43 = vmul.f32 %v8493_v41, %v4795_v24  ;;  %v5446_v24 = vld [vmem:[#allocation2 + $0x4e8] sm:$0xff] }
0x1334   :  { %v4810_v44 = vmul.f32 %v8495_v42, %v4794_v25  ;;  %v5447_v25 = vld [vmem:[#allocation2 + $0x4f0] sm:$0xff] }
0x1335   :  { %v4825_v45 = vmul.f32 %v4822_v33, %v4811_v43  ;;  %v8353_v27 = vpack.c.bf16 %v5447_v25, %v5446_v24  ;;  %v5452_v33 = vld [vmem:[#allocation2 + $0x518] sm:$0xff]  ;;  %v5880_v24 = vld [vmem:[#allocation2 + $0x600] sm:$0xff]  ;;  %v5881_v25 = vld [vmem:[#allocation2 + $0x608] sm:$0xff] }
0x1336   :  { %v4824_v46 = vmul.f32 %v4817_v34, %v4810_v44  ;;  %v5453_v34 = vld [vmem:[#allocation2 + $0x520] sm:$0xff]  ;;  %v5528_v44 = vld [vmem:[#allocation2 + $0x528] sm:$0xff] }
0x1337   :  { %v4839_v49 = vadd.f32 %v4836_v47, %v4825_v45  ;;  %v8362_v35 = vpack.c.bf16 %v5453_v34, %v5452_v33  ;;  %v5707_v33 = vld [vmem:[#allocation2 + $0x538] sm:$0xff] }
0x1338   :  { %v4838_v50 = vadd.f32 %v4831_v48, %v4824_v46 }
0x133a   :  { %v8934_v51 = vpack.c.bf16 %v4839_v49, %v4838_v50  ;;  %v5551_v50 = vld [vmem:[#allocation4 + $0x1a0] sm:$0xff] }
0x133c   :  { %8315 = vmatpush3.bf16.msra.mxu0 %v8934_v51 }
0x133d   :  { %8316 = vmatprep.subr.bf16.mxu0 %v8552_v11 }
0x133f   :  { %7788 = vmatmul.mubr.msk.f32.vlgmr.msra.gmra.mrb[94].mxu0 %vm1148_vm6, %v4840_v52 }
0x1340   :  { %8318 = vmatpush3.bf16.msra.mxu0 %v8670_v57  ;;  %7794 = vmatprep.mubr.msk.f32.mxu0 %vm8551_vm0, %v8550_v0 }
0x1341   :  { %8319 = vmatprep.subr.bf16.mxu0 %v8552_v11 }
0x1343   :  { %7795 = vmatmul.mubr.msk.f32.vlgmr.msra.gmra.mrb[96].mxu0 %vm1148_vm6, %v4997_v54 }
0x1344   :  { %8321 = vmatpush3.bf16.msra.mxu0 %v8934_v51  ;;  %7801 = vmatprep.mubr.msk.f32.mxu0 %vm8551_vm0, %v8550_v0 }
0x1345   :  { %8322 = vmatprep.subr.bf16.mxu0 %v8552_v11 }
0x134b   :  { %7802 = vmatmul.mubr.msk.f32.vlgmr.msra.gmra.mrb[96].mxu0 %vm1148_vm6, %v4996_v58  ;;  %v5723_v58 = vld [vmem:[#allocation4 + $0x1c0] sm:$0xff] }
0x134c   :  { %8324 = vmatpush3.bf16.msra.mxu0 %v8323_v59  ;;  %7820 = vmatprep.mubr.msk.f32.mxu0 %vm8551_vm0, %v8550_v0  ;;  %v5559_v59 = vld [vmem:[#allocation4 + $0x1b0] sm:$0xff] }
0x134d   :  { %8325 = vmatprep.subr.bf16.mxu0 %v8552_v11  ;;  %7888 = vmatmul.mubr.msk.f32.vlgmr.msra.gmra.mrb[146].mxu1 %vm44_vm1, %v5723_v58  ;;  %v6174_v58 = vld [vmem:[#allocation2 + $0x630] sm:$0xff] }
0x134e   :  { %7892 = vmatprep.mubr.msk.f32.mxu1 %vm8551_vm0, %v8550_v0 }
0x1350   :  { %8327 = vmatpush3.bf16.msra.mxu0 %v8326_v62 }
0x1351   :  { %8328 = vmatprep.subr.bf16.mxu0 %v8552_v11 }
0x1354   :  { %8330 = vmatpush3.bf16.msra.mxu0 %v8329_v3 }
0x1355   :  { %8331 = vmatprep.subr.bf16.mxu0 %v8552_v11 }
0x1358   :  { %8333 = vmatpush3.bf16.msra.mxu0 %v8332_v5  ;;  %v5871_v5 = vld [vmem:[#allocation2 + $0x5b8] sm:$0xff] }
0x1359   :  { %8334 = vmatprep.subr.bf16.mxu0 %v8552_v11 }
0x1412   :  { %v4984_v6 = vpop.f32.mrb[94].mxu0 }
0x1413   :  { %v7789_v7 = vpop.f32.mrb[95].mxu0 }
0x141e   :  { %v5140_v14 = vpop.f32.mrb[96].mxu0 }
0x141f   :  { %7821 = vmatmul.mubr.msk.f32.vlgmr.msra.gmra.mrb[98].mxu0 %vm1089_vm4, %v5140_v14  ;;  %v7803_v15 = vpop.f32.mrb[97].mxu0  ;;  %v8368_v14 = vpack.c.bf16 %v5873_v13, %v5872_v12  ;;  %v6026_v12 = vld [vmem:[#allocation4 + $0x1c8] sm:$0xff] }
0x1420   :  { %8336 = vmatpush3.bf16.msra.mxu0 %v8335_v10  ;;  %7839 = vmatprep.mubr.msk.f32.mxu0 %vm8551_vm0, %v8550_v0  ;;  %v8365_v10 = vpack.c.bf16 %v5871_v5, %v5870_v1  ;;  %v5874_v15 = vld [vmem:[#allocation2 + $0x5d0] sm:$0xff]  ;;  %v6027_v1 = vld [vmem:[#allocation4 + $0x1d0] sm:$0xff] }
0x1421   :  { %8337 = vmatprep.subr.bf16.mxu0 %v8552_v11 }
0x1424   :  { %8339 = vmatpush3.bf16.msra.mxu0 %v8338_v16  ;;  %v5875_v16 = vld [vmem:[#allocation2 + $0x5d8] sm:$0xff] }
0x1425   :  { %8340 = vmatprep.subr.bf16.mxu0 %v8552_v11  ;;  %v8371_v17 = vpack.c.bf16 %v5875_v16, %v5874_v15  ;;  %v6183_v15 = vld [vmem:[#allocation2 + $0x678] sm:$0xff]  ;;  %v6185_v16 = vld [vmem:[#allocation2 + $0x688] sm:$0xff] }
0x1428   :  { %8342 = vmatpush3.bf16.msra.mxu0 %v8341_v19  ;;  %v5877_v19 = vld [vmem:[#allocation2 + $0x5e8] sm:$0xff] }
0x1429   :  { %8343 = vmatprep.subr.bf16.mxu0 %v8552_v11  ;;  %v8374_v20 = vpack.c.bf16 %v5877_v19, %v5876_v18  ;;  %v6186_v18 = vld [vmem:[#allocation2 + $0x690] sm:$0xff]  ;;  %v6187_v19 = vld [vmem:[#allocation2 + $0x698] sm:$0xff] }
0x142c   :  { %8345 = vmatpush3.bf16.msra.mxu0 %v8344_v22  ;;  %v5879_v22 = vld [vmem:[#allocation2 + $0x5f8] sm:$0xff] }
0x142d   :  { %8346 = vmatprep.subr.bf16.mxu0 %v8552_v11 }
0x142f   :  { %7840 = vmatmul.mubr.msk.f32.vlgmr.msra.gmra.mrb[100].mxu0 %vm1089_vm4, %v4984_v6 }
0x1430   :  { %8348 = vmatpush3.bf16.msra.mxu0 %v8670_v57  ;;  %7846 = vmatprep.mubr.msk.f32.mxu0 %vm8551_vm0, %v8550_v0  ;;  %v5448_v57 = vld [vmem:[#allocation2 + $0x4f8] sm:$0xff] }
0x1431   :  { %8349 = vmatprep.subr.bf16.mxu0 %v8552_v11  ;;  %v8356_v31 = vpack.c.bf16 %v5449_v28, %v5448_v57  ;;  %v5883_v57 = vld [vmem:[#allocation2 + $0x618] sm:$0xff] }
0x1433   :  { %7847 = vmatmul.mubr.msk.f32.vlgmr.msra.gmra.mrb[102].mxu0 %vm1148_vm6, %v5299_v23  ;;  %v8377_v23 = vpack.c.bf16 %v5879_v22, %v5878_v21  ;;  %v6188_v21 = vld [vmem:[#allocation2 + $0x6a0] sm:$0xff]  ;;  %v6189_v22 = vld [vmem:[#allocation2 + $0x6a8] sm:$0xff] }
0x1434   :  { %8351 = vmatpush3.bf16.msra.mxu0 %v8934_v51  ;;  %7853 = vmatprep.mubr.msk.f32.mxu0 %vm8551_vm0, %v8550_v0 }
0x1435   :  { %8352 = vmatprep.subr.bf16.mxu0 %v8552_v11 }
0x143b   :  { %7854 = vmatmul.mubr.msk.f32.vlgmr.msra.gmra.mrb[102].mxu0 %vm1148_vm6, %v5298_v26  ;;  %v8380_v26 = vpack.c.bf16 %v5881_v25, %v5880_v24 }
0x143c   :  { %8354 = vmatpush3.bf16.msra.mxu0 %v8353_v27  ;;  %7872 = vmatprep.mubr.msk.f32.mxu0 %vm8551_vm0, %v8550_v0  ;;  %v5882_v27 = vld [vmem:[#allocation2 + $0x610] sm:$0xff] }
0x143d   :  { %8355 = vmatprep.subr.bf16.mxu0 %v8552_v11  ;;  %v8383_v28 = vpack.c.bf16 %v5883_v57, %v5882_v27 }
0x1440   :  { %8357 = vmatpush3.bf16.msra.mxu0 %v8356_v31  ;;  %v5884_v31 = vld [vmem:[#allocation2 + $0x620] sm:$0xff] }
0x1441   :  { %8358 = vmatprep.subr.bf16.mxu0 %v8552_v11  ;;  %v8386_v30 = vpack.c.bf16 %v5885_v29, %v5884_v31 }
0x1444   :  { %8360 = vmatpush3.bf16.msra.mxu0 %v8359_v32  ;;  %v5706_v32 = vld [vmem:[#allocation2 + $0x530] sm:$0xff] }
0x1445   :  { %8361 = vmatprep.subr.bf16.mxu0 %v8552_v11  ;;  %v8389_v34 = vpack.c.bf16 %v5707_v33, %v5706_v32 }
0x1448   :  { %8363 = vmatpush3.bf16.msra.mxu0 %v8362_v35  ;;  %v5708_v35 = vld [vmem:[#allocation2 + $0x540] sm:$0xff] }
0x1449   :  { %7875 = vmatprep.subr.mxu0 %v8550_v0 }
0x14f2   :  { %v5221_v36 = vpop.f32.mrb[98].mxu0 }
0x14f3   :  { %v7822_v37 = vpop.f32.mrb[99].mxu0 }
0x1502   :  { %v5294_v38 = vpop.f32.mrb[100].mxu0 }
0x1503   :  { %v5295_v39 = vadd.f32 %v5294_v38, %v5221_v36  ;;  %v7841_v40 = vpop.f32.mrb[101].mxu0  ;;  %v5709_v36 = vld [vmem:[#allocation2 + $0x548] sm:$0xff]  ;;  %v5710_v38 = vld [vmem:[#allocation2 + $0x550] sm:$0xff] }
0x1504   :  { %v8392_v37 = vpack.c.bf16 %v5709_v36, %v5708_v35 }
0x150e   :  { %v5442_v41 = vpop.f32.mrb[102].mxu0 }
0x150f   :  { %7873 = vmatmul.mubr.msk.f32.vlgmr.msra.gmra.mrb[104].mxu0 %vm1089_vm4, %v5442_v41  ;;  %v7855_v42 = vpop.f32.mrb[103].mxu0  ;;  %v5712_v41 = vld [vmem:[#allocation2 + $0x560] sm:$0xff] }
0x1510   :  { %7876 = vmatpush3.msra.mxu0 %v8650_v53  ;;  %7877 = vmatprep.mubr.msk.f32.mxu0 %vm8551_vm0, %v8550_v0  ;;  %v5713_v42 = vld [vmem:[#allocation2 + $0x568] sm:$0xff] }
0x1511   :  { %7880 = vmatprep.subr.mxu0 %v8550_v0 }
0x1513   :  { %7878 = vmatmul.mubr.msk.f32.vlgmr.msra.gmra.mrb[106].mxu0 %vm44_vm1, %v5559_v59  ;;  %v6175_v59 = vld [vmem:[#allocation2 + $0x638] sm:$0xff] }
0x1514   :  { %7882 = vmatprep.mubr.msk.f32.mxu0 %vm8551_vm0, %v8550_v0 }
0x15e2   :  { %v5523_v43 = vpop.f32.mrb[104].mxu0 }
0x15e3   :  { %v5527_v45 = vadd.f32 %v5523_v43, %v5295_v39  ;;  %v7874_v46 = vpop.f32.mrb[105].mxu0  ;;  %v5711_v39 = vld [vmem:[#allocation2 + $0x558] sm:$0xff]  ;;  %v8398_v43 = vpack.c.bf16 %v5713_v42, %v5712_v41 }
0x15e4   :  { %v8395_v40 = vpack.c.bf16 %v5711_v39, %v5710_v38 }
0x15e5   :  { %v5529_v47 = vadd.f32 %v5528_v44, %v5527_v45  ;;  %v5714_v44 = vld [vmem:[#allocation2 + $0x570] sm:$0xff]  ;;  %v5715_v45 = vld [vmem:[#allocation2 + $0x578] sm:$0xff] }
0x15e6   :  { %v8401_v46 = vpack.c.bf16 %v5715_v45, %v5714_v44 }
0x15e7   :  { %vm5530_vm2 = vcmp.ge.f32.partialorder %v5529_v47, 0.0  ;;  %v5531_v48 = vmul.f32 0.01, %v5529_v47 }
0x15e9   :  { %v5532_v49 = vsel %vm5530_vm2, %v5529_v47, %v5531_v48  ;;  %v5716_v47 = vld [vmem:[#allocation2 + $0x580] sm:$0xff]  ;;  %v5717_v48 = vld [vmem:[#allocation2 + $0x588] sm:$0xff] }
0x15ea   :  { %5533 = vadd.xlane.f32.xlu1 %v5532_v49 }
0x15fb   :  { %5554 = vperm.xlu1 %8476, %v5551_v50   ;;  %v5718_v50 = vld [vmem:[#allocation2 + $0x590] sm:$0xff] }
0x1677   :  { %v5534_v51 = vpop.xlane.xlu1 %5533 }
0x1678   :  { %v5535_v52 = vmul.f32 0.0078125, %v5534_v51  ;;  %v5719_v51 = vld [vmem:[#allocation2 + $0x598] sm:$0xff] }
0x167a   :  { %v5536_v54 = vsub.f32 %v5532_v49, %v5535_v52  ;;  %v8404_v49 = vpack.c.bf16 %v5717_v48, %v5716_v47  ;;  %v8407_v52 = vpack.c.bf16 %v5719_v51, %v5718_v50 }
0x167b   :  { %v5555_v6 = vpop.permute.xlu1 %5554 }
0x167c   :  { %v5537_v55 = vmul.f32 %v5536_v54, %v5536_v54 }
0x167e   :  { %5538 = vadd.xlane.f32.xlu0 %v5537_v55  ;;  %v5721_v55 = vld [vmem:[#allocation2 + $0x5a8] sm:$0xff] }
0x1694   :  { %5547 = vperm.xlu0 %8477, %v5544_v56  }
0x170b   :  { %v5539_v60 = vpop.xlane.xlu0 %5538 }
0x170c   :  { %v5540_v61 = vmul.f32 0.0078125, %v5539_v60  ;;  %v8413_v60 = vpack.c.bf16 %v6175_v59, %v6174_v58 }
0x170e   :  { %v5541_v62 = vadd.f32 1e-05, %v5540_v61 }
0x1710   :  { %8496 = vrsqrt.f32 %v5541_v62 }
0x1713   :  { %v5548_v3 = vpop.permute.xlu0 %5547 }
0x171a   :  { %v8497_v63 = vpop.eup %8496 }
0x171b   :  { %v5543_v2 = vmul.f32 %v8497_v63, %v5536_v54  ;;  %v5720_v54 = vld [vmem:[#allocation2 + $0x5a0] sm:$0xff] }
0x171c   :  { %v8410_v56 = vpack.c.bf16 %v5721_v55, %v5720_v54  ;;  %v6176_v63 = vld [vmem:[#allocation2 + $0x640] sm:$0xff] }
0x171d   :  { %v5550_v4 = vmul.f32 %v5548_v3, %v5543_v2  ;;  %v6177_v2 = vld [vmem:[#allocation2 + $0x648] sm:$0xff] }
0x171e   :  { %v8416_v5 = vpack.c.bf16 %v6177_v2, %v6176_v63 }
0x171f   :  { %v8990_v7 = vadd.f32 %v5555_v6, %v5550_v4  ;;  %v6178_v6 = vld [vmem:[#allocation2 + $0x650] sm:$0xff] }
0x1721   :  { %7881 = vmatpush3.msra.mxu0 %v8990_v7  ;;  %7891 = vmatpush3.msra.mxu1 %v8990_v7 }
0x1722   :  { %7893 = vmatmul.mubr.msk.f32.vlgmr.msra.gmra.mrb[146].mxu1 %vm44_vm1, %v5722_v8  ;;  %7883 = vmatmul.mubr.msk.f32.vlgmr.msra.gmra.mrb[106].mxu0 %vm44_vm1, %v5558_v9  ;;  %v6179_v8 = vld [vmem:[#allocation2 + $0x658] sm:$0xff]  ;;  %v6180_v9 = vld [vmem:[#allocation2 + $0x660] sm:$0xff] }
0x1723   :  { %8364 = vmatprep.subr.bf16.mxu0 %v8552_v11  ;;  %7927 = vmatprep.mubr.msk.f32.mxu0 %vm8551_vm0, %v8550_v0 }
0x1724   :  { %8366 = vmatpush3.bf16.msra.mxu0 %v8365_v10  ;;  %8388 = vmatprep.subr.bf16.mxu1 %v8552_v11  ;;  %v6181_v10 = vld [vmem:[#allocation2 + $0x668] sm:$0xff] }
0x1725   :  { %8367 = vmatprep.subr.bf16.mxu0 %v8552_v11  ;;  %7962 = vmatprep.mubr.msk.f32.mxu1 %vm8551_vm0, %v8550_v0  ;;  %v8422_v13 = vpack.c.bf16 %v6181_v10, %v6180_v9 }
0x1726   :  { %8390 = vmatpush3.bf16.msra.mxu1 %v8389_v34 }
0x1727   :  { %8391 = vmatprep.subr.bf16.mxu1 %v8552_v11 }
0x1728   :  { %8369 = vmatpush3.bf16.msra.mxu0 %v8368_v14  ;;  %v6182_v14 = vld [vmem:[#allocation2 + $0x670] sm:$0xff] }
0x1729   :  { %8370 = vmatprep.subr.bf16.mxu0 %v8552_v11 }
0x172a   :  { %8393 = vmatpush3.bf16.msra.mxu1 %v8392_v37 }
0x172b   :  { %8394 = vmatprep.subr.bf16.mxu1 %v8552_v11 }
0x172c   :  { %8372 = vmatpush3.bf16.msra.mxu0 %v8371_v17 }
0x172d   :  { %8373 = vmatprep.subr.bf16.mxu0 %v8552_v11 }
0x172e   :  { %8396 = vmatpush3.bf16.msra.mxu1 %v8395_v40 }
0x172f   :  { %8397 = vmatprep.subr.bf16.mxu1 %v8552_v11 }
0x1730   :  { %8375 = vmatpush3.bf16.msra.mxu0 %v8374_v20  ;;  %v8431_v20 = vpack.c.bf16 %v6187_v19, %v6186_v18 }
0x1731   :  { %8376 = vmatprep.subr.bf16.mxu0 %v8552_v11 }
0x1732   :  { %8399 = vmatpush3.bf16.msra.mxu1 %v8398_v43 }
0x1733   :  { %8400 = vmatprep.subr.bf16.mxu1 %v8552_v11 }
0x1734   :  { %8378 = vmatpush3.bf16.msra.mxu0 %v8377_v23  ;;  %v8434_v23 = vpack.c.bf16 %v6189_v22, %v6188_v21 }
0x1735   :  { %8379 = vmatprep.subr.bf16.mxu0 %v8552_v11 }
0x1736   :  { %8402 = vmatpush3.bf16.msra.mxu1 %v8401_v46 }
0x1737   :  { %8403 = vmatprep.subr.bf16.mxu1 %v8552_v11 }
0x1738   :  { %8381 = vmatpush3.bf16.msra.mxu0 %v8380_v26 }
0x1739   :  { %8382 = vmatprep.subr.bf16.mxu0 %v8552_v11 }
0x173a   :  { %8405 = vmatpush3.bf16.msra.mxu1 %v8404_v49 }
0x173b   :  { %8406 = vmatprep.subr.bf16.mxu1 %v8552_v11 }
0x173c   :  { %8384 = vmatpush3.bf16.msra.mxu0 %v8383_v28 }
0x173d   :  { %8385 = vmatprep.subr.bf16.mxu0 %v8552_v11 }
0x173e   :  { %8408 = vmatpush3.bf16.msra.mxu1 %v8407_v52 }
0x173f   :  { %8409 = vmatprep.subr.bf16.mxu1 %v8552_v11 }
0x1740   :  { %8387 = vmatpush3.bf16.msra.mxu0 %v8386_v30  ;;  %v6261_v30 = vld [vmem:[#allocation2 + $0x6b0] sm:$0xff] }
0x1741   :  { %7965 = vmatprep.subr.mxu0 %v8550_v0 }
0x1742   :  { %8411 = vmatpush3.bf16.msra.mxu1 %v8410_v56 }
0x1743   :  { %8412 = vmatprep.subr.bf16.mxu1 %v8552_v11 }
0x17f5   :  { %v5866_v61 = vpop.f32.mrb[146].mxu1  ;;  %v5702_v62 = vpop.f32.mrb[106].mxu0 }
0x17f6   :  { %7928 = vmatmul.mubr.f32.vlgmr.msra.gmra.mrb[108].mxu0 %v5866_v61  ;;  %v7894_v3 = vpop.f32.mrb[147].mxu1  ;;  %7963 = vmatmul.mubr.f32.vlgmr.msra.gmra.mrb[148].mxu1 %v5702_v62  ;;  %v7884_v4 = vpop.f32.mrb[107].mxu0 }
0x17f7   :  { %7966 = vmatpush3.msra.mxu0 %v8650_v53  ;;  %7967 = vmatprep.mubr.msk.f32.mxu0 %vm8551_vm0, %v8550_v0  ;;  %v8419_v53 = vpack.c.bf16 %v6179_v8, %v6178_v6 }
0x17f8   :  { %7970 = vmatprep.subr.mxu0 %v8550_v0  ;;  %8414 = vmatpush3.bf16.msra.mxu1 %v8413_v60 }
0x17f9   :  { %8415 = vmatprep.subr.bf16.mxu1 %v8552_v11  ;;  %8007 = vmatprep.mubr.msk.f32.mxu1 %vm8551_vm0, %v8550_v0 }
0x17fa   :  { %7968 = vmatmul.mubr.msk.f32.vlgmr.msra.gmra.mrb[110].mxu0 %vm44_vm1, %v6027_v1 }
0x17fb   :  { %7971 = vmatpush3.msra.mxu0 %v8990_v7  ;;  %7972 = vmatprep.mubr.msk.f32.mxu0 %vm8551_vm0, %v8550_v0  ;;  %v8425_v7 = vpack.c.bf16 %v6183_v15, %v6182_v14  ;;  %v6184_v0 = vld [vmem:[#allocation2 + $0x680] sm:$0xff] }
0x17fc   :  { %8417 = vmatpush3.bf16.msra.mxu1 %v8416_v5  ;;  %v8428_v17 = vpack.c.bf16 %v6185_v16, %v6184_v0 }
0x17fd   :  { %8418 = vmatprep.subr.bf16.mxu1 %v8552_v11 }
0x1800   :  { %8420 = vmatpush3.bf16.msra.mxu1 %v8419_v53 }
0x1801   :  { %8421 = vmatprep.subr.bf16.mxu1 %v8552_v11 }
0x1802   :  { %7973 = vmatmul.mubr.msk.f32.vlgmr.msra.gmra.mrb[110].mxu0 %vm44_vm1, %v6026_v12 }
0x1804   :  { %8423 = vmatpush3.bf16.msra.mxu1 %v8422_v13 }
0x1805   :  { %8424 = vmatprep.subr.bf16.mxu1 %v8552_v11 }
0x1808   :  { %8426 = vmatpush3.bf16.msra.mxu1 %v8425_v7 }
0x1809   :  { %8427 = vmatprep.subr.bf16.mxu1 %v8552_v11 }
0x180c   :  { %8429 = vmatpush3.bf16.msra.mxu1 %v8428_v17 }
0x180d   :  { %8430 = vmatprep.subr.bf16.mxu1 %v8552_v11 }
0x1810   :  { %8432 = vmatpush3.bf16.msra.mxu1 %v8431_v20 }
0x1811   :  { %8433 = vmatprep.subr.bf16.mxu1 %v8552_v11 }
0x1814   :  { %8435 = vmatpush3.bf16.msra.mxu1 %v8434_v23 }
0x18c9   :  { %v5952_v24 = vpop.f32.mrb[108].mxu0  ;;  %v6022_v25 = vpop.f32.mrb[148].mxu1 }
0x18ca   :  { %v7929_v26 = vpop.f32.mrb[109].mxu0  ;;  %v6023_v27 = vadd.f32 %v6022_v25, %v5952_v24  ;;  %v7964_v57 = vpop.f32.mrb[149].mxu1 }
0x18d5   :  { %v6170_v28 = vpop.f32.mrb[110].mxu0 }
0x18d6   :  { %8008 = vmatmul.mubr.f32.vlgmr.msra.gmra.mrb[150].mxu1 %v6170_v28  ;;  %v7974_v31 = vpop.f32.mrb[111].mxu0 }
0x19a9   :  { %v6256_v29 = vpop.f32.mrb[150].mxu1 }
0x19aa   :  { %v6260_v32 = vadd.f32 %v6256_v29, %v6023_v27  ;;  %v8009_v33 = vpop.f32.mrb[151].mxu1 }
0x19ac   :  { %v6262_v34 = vadd.f32 %v6261_v30, %v6260_v32 }
0x19ae   :  { %6263 = vst [vmem:[%s9042_s3] sm:$0xff] %v6262_v34 }
0x19af   :  { %6268 = vsyncpa [#allocation3], 1 }
0x19b0   :  { %6269 = vsyncpa [#allocation5], 1 }

</bundles_post_ra>
